<compile_context>
chip_gen: v5e
topology: v5e:2x2
jax: 0.10.0
libtpu: 0.0.40
codegen_flags: <defaults>
</compile_context>

<pallas_src>
import numpy as np
import jax
import jax.numpy as jnp
from jax.experimental import pallas as pl
from jax.experimental.pallas import tpu as pltpu

_BN_EPS = 1e-5
_OUT_REAL = 3 * 7 * 7     # 147
_OUT_PAD = 256            # lane-dense padded output width


# --------------------------------------------------------------------------
# Pallas kernel
# --------------------------------------------------------------------------
def _bn_relu(x, sum_mat, bcast_mat):
    """Training-mode BatchNorm2d (gamma=1, beta=0) + ReLU on NCHW-flattened x.

    x:         (B, C*HW) f32, channel-major / spatial-minor columns.
    sum_mat:   (C*HW, C)  one-hot f32 summing each channel block.
    bcast_mat: (C, C*HW)  one-hot f32 broadcasting per-channel values back.
    All statistics math stays in f32.  The 1/(B*HW) normalizer is a trace-time
    constant, so the one-hot matrices are batch-size independent.
    """
    B, CHW = x.shape
    C = sum_mat.shape[1]
    HW = CHW // C
    inv = 1.0 / float(B * HW)

    s1 = jnp.sum(x, axis=0, keepdims=True)          # (1, CHW)  sum x
    s2 = jnp.sum(x * x, axis=0, keepdims=True)      # (1, CHW)  sum x^2
    # Stack the two moments into (2, CHW) so one matmul reduces both
    # (iota/select instead of sublane concat for robust lowering).
    rows = jax.lax.broadcasted_iota(jnp.int32, (2, CHW), 0)
    stacked = jnp.where(rows == 0,
                        jnp.broadcast_to(s1, (2, CHW)),
                        jnp.broadcast_to(s2, (2, CHW)))
    stats_c = jnp.dot(stacked, sum_mat,
                      preferred_element_type=jnp.float32) * inv       # (2, C)

    # Normalization coefficients computed in the compact per-channel space.
    mean_c = stats_c[0:1, :]
    ex2_c = stats_c[1:2, :]
    var_c = ex2_c - mean_c * mean_c
    scale_c = jax.lax.rsqrt(var_c + _BN_EPS)    # gamma = 1 folded in
    shift_c = -mean_c * scale_c                 # beta  = 0 folded in

    rows_c = jax.lax.broadcasted_iota(jnp.int32, (2, C), 0)
    ss_c = jnp.where(rows_c == 0,
                     jnp.broadcast_to(scale_c, (2, C)),
                     jnp.broadcast_to(shift_c, (2, C)))
    ss = jnp.dot(ss_c, bcast_mat,
                 preferred_element_type=jnp.float32)                  # (2, CHW)
    scale = ss[0:1, :]
    shift = ss[1:2, :]
    return jnp.maximum(x * scale + shift, 0.0)


def generative_kernel(noise_ref, w1_ref, w2_ref, wd1_ref, s1m_ref, c1m_ref,
                      wd2_ref, s2m_ref, c2m_ref, wo_ref, bias_ref, out_ref):
    bf = jnp.bfloat16
    # Packed f32 biases: [0:512) = b1, [512:768) = b2, [768:1024) = bo_pad.
    b1 = bias_ref[:, 0:512]
    b2 = bias_ref[:, 512:768]
    bo = bias_ref[:, 768:1024]

    # fc1: Linear(L,512) -> ReLU -> Linear(512,256) -> ReLU  (bf16 x bf16 MXU)
    x = noise_ref[...].astype(bf)                                      # (B, L)
    h = jnp.dot(x, w1_ref[...], preferred_element_type=jnp.float32) + b1
    h = jnp.maximum(h, 0.0)
    h = jnp.dot(h.astype(bf), w2_ref[...],
                preferred_element_type=jnp.float32) + b2
    h = jnp.maximum(h, 0.0)                                             # (B, 256)

    # deconv1: ConvTranspose2d(256,128,k=4,s=2,p=1) 1x1 -> 2x2, + BN + ReLU
    # (deconv bias dropped: exactly cancelled by training-mode BN mean subtract)
    d1 = jnp.dot(h.astype(bf), wd1_ref[...],
                 preferred_element_type=jnp.float32)
    d1 = _bn_relu(d1, s1m_ref[...], c1m_ref[...])                       # (B, 512)

    # deconv2: ConvTranspose2d(128,64,k=4,s=2,p=1) 2x2 -> 4x4, + BN + ReLU
    d2 = jnp.dot(d1.astype(bf), wd2_ref[...],
                 preferred_element_type=jnp.float32)
    d2 = _bn_relu(d2, s2m_ref[...], c2m_ref[...])                       # (B, 1024)

    # output: ConvTranspose2d(64,3,k=4,s=1,p=0) 4x4 -> 7x7 (padded to 256), + tanh
    o = jnp.dot(d2.astype(bf), wo_ref[...],
                preferred_element_type=jnp.float32) + bo
    out_ref[...] = jnp.tanh(o)                                          # (B, 256)


def generative_forward(noise, kernel_args, group=None):
    """Run the fused forward.  `group` samples are processed per grid step
    (BatchNorm statistics are per group).  Default: one group = whole batch,
    which matches PyTorch whole-batch training-mode BN exactly."""
    B, L = noise.shape
    if group is None:
        group = B
    assert B % group == 0 and group % 8 == 0
    n_groups = B // group

    # Weights / one-hot matrices: constant block index -> stay VMEM-resident
    # across grid steps (no re-DMA); only noise/output blocks advance.
    weight_specs = [pl.BlockSpec(a.shape, lambda g: (0, 0)) for a in kernel_args]

    out_flat = pl.pallas_call(
        generative_kernel,
        out_shape=jax.ShapeDtypeStruct((B, _OUT_PAD), jnp.float32),
        grid=(n_groups,),
        in_specs=[pl.BlockSpec((group, L), lambda g: (g, 0))] + weight_specs,
        out_specs=pl.BlockSpec((group, _OUT_PAD), lambda g: (g, 0)),
        compiler_params=pltpu.CompilerParams(
            dimension_semantics=("parallel",)),
    )(noise, *kernel_args)
    return out_flat[:, :_OUT_REAL].reshape(B, 3, 7, 7)


# --------------------------------------------------------------------------
# Glue: parameter setup, transposed-conv unfolding, BN one-hot matrices
# --------------------------------------------------------------------------
def unfold_convtranspose(W, Hin, Win, stride, padding):
    """W: (Cin, Cout, K, K) PyTorch ConvTranspose2d weight.
    Returns dense (Cin*Hin*Win, Cout*Hout*Wout) matrix such that
    x_flat @ Wu == flatten(conv_transpose2d(x, W))."""
    Cin, Cout, K, _ = W.shape
    Hout = (Hin - 1) * stride - 2 * padding + K
    Wout = (Win - 1) * stride - 2 * padding + K
    Wu = np.zeros((Cin, Hin, Win, Cout, Hout, Wout), dtype=np.float32)
    for ih in range(Hin):
        for kh in range(K):
            oh = ih * stride - padding + kh
            if not (0 <= oh < Hout):
                continue
            for iw in range(Win):
                for kw in range(K):
                    ow = iw * stride - padding + kw
                    if not (0 <= ow < Wout):
                        continue
                    Wu[:, ih, iw, :, oh, ow] = W[:, :, kh, kw]
    return Wu.reshape(Cin * Hin * Win, Cout * Hout * Wout), Hout, Wout


def channel_onehot_matrices(C, HW):
    """Skinny one-hot matrices (exact 0/1 values, stored f32).
    S: (C*HW, C) sums each channel block;  S.T: (C, C*HW) broadcasts back."""
    S = np.kron(np.eye(C, dtype=np.float32), np.ones((HW, 1), np.float32))
    return S, np.ascontiguousarray(S.T)


def _bf16_round(a):
    """Round-trip f32 -> bf16 -> f32 (the effective stored weight values)."""
    return np.asarray(jnp.asarray(a, jnp.float32).astype(jnp.bfloat16)
                      .astype(jnp.float32))


def build_params(key, latent_dim):
    ks = jax.random.split(key, 10)

    def uinit(k, shape, fan_in):
        bound = 1.0 / np.sqrt(fan_in)
        return jax.random.uniform(k, shape, jnp.float32, -bound, bound)

    raw = {
        'w1': uinit(ks[0], (latent_dim, 512), latent_dim),
        'b1': uinit(ks[1], (1, 512), latent_dim),
        'w2': uinit(ks[2], (512, 256), 512),
        'b2': uinit(ks[3], (1, 256), 512),
        'Wd1': uinit(ks[4], (256, 128, 4, 4), 128 * 16),   # (Cin, Cout, K, K)
        'bd1': uinit(ks[5], (128,), 128 * 16),
        'Wd2': uinit(ks[6], (128, 64, 4, 4), 64 * 16),
        'bd2': uinit(ks[7], (64,), 64 * 16),
        'Wo': uinit(ks[8], (64, 3, 4, 4), 3 * 16),
        'bo': uinit(ks[9], (3,), 3 * 16),
    }

    # Effective weights = bf16 storage (reference uses the same values in f32).
    eff = dict(raw)
    for name in ('w1', 'w2', 'Wd1', 'Wd2', 'Wo'):
        eff[name] = _bf16_round(raw[name])

    wd1_u, h1, w1s = unfold_convtranspose(np.asarray(eff['Wd1']), 1, 1, 2, 1)
    wd2_u, h2, w2s = unfold_convtranspose(np.asarray(eff['Wd2']), h1, w1s, 2, 1)
    wo_u, h3, w3s = unfold_convtranspose(np.asarray(eff['Wo']), h2, w2s, 1, 0)
    assert (h1, w1s, h2, w2s, h3, w3s) == (2, 2, 4, 4, 7, 7)

    # bd1/bd2 are deliberately NOT fed to the kernel (cancelled by BN).
    bo_rep = np.repeat(np.asarray(raw['bo']), h3 * w3s)[None, :]

    # Pad the final matmul's N dim 147 -> 256 for lane-dense output stores.
    wo_pad = np.zeros((wo_u.shape[0], _OUT_PAD), np.float32)
    wo_pad[:, :_OUT_REAL] = wo_u
    bo_pad = np.zeros((1, _OUT_PAD), np.float32)
    bo_pad[:, :_OUT_REAL] = bo_rep

    # Pack the remaining f32 biases into one (1, 1024) array: b1 | b2 | bo_pad.
    bias_pack = np.concatenate(
        [np.asarray(raw['b1'], np.float32),
         np.asarray(raw['b2'], np.float32),
         bo_pad], axis=1)
    assert bias_pack.shape == (1, 1024)

    S1, C1 = channel_onehot_matrices(128, h1 * w1s)   # (512,128) / (128,512)
    S2, C2 = channel_onehot_matrices(64, h2 * w2s)    # (1024,64) / (64,1024)

    bf = jnp.bfloat16
    f32 = jnp.float32
    kernel_args = [
        jnp.asarray(eff['w1'], bf),
        jnp.asarray(eff['w2'], bf),
        jnp.asarray(wd1_u, bf),
        jnp.asarray(S1, f32), jnp.asarray(C1, f32),
        jnp.asarray(wd2_u, bf),
        jnp.asarray(S2, f32), jnp.asarray(C2, f32),
        jnp.asarray(wo_pad, bf),
        jnp.asarray(bias_pack, f32),
    ]
    return kernel_args, eff


# --------------------------------------------------------------------------
# Pure-JAX reference (same effective weights, f32 math, full PyTorch semantics
# including the pre-BN deconv biases, which BN cancels exactly)
# --------------------------------------------------------------------------
def _ref_convtranspose(x, W, b, stride, padding):
    K = W.shape[2]
    rhs = jnp.flip(jnp.transpose(jnp.asarray(W), (1, 0, 2, 3)), axis=(2, 3))
    y = jax.lax.conv_general_dilated(
        x, rhs, window_strides=(1, 1),
        padding=[(K - 1 - padding, K - 1 - padding)] * 2,
        lhs_dilation=(stride, stride),
        dimension_numbers=('NCHW', 'OIHW', 'NCHW'))
    return y + jnp.asarray(b).reshape(1, -1, 1, 1)


def _ref_bn(x):
    mean = jnp.mean(x, axis=(0, 2, 3), keepdims=True)
    var = jnp.var(x, axis=(0, 2, 3), keepdims=True)   # biased, like torch training BN
    return (x - mean) * jax.lax.rsqrt(var + _BN_EPS)


def reference_forward(noise, p):
    h = jnp.maximum(noise @ jnp.asarray(p['w1']) + p['b1'], 0.0)
    h = jnp.maximum(h @ jnp.asarray(p['w2']) + p['b2'], 0.0)
    x = h.reshape(-1, 256, 1, 1)
    x = jnp.maximum(_ref_bn(_ref_convtranspose(x, p['Wd1'], p['bd1'], 2, 1)), 0.0)
    x = jnp.maximum(_ref_bn(_ref_convtranspose(x, p['Wd2'], p['bd2'], 2, 1)), 0.0)
    x = _ref_convtranspose(x, p['Wo'], p['bo'], 1, 0)
    return jnp.tanh(x)


# --------------------------------------------------------------------------
if __name__ == "__main__":
    BATCH = 8
    LATENT = 32

    key = jax.random.PRNGKey(0)
    k_params, k_noise = jax.random.split(key)
    kernel_args, eff = build_params(k_params, LATENT)
    noise = jax.random.normal(k_noise, (BATCH, LATENT), jnp.float32)

    out = generative_forward(noise, kernel_args)
    out = jax.block_until_ready(out)
    assert out.shape == (BATCH, 3, 7, 7), out.shape
    assert bool(jnp.all(jnp.isfinite(out)))

    ref = jax.block_until_ready(reference_forward(noise, eff))
    max_diff = float(jnp.max(jnp.abs(out - ref)))
    # bf16 MXU operands (per perf review) add ~0.5-1% relative error vs the
    # f32 reference; outputs are tanh-bounded to [-1, 1].
    assert max_diff < 5e-2, f"max diff vs reference too large: {max_diff}"

    print("KERNEL_OK")
</pallas_src>

<mosaic_0001>
module attributes {stable_mosaic.version = 11 : i64} {
  func.func @generative_kernel(%arg0: i32, %arg1: memref<8x32xf32, #tpu.memory_space<vmem>>, %arg2: memref<32x512xbf16, #tpu.memory_space<vmem>>, %arg3: memref<512x256xbf16, #tpu.memory_space<vmem>>, %arg4: memref<256x512xbf16, #tpu.memory_space<vmem>>, %arg5: memref<512x128xf32, #tpu.memory_space<vmem>>, %arg6: memref<128x512xf32, #tpu.memory_space<vmem>>, %arg7: memref<512x1024xbf16, #tpu.memory_space<vmem>>, %arg8: memref<1024x64xf32, #tpu.memory_space<vmem>>, %arg9: memref<64x1024xf32, #tpu.memory_space<vmem>>, %arg10: memref<1024x256xbf16, #tpu.memory_space<vmem>>, %arg11: memref<1x1024xf32, #tpu.memory_space<vmem>>, %arg12: memref<8x256xf32, #tpu.memory_space<vmem>>) attributes {dimension_semantics = [#tpu.dimension_semantics<parallel>], iteration_bounds = array<i64: 1>, scalar_prefetch = 0 : i64, scratch_operands = 0 : i64, tpu.core_type = #tpu.core_type<tc>, window_params = [{transform_indices = @transform_0, window_bounds = array<i64: 8, 32>}, {pipeline_mode = #tpu.pipeline_mode<synchronous>, transform_indices = @transform_1, window_bounds = array<i64: 32, 512>}, {pipeline_mode = #tpu.pipeline_mode<synchronous>, transform_indices = @transform_2, window_bounds = array<i64: 512, 256>}, {pipeline_mode = #tpu.pipeline_mode<synchronous>, transform_indices = @transform_3, window_bounds = array<i64: 256, 512>}, {pipeline_mode = #tpu.pipeline_mode<synchronous>, transform_indices = @transform_4, window_bounds = array<i64: 512, 128>}, {pipeline_mode = #tpu.pipeline_mode<synchronous>, transform_indices = @transform_5, window_bounds = array<i64: 128, 512>}, {pipeline_mode = #tpu.pipeline_mode<synchronous>, transform_indices = @transform_6, window_bounds = array<i64: 512, 1024>}, {pipeline_mode = #tpu.pipeline_mode<synchronous>, transform_indices = @transform_7, window_bounds = array<i64: 1024, 64>}, {pipeline_mode = #tpu.pipeline_mode<synchronous>, transform_indices = @transform_8, window_bounds = array<i64: 64, 1024>}, {pipeline_mode = #tpu.pipeline_mode<synchronous>, transform_indices = @transform_9, window_bounds = array<i64: 1024, 256>}, {pipeline_mode = #tpu.pipeline_mode<synchronous>, transform_indices = @transform_10, window_bounds = array<i64: 1, 1024>}, {transform_indices = @transform_11, window_bounds = array<i64: 8, 256>}]} {
    %c0 = arith.constant 0 : index
    %c0_0 = arith.constant 0 : index
    %0 = vector.load %arg11[%c0, %c0_0] : memref<1x1024xf32, #tpu.memory_space<vmem>>, vector<1x512xf32>
    %c0_1 = arith.constant 0 : index
    %c512 = arith.constant 512 : index
    %1 = vector.load %arg11[%c0_1, %c512] : memref<1x1024xf32, #tpu.memory_space<vmem>>, vector<1x256xf32>
    %c0_2 = arith.constant 0 : index
    %c768 = arith.constant 768 : index
    %2 = vector.load %arg11[%c0_2, %c768] : memref<1x1024xf32, #tpu.memory_space<vmem>>, vector<1x256xf32>
    %c0_3 = arith.constant 0 : index
    %c0_4 = arith.constant 0 : index
    %3 = vector.load %arg1[%c0_3, %c0_4] : memref<8x32xf32, #tpu.memory_space<vmem>>, vector<8x32xf32>
    %4 = arith.truncf %3 : vector<8x32xf32> to vector<8x32xbf16>
    %c0_5 = arith.constant 0 : index
    %c0_6 = arith.constant 0 : index
    %5 = vector.load %arg2[%c0_5, %c0_6] : memref<32x512xbf16, #tpu.memory_space<vmem>>, vector<32x512xbf16>
    %cst = arith.constant dense<0.000000e+00> : vector<8x512xf32>
    %6 = tpu.matmul %4, %5, %cst {dimension_numbers = #tpu.dot_dimension_numbers<[1], [0], [0], [1], [0, 0, 1, 1], [], []>} : vector<8x32xbf16>, vector<32x512xbf16>, vector<8x512xf32> -> vector<8x512xf32>
    %7 = vector.broadcast %0 : vector<1x512xf32> to vector<8x512xf32>
    %8 = arith.addf %6, %7 : vector<8x512xf32>
    %cst_7 = arith.constant 0.000000e+00 : f32
    %9 = vector.broadcast %cst_7 : f32 to vector<8x512xf32>
    %10 = arith.maximumf %8, %9 : vector<8x512xf32>
    %11 = arith.truncf %10 : vector<8x512xf32> to vector<8x512xbf16>
    %c0_8 = arith.constant 0 : index
    %c0_9 = arith.constant 0 : index
    %12 = vector.load %arg3[%c0_8, %c0_9] : memref<512x256xbf16, #tpu.memory_space<vmem>>, vector<512x256xbf16>
    %cst_10 = arith.constant dense<0.000000e+00> : vector<8x256xf32>
    %13 = tpu.matmul %11, %12, %cst_10 {dimension_numbers = #tpu.dot_dimension_numbers<[1], [0], [0], [1], [0, 0, 1, 1], [], []>} : vector<8x512xbf16>, vector<512x256xbf16>, vector<8x256xf32> -> vector<8x256xf32>
    %14 = vector.broadcast %1 : vector<1x256xf32> to vector<8x256xf32>
    %15 = arith.addf %13, %14 : vector<8x256xf32>
    %cst_11 = arith.constant 0.000000e+00 : f32
    %16 = vector.broadcast %cst_11 : f32 to vector<8x256xf32>
    %17 = arith.maximumf %15, %16 : vector<8x256xf32>
    %18 = arith.truncf %17 : vector<8x256xf32> to vector<8x256xbf16>
    %c0_12 = arith.constant 0 : index
    %c0_13 = arith.constant 0 : index
    %19 = vector.load %arg4[%c0_12, %c0_13] : memref<256x512xbf16, #tpu.memory_space<vmem>>, vector<256x512xbf16>
    %cst_14 = arith.constant dense<0.000000e+00> : vector<8x512xf32>
    %20 = tpu.matmul %18, %19, %cst_14 {dimension_numbers = #tpu.dot_dimension_numbers<[1], [0], [0], [1], [0, 0, 1, 1], [], []>} : vector<8x256xbf16>, vector<256x512xbf16>, vector<8x512xf32> -> vector<8x512xf32>
    %c0_15 = arith.constant 0 : index
    %c0_16 = arith.constant 0 : index
    %21 = vector.load %arg5[%c0_15, %c0_16] : memref<512x128xf32, #tpu.memory_space<vmem>>, vector<512x128xf32>
    %c0_17 = arith.constant 0 : index
    %c0_18 = arith.constant 0 : index
    %22 = vector.load %arg6[%c0_17, %c0_18] : memref<128x512xf32, #tpu.memory_space<vmem>>, vector<128x512xf32>
    %cst_19 = arith.constant dense<0.000000e+00> : vector<512xf32>
    %23 = vector.multi_reduction <add>, %20, %cst_19 [0] : vector<8x512xf32> to vector<512xf32>
    %24 = vector.shape_cast %23 : vector<512xf32> to vector<1x512xf32>
    %25 = arith.mulf %20, %20 : vector<8x512xf32>
    %cst_20 = arith.constant dense<0.000000e+00> : vector<512xf32>
    %26 = vector.multi_reduction <add>, %25, %cst_20 [0] : vector<8x512xf32> to vector<512xf32>
    %27 = vector.shape_cast %26 : vector<512xf32> to vector<1x512xf32>
    %28 = tpu.iota {dimensions = array<i32: 0>} : vector<2x512xi32>
    %c0_i32 = arith.constant 0 : i32
    %29 = vector.broadcast %c0_i32 : i32 to vector<2x512xi32>
    %30 = arith.cmpi eq, %28, %29 : vector<2x512xi32>
    %31 = vector.shape_cast %24 : vector<1x512xf32> to vector<1x512xf32>
    %32 = vector.broadcast %31 : vector<1x512xf32> to vector<2x512xf32>
    %33 = vector.shape_cast %27 : vector<1x512xf32> to vector<1x512xf32>
    %34 = vector.broadcast %33 : vector<1x512xf32> to vector<2x512xf32>
    %35 = arith.select %30, %32, %34 : vector<2x512xi1>, vector<2x512xf32>
    %cst_21 = arith.constant dense<0.000000e+00> : vector<2x128xf32>
    %36 = tpu.matmul %35, %21, %cst_21 {dimension_numbers = #tpu.dot_dimension_numbers<[1], [0], [0], [1], [0, 0, 1, 1], [], []>} : vector<2x512xf32>, vector<512x128xf32>, vector<2x128xf32> -> vector<2x128xf32>
    %cst_22 = arith.constant 3.125000e-02 : f32
    %37 = vector.broadcast %cst_22 : f32 to vector<2x128xf32>
    %38 = arith.mulf %36, %37 : vector<2x128xf32>
    %39 = vector.extract_strided_slice %38 {offsets = [0, 0], sizes = [1, 128], strides = [1, 1]} : vector<2x128xf32> to vector<1x128xf32>
    %40 = vector.extract_strided_slice %38 {offsets = [1, 0], sizes = [1, 128], strides = [1, 1]} : vector<2x128xf32> to vector<1x128xf32>
    %41 = arith.mulf %39, %39 : vector<1x128xf32>
    %42 = arith.subf %40, %41 : vector<1x128xf32>
    %cst_23 = arith.constant 9.99999974E-6 : f32
    %43 = vector.broadcast %cst_23 : f32 to vector<1x128xf32>
    %44 = arith.addf %42, %43 : vector<1x128xf32>
    %45 = math.rsqrt %44 : vector<1x128xf32>
    %cst_24 = arith.constant 0.000000e+00 : f32
    %46 = vector.broadcast %cst_24 : f32 to vector<1x128xf32>
    %47 = arith.subf %46, %39 : vector<1x128xf32>
    %48 = arith.mulf %47, %45 : vector<1x128xf32>
    %49 = tpu.iota {dimensions = array<i32: 0>} : vector<2x128xi32>
    %c0_i32_25 = arith.constant 0 : i32
    %50 = vector.broadcast %c0_i32_25 : i32 to vector<2x128xi32>
    %51 = arith.cmpi eq, %49, %50 : vector<2x128xi32>
    %52 = vector.shape_cast %45 : vector<1x128xf32> to vector<1x128xf32>
    %53 = vector.broadcast %52 : vector<1x128xf32> to vector<2x128xf32>
    %54 = vector.shape_cast %48 : vector<1x128xf32> to vector<1x128xf32>
    %55 = vector.broadcast %54 : vector<1x128xf32> to vector<2x128xf32>
    %56 = arith.select %51, %53, %55 : vector<2x128xi1>, vector<2x128xf32>
    %cst_26 = arith.constant dense<0.000000e+00> : vector<2x512xf32>
    %57 = tpu.matmul %56, %22, %cst_26 {dimension_numbers = #tpu.dot_dimension_numbers<[1], [0], [0], [1], [0, 0, 1, 1], [], []>} : vector<2x128xf32>, vector<128x512xf32>, vector<2x512xf32> -> vector<2x512xf32>
    %58 = vector.extract_strided_slice %57 {offsets = [0, 0], sizes = [1, 512], strides = [1, 1]} : vector<2x512xf32> to vector<1x512xf32>
    %59 = vector.extract_strided_slice %57 {offsets = [1, 0], sizes = [1, 512], strides = [1, 1]} : vector<2x512xf32> to vector<1x512xf32>
    %60 = vector.broadcast %58 : vector<1x512xf32> to vector<8x512xf32>
    %61 = arith.mulf %20, %60 : vector<8x512xf32>
    %62 = vector.broadcast %59 : vector<1x512xf32> to vector<8x512xf32>
    %63 = arith.addf %61, %62 : vector<8x512xf32>
    %cst_27 = arith.constant 0.000000e+00 : f32
    %64 = vector.broadcast %cst_27 : f32 to vector<8x512xf32>
    %65 = arith.maximumf %63, %64 : vector<8x512xf32>
    %66 = arith.truncf %65 : vector<8x512xf32> to vector<8x512xbf16>
    %c0_28 = arith.constant 0 : index
    %c0_29 = arith.constant 0 : index
    %67 = vector.load %arg7[%c0_28, %c0_29] : memref<512x1024xbf16, #tpu.memory_space<vmem>>, vector<512x1024xbf16>
    %cst_30 = arith.constant dense<0.000000e+00> : vector<8x1024xf32>
    %68 = tpu.matmul %66, %67, %cst_30 {dimension_numbers = #tpu.dot_dimension_numbers<[1], [0], [0], [1], [0, 0, 1, 1], [], []>} : vector<8x512xbf16>, vector<512x1024xbf16>, vector<8x1024xf32> -> vector<8x1024xf32>
    %c0_31 = arith.constant 0 : index
    %c0_32 = arith.constant 0 : index
    %69 = vector.load %arg8[%c0_31, %c0_32] : memref<1024x64xf32, #tpu.memory_space<vmem>>, vector<1024x64xf32>
    %c0_33 = arith.constant 0 : index
    %c0_34 = arith.constant 0 : index
    %70 = vector.load %arg9[%c0_33, %c0_34] : memref<64x1024xf32, #tpu.memory_space<vmem>>, vector<64x1024xf32>
    %cst_35 = arith.constant dense<0.000000e+00> : vector<1024xf32>
    %71 = vector.multi_reduction <add>, %68, %cst_35 [0] : vector<8x1024xf32> to vector<1024xf32>
    %72 = vector.shape_cast %71 : vector<1024xf32> to vector<1x1024xf32>
    %73 = arith.mulf %68, %68 : vector<8x1024xf32>
    %cst_36 = arith.constant dense<0.000000e+00> : vector<1024xf32>
    %74 = vector.multi_reduction <add>, %73, %cst_36 [0] : vector<8x1024xf32> to vector<1024xf32>
    %75 = vector.shape_cast %74 : vector<1024xf32> to vector<1x1024xf32>
    %76 = tpu.iota {dimensions = array<i32: 0>} : vector<2x1024xi32>
    %c0_i32_37 = arith.constant 0 : i32
    %77 = vector.broadcast %c0_i32_37 : i32 to vector<2x1024xi32>
    %78 = arith.cmpi eq, %76, %77 : vector<2x1024xi32>
    %79 = vector.shape_cast %72 : vector<1x1024xf32> to vector<1x1024xf32>
    %80 = vector.broadcast %79 : vector<1x1024xf32> to vector<2x1024xf32>
    %81 = vector.shape_cast %75 : vector<1x1024xf32> to vector<1x1024xf32>
    %82 = vector.broadcast %81 : vector<1x1024xf32> to vector<2x1024xf32>
    %83 = arith.select %78, %80, %82 : vector<2x1024xi1>, vector<2x1024xf32>
    %cst_38 = arith.constant dense<0.000000e+00> : vector<2x64xf32>
    %84 = tpu.matmul %83, %69, %cst_38 {dimension_numbers = #tpu.dot_dimension_numbers<[1], [0], [0], [1], [0, 0, 1, 1], [], []>} : vector<2x1024xf32>, vector<1024x64xf32>, vector<2x64xf32> -> vector<2x64xf32>
    %cst_39 = arith.constant 7.812500e-03 : f32
    %85 = vector.broadcast %cst_39 : f32 to vector<2x64xf32>
    %86 = arith.mulf %84, %85 : vector<2x64xf32>
    %87 = vector.extract_strided_slice %86 {offsets = [0, 0], sizes = [1, 64], strides = [1, 1]} : vector<2x64xf32> to vector<1x64xf32>
    %88 = vector.extract_strided_slice %86 {offsets = [1, 0], sizes = [1, 64], strides = [1, 1]} : vector<2x64xf32> to vector<1x64xf32>
    %89 = arith.mulf %87, %87 : vector<1x64xf32>
    %90 = arith.subf %88, %89 : vector<1x64xf32>
    %cst_40 = arith.constant 9.99999974E-6 : f32
    %91 = vector.broadcast %cst_40 : f32 to vector<1x64xf32>
    %92 = arith.addf %90, %91 : vector<1x64xf32>
    %93 = math.rsqrt %92 : vector<1x64xf32>
    %cst_41 = arith.constant 0.000000e+00 : f32
    %94 = vector.broadcast %cst_41 : f32 to vector<1x64xf32>
    %95 = arith.subf %94, %87 : vector<1x64xf32>
    %96 = arith.mulf %95, %93 : vector<1x64xf32>
    %97 = tpu.iota {dimensions = array<i32: 0>} : vector<2x64xi32>
    %c0_i32_42 = arith.constant 0 : i32
    %98 = vector.broadcast %c0_i32_42 : i32 to vector<2x64xi32>
    %99 = arith.cmpi eq, %97, %98 : vector<2x64xi32>
    %100 = vector.shape_cast %93 : vector<1x64xf32> to vector<1x64xf32>
    %101 = vector.broadcast %100 : vector<1x64xf32> to vector<2x64xf32>
    %102 = vector.shape_cast %96 : vector<1x64xf32> to vector<1x64xf32>
    %103 = vector.broadcast %102 : vector<1x64xf32> to vector<2x64xf32>
    %104 = arith.select %99, %101, %103 : vector<2x64xi1>, vector<2x64xf32>
    %cst_43 = arith.constant dense<0.000000e+00> : vector<2x1024xf32>
    %105 = tpu.matmul %104, %70, %cst_43 {dimension_numbers = #tpu.dot_dimension_numbers<[1], [0], [0], [1], [0, 0, 1, 1], [], []>} : vector<2x64xf32>, vector<64x1024xf32>, vector<2x1024xf32> -> vector<2x1024xf32>
    %106 = vector.extract_strided_slice %105 {offsets = [0, 0], sizes = [1, 1024], strides = [1, 1]} : vector<2x1024xf32> to vector<1x1024xf32>
    %107 = vector.extract_strided_slice %105 {offsets = [1, 0], sizes = [1, 1024], strides = [1, 1]} : vector<2x1024xf32> to vector<1x1024xf32>
    %108 = vector.broadcast %106 : vector<1x1024xf32> to vector<8x1024xf32>
    %109 = arith.mulf %68, %108 : vector<8x1024xf32>
    %110 = vector.broadcast %107 : vector<1x1024xf32> to vector<8x1024xf32>
    %111 = arith.addf %109, %110 : vector<8x1024xf32>
    %cst_44 = arith.constant 0.000000e+00 : f32
    %112 = vector.broadcast %cst_44 : f32 to vector<8x1024xf32>
    %113 = arith.maximumf %111, %112 : vector<8x1024xf32>
    %114 = arith.truncf %113 : vector<8x1024xf32> to vector<8x1024xbf16>
    %c0_45 = arith.constant 0 : index
    %c0_46 = arith.constant 0 : index
    %115 = vector.load %arg10[%c0_45, %c0_46] : memref<1024x256xbf16, #tpu.memory_space<vmem>>, vector<1024x256xbf16>
    %cst_47 = arith.constant dense<0.000000e+00> : vector<8x256xf32>
    %116 = tpu.matmul %114, %115, %cst_47 {dimension_numbers = #tpu.dot_dimension_numbers<[1], [0], [0], [1], [0, 0, 1, 1], [], []>} : vector<8x1024xbf16>, vector<1024x256xbf16>, vector<8x256xf32> -> vector<8x256xf32>
    %117 = vector.broadcast %2 : vector<1x256xf32> to vector<8x256xf32>
    %118 = arith.addf %116, %117 : vector<8x256xf32>
    %119 = math.tanh %118 : vector<8x256xf32>
    %c0_48 = arith.constant 0 : index
    %c0_49 = arith.constant 0 : index
    %120 = vector.load %arg12[%c0_48, %c0_49] : memref<8x256xf32, #tpu.memory_space<vmem>>, vector<8x256xf32>
    tpu.vector_store %arg12[%c0_48, %c0_49], %119 {strides = array<i32>} : memref<8x256xf32, #tpu.memory_space<vmem>>, vector<8x256xf32>,
    return
  }
  func.func @transform_0(%arg0: i32) -> (i32, i32) {
    %c0_i32 = arith.constant 0 : i32
    %c0_i32_0 = arith.constant 0 : i32
    return %arg0, %c0_i32 : i32, i32
  }
  func.func @transform_1(%arg0: i32) -> (i32, i32) {
    %c0_i32 = arith.constant 0 : i32
    %c0_i32_0 = arith.constant 0 : i32
    %c0_i32_1 = arith.constant 0 : i32
    return %c0_i32, %c0_i32_0 : i32, i32
  }
  func.func @transform_2(%arg0: i32) -> (i32, i32) {
    %c0_i32 = arith.constant 0 : i32
    %c0_i32_0 = arith.constant 0 : i32
    %c0_i32_1 = arith.constant 0 : i32
    return %c0_i32, %c0_i32_0 : i32, i32
  }
  func.func @transform_3(%arg0: i32) -> (i32, i32) {
    %c0_i32 = arith.constant 0 : i32
    %c0_i32_0 = arith.constant 0 : i32
    %c0_i32_1 = arith.constant 0 : i32
    return %c0_i32, %c0_i32_0 : i32, i32
  }
  func.func @transform_4(%arg0: i32) -> (i32, i32) {
    %c0_i32 = arith.constant 0 : i32
    %c0_i32_0 = arith.constant 0 : i32
    %c0_i32_1 = arith.constant 0 : i32
    return %c0_i32, %c0_i32_0 : i32, i32
  }
  func.func @transform_5(%arg0: i32) -> (i32, i32) {
    %c0_i32 = arith.constant 0 : i32
    %c0_i32_0 = arith.constant 0 : i32
    %c0_i32_1 = arith.constant 0 : i32
    return %c0_i32, %c0_i32_0 : i32, i32
  }
  func.func @transform_6(%arg0: i32) -> (i32, i32) {
    %c0_i32 = arith.constant 0 : i32
    %c0_i32_0 = arith.constant 0 : i32
    %c0_i32_1 = arith.constant 0 : i32
    return %c0_i32, %c0_i32_0 : i32, i32
  }
  func.func @transform_7(%arg0: i32) -> (i32, i32) {
    %c0_i32 = arith.constant 0 : i32
    %c0_i32_0 = arith.constant 0 : i32
    %c0_i32_1 = arith.constant 0 : i32
    return %c0_i32, %c0_i32_0 : i32, i32
  }
  func.func @transform_8(%arg0: i32) -> (i32, i32) {
    %c0_i32 = arith.constant 0 : i32
    %c0_i32_0 = arith.constant 0 : i32
    %c0_i32_1 = arith.constant 0 : i32
    return %c0_i32, %c0_i32_0 : i32, i32
  }
  func.func @transform_9(%arg0: i32) -> (i32, i32) {
    %c0_i32 = arith.constant 0 : i32
    %c0_i32_0 = arith.constant 0 : i32
    %c0_i32_1 = arith.constant 0 : i32
    return %c0_i32, %c0_i32_0 : i32, i32
  }
  func.func @transform_10(%arg0: i32) -> (i32, i32) {
    %c0_i32 = arith.constant 0 : i32
    %c0_i32_0 = arith.constant 0 : i32
    %c0_i32_1 = arith.constant 0 : i32
    return %c0_i32, %c0_i32_0 : i32, i32
  }
  func.func @transform_11(%arg0: i32) -> (i32, i32) {
    %c0_i32 = arith.constant 0 : i32
    %c0_i32_0 = arith.constant 0 : i32
    return %arg0, %c0_i32 : i32, i32
  }
}

</mosaic_0001>

<bundles_post_ra>
// kernel: tpu_custom_call.1
= control target key start
LH: loop header
LB: loop body
LE: loop exit
PB: predicated region body
PF: predicated region fallthrough
CT: control target
= control target key end

     0   :  { %16 = vsyncpa [#allocation3], 0  ;;  %s10054_s0 = inlined_call_operand.vmem [shape: f32[8,32], index: 0, kind: input, shape index: {}]   ;;  %s10055_s1 = inlined_call_operand.hbm [shape: bf16[32,512], index: 1, kind: input, shape index: {}]   ;;  %s10056_s2 = inlined_call_operand.vmem [shape: bf16[512,256], index: 2, kind: input, shape index: {}]   ;;  %s10057_s3 = inlined_call_operand.hbm [shape: bf16[256,512], index: 3, kind: input, shape index: {}]   ;;  %s10058_s4 = inlined_call_operand.hbm [shape: f32[512,128], index: 4, kind: input, shape index: {}]   ;;  %s10059_s5 = inlined_call_operand.hbm [shape: f32[128,512], index: 5, kind: input, shape index: {}]   ;;  %s10060_s6 = inlined_call_operand.hbm [shape: bf16[512,1024], index: 6, kind: input, shape index: {}]   ;;  %s10061_s7 = inlined_call_operand.vmem [shape: f32[1024,64], index: 7, kind: input, shape index: {}]   ;;  %s10062_s8 = inlined_call_operand.hbm [shape: f32[64,1024], index: 8, kind: input, shape index: {}]   ;;  %s10063_s9 = inlined_call_operand.vmem [shape: bf16[1024,256], index: 9, kind: input, shape index: {}]   ;;  %s10064_s10 = inlined_call_operand.hbm [shape: f32[1,1024], index: 10, kind: input, shape index: {}]   ;;  %s10065_s11 = inlined_call_operand.hbm [shape: f32[8,256], index: 11, kind: output, shape index: {}]  }
   0x1   :  { %17 = vsyncpa [#allocation6], 0 }
   0x2   :  { %18 = vsyncpa [#allocation9], 0 }
   0x3   :  { %19 = vsyncpa [#allocation12], 0 }
   0x4   :  { %20 = vsyncpa [#allocation4], 0  ;;  %s42_s19 = sshll.u32 %s10057_s3, 4  ;;  %s8150_s20 = smov [#allocation5]   ;;  %s43_s19 = int_to_ptr.hbm [resolvable:$true] %s42_s19 }
   0x5   :  { %s44_s21 = sshll.u32 %s8150_s20, 4  ;;  %s68_s24 = sshll.u32 %s10059_s5, 4  ;;  %s45_s21 = int_to_ptr.vmem [resolvable:$true] %s44_s21  ;;  %s69_s24 = int_to_ptr.hbm [resolvable:$true] %s68_s24 }
   0x6   :  { %s8151_s25 = smov 256   ;;  %s8152_s26 = smov 16  }
   0x7   :  { %50 = dma.hbm_to_vmem [thread:$0]  %s43_s19, 8192, %s45_s21, [#allocation6], %s8151_s25, %s8151_s25, %s8152_s26  }
   0x8   :  { %s8153_s27 = smov [#allocation8]   ;;  %s8154_s29 = smov 512  }
   0x9   :  { %s70_s28 = sshll.u32 %s8153_s27, 4  ;;  %s8155_s30 = smov 32   ;;  %s71_s28 = int_to_ptr.vmem [resolvable:$true] %s70_s28 }
   0xa   :  { %76 = dma.hbm_to_vmem [thread:$0]  %s69_s24, 8192, %s71_s28, [#allocation9], %s8154_s29, %s8154_s29, %s8155_s30  }
   0xb   :  { %s96_s13 = sshll.u32 %s10062_s8, 4  ;;  %s8156_s14 = smov [#allocation11]   ;;  %s97_s13 = int_to_ptr.hbm [resolvable:$true] %s96_s13 }
   0xc   :  { %s98_s5 = sshll.u32 %s8156_s14, 4  ;;  %s27_s17 = sshll.u32 %s10055_s1, 4  ;;  %s99_s5 = int_to_ptr.vmem [resolvable:$true] %s98_s5  ;;  %s28_s17 = int_to_ptr.hbm [resolvable:$true] %s27_s17 }
   0xd   :  { %s8157_s18 = smov 1024   ;;  %s8158_s19 = smov 64  }
   0xe   :  { %104 = dma.hbm_to_vmem [thread:$0]  %s97_s13, 8192, %s99_s5, [#allocation12], %s8157_s18, %s8157_s18, %s8158_s19  }
   0xf   :  { %s8159_s20 = smov [#allocation2]   ;;  %s55_s24 = sshll.u32 %s10058_s4, 4  ;;  %s56_s24 = int_to_ptr.hbm [resolvable:$true] %s55_s24 }
  0x10   :  { %s29_s21 = sshll.u32 %s8159_s20, 4  ;;  %s8160_s8 = smov [#allocation7]   ;;  %s30_s21 = int_to_ptr.vmem [resolvable:$true] %s29_s21 }
  0x11   :  { %35 = dma.hbm_to_vmem [thread:$0]  %s28_s17, 1024, %s30_s21, [#allocation3], %s8151_s25, %s8151_s25, %s8152_s26  }
  0x12   :  { %s57_s27 = sshll.u32 %s8160_s8, 4  ;;  %s81_s1 = sshll.u32 %s10060_s6, 4  ;;  %s58_s27 = int_to_ptr.vmem [resolvable:$true] %s57_s27  ;;  %s82_s1 = int_to_ptr.hbm [resolvable:$true] %s81_s1 }
  0x13   :  { %s8161_s12 = smov 128   ;;  %s8162_s14 = smov 8  }
  0x14   :  { %63 = dma.hbm_to_vmem [thread:$0]  %s56_s24, 8192, %s58_s27, [#allocation6], %s8161_s12, %s8161_s12, %s8162_s14  }
  0x15   :  { %s8163_s13 = smov [#allocation10]   ;;  %s112_s4 = sshll.u32 %s10064_s10, 4  ;;  %s113_s4 = int_to_ptr.hbm [resolvable:$true] %s112_s4 }
  0x16   :  { %s83_s5 = sshll.u32 %s8163_s13, 4  ;;  %s8164_s25 = smov [#allocation13]   ;;  %s84_s5 = int_to_ptr.vmem [resolvable:$true] %s83_s5 }
  0x17   :  { %89 = dma.hbm_to_vmem [thread:$0]  %s82_s1, 32768, %s84_s5, [#allocation9], %s8154_s29, %s8154_s29, %s8155_s30  }
  0x18   :  { %s114_s26 = sshll.u32 %s8164_s25, 4  ;;  %s115_s26 = int_to_ptr.vmem [resolvable:$true] %s114_s26 }
  0x19   :  { %117 = dma.hbm_to_vmem [thread:$0]  %s113_s4, 128, %s115_s26, [#allocation12]  }
  0x1a   :  { %8140 = dma.done.wait [#allocation3], 1024  }
  0x1b   :  { %8141 = vsyncadd [#allocation3], 4294966272 }
  0x1c   :  { %8142 = dma.done.wait [#allocation6], 16384  }
  0x1d   :  { %8143 = vsyncadd [#allocation6], 4294950912 }
  0x1e   :  { %8144 = dma.done.wait [#allocation9], 40960  }
  0x1f   :  { %8145 = vsyncadd [#allocation9], 4294926336 }
  0x20   :  { %8146 = dma.done.wait [#allocation12], 8320  }
  0x21   :  { %8147 = vsyncadd [#allocation12], 4294958976  ;;  %v5330_v0 = vld [vmem:[#allocation2 + $0x20] sm:$0xf]  ;;  %v7410_v1 = vld [vmem:[#allocation2 + $0x2c] sm:$0xf0] }
  0x22   :  { %v7408_v2 = vld [vmem:[#allocation2 + $0x24] sm:$0xf]  ;;  %v5331_v3 = vor.u32 %v7410_v1, %v5330_v0  ;;  %v5332_v4 = vld [vmem:[#allocation2 + $0x30] sm:$0xf0]  ;;  %v5338_v5 = vld [vmem:[#allocation2 + $0x28] sm:$0xf] }
  0x23   :  { %v7411_v6 = vld [vmem:[#allocation2 + $0x34] sm:$0xf0]  ;;  %v5335_v7 = vor.u32 %v7408_v2, %v5332_v4  ;;  %v7409_v9 = vld [vmem:[#allocation2 + $0x2c] sm:$0xf]  ;;  %v5340_v10 = vld [vmem:[#allocation2 + $0x38] sm:$0xf0] }
  0x24   :  { %v5339_v8 = vor.u32 %v7411_v6, %v5338_v5  ;;  %v5314_v11 = vld [vmem:[#allocation2] sm:$0xf]  ;;  %219 = vmatpush.bf16.msra.mxu0 %v5331_v3  ;;  %v5343_v12 = vor.u32 %v7409_v9, %v5340_v10  ;;  %v7406_v13 = vld [vmem:[#allocation2 + $0xc] sm:$0xf0]  ;;  %v7404_v14 = vld [vmem:[#allocation2 + $0x4] sm:$0xf] }
  0x25   :  { %v5316_v15 = vld [vmem:[#allocation2 + $0x10] sm:$0xf0]  ;;  %232 = vmatpush.bf16.msra.mxu1 %v5335_v7  ;;  %v5315_v16 = vor.u32 %v7406_v13, %v5314_v11  ;;  %v5322_v18 = vld [vmem:[#allocation2 + $0x8] sm:$0xf]  ;;  %v7407_v19 = vld [vmem:[#allocation2 + $0x14] sm:$0xf0] }
  0x26   :  { %245 = vmatpush.bf16.msra.mxu2 %v5339_v8  ;;  %v5319_v17 = vor.u32 %v7404_v14, %v5316_v15  ;;  %v7405_v20 = vld [vmem:[#allocation2 + $0xc] sm:$0xf]  ;;  %258 = vmatpush.bf16.msra.mxu3 %v5343_v12  ;;  %v5323_v21 = vor.u32 %v7407_v19, %v5322_v18  ;;  %v5324_v22 = vld [vmem:[#allocation2 + $0x18] sm:$0xf0]  ;;  %v150_v23 = vld [vmem:[%s10054_s0] sm:$0xff]  ;;  %vm209_vm0 = vcmask 261120  }
  0x27   :  { %v5406_v24 = vld [vmem:[%s10056_s2 + $0x70] sm:$0xf]  ;;  %v5327_v25 = vor.u32 %v7405_v20, %v5324_v22  ;;  %v151_v26 = vpack.c.bf16 %v150_v23, %v150_v23  ;;  %v7427_v27 = vld [vmem:[%s10056_s2 + $0x74] sm:$0xf0]  ;;  %v5398_v32 = vld [vmem:[%s10056_s2 + $0x60] sm:$0xf] }
  0x28   :  { %v5470_v28 = vld [vmem:[%s10056_s2 + $0xf0] sm:$0xf]  ;;  %v7443_v29 = vld [vmem:[%s10056_s2 + $0xf4] sm:$0xf0]  ;;  %220 = vmatpush.bf16.msra.mxu0 %v5315_v16  ;;  %v5407_v30 = vor.u32 %v7427_v27, %v5406_v24  ;;  %v7425_v33 = vld [vmem:[%s10056_s2 + $0x64] sm:$0xf0] }
  0x29   :  { %v5471_v31 = vor.u32 %v7443_v29, %v5470_v28  ;;  %v5462_v34 = vld [vmem:[%s10056_s2 + $0xe0] sm:$0xf]  ;;  %233 = vmatpush.bf16.msra.mxu1 %v5319_v17  ;;  %v7441_v35 = vld [vmem:[%s10056_s2 + $0xe4] sm:$0xf0]  ;;  %v5534_v36 = vld [vmem:[%s10056_s2 + $0x170] sm:$0xf]  ;;  %v5399_v38 = vor.u32 %v7425_v33, %v5398_v32 }
  0x2a   :  { %246 = vmatpush.bf16.msra.mxu2 %v5323_v21  ;;  %v7459_v37 = vld [vmem:[%s10056_s2 + $0x174] sm:$0xf0]  ;;  %259 = vmatpush.bf16.msra.mxu3 %v5327_v25  ;;  %v5598_v40 = vld [vmem:[%s10056_s2 + $0x1f0] sm:$0xf]  ;;  %v5463_v43 = vor.u32 %v7441_v35, %v5462_v34  ;;  %v5526_v48 = vld [vmem:[%s10056_s2 + $0x160] sm:$0xf] }
  0x2b   :  { %v5535_v39 = vor.u32 %v7459_v37, %v5534_v36  ;;  %v7475_v41 = vld [vmem:[%s10056_s2 + $0x1f4] sm:$0xf0]  ;;  %v5390_v42 = vld [vmem:[%s10056_s2 + $0x50] sm:$0xf]  ;;  %5344 = vmatmul.msk.bf16.vlgmr.msra.gmra.mxu0 %vm209_vm0, %v151_v26  ;;  %v7457_v49 = vld [vmem:[%s10056_s2 + $0x164] sm:$0xf0] }
  0x2c   :  { %662 = vmatpush.bf16.msrb.mxu0 %v5407_v30  ;;  %v5599_v44 = vor.u32 %v7475_v41, %v5598_v40  ;;  %v7423_v45 = vld [vmem:[%s10056_s2 + $0x54] sm:$0xf0]  ;;  %v5454_v46 = vld [vmem:[%s10056_s2 + $0xd0] sm:$0xf]  ;;  %5345 = vmatmul.msk.bf16.vlgmr.msra.gmra.mxu1 %vm209_vm0, %v151_v26  ;;  %v5590_v50 = vld [vmem:[%s10056_s2 + $0x1e0] sm:$0xf]  ;;  %v5527_v51 = vor.u32 %v7457_v49, %v5526_v48 }
  0x2d   :  { %675 = vmatpush.bf16.msrb.mxu1 %v5471_v31  ;;  %v7439_v47 = vld [vmem:[%s10056_s2 + $0xd4] sm:$0xf0]  ;;  %5346 = vmatmul.msk.bf16.vlgmr.msra.gmra.mxu2 %vm209_vm0, %v151_v26  ;;  %v7473_v52 = vld [vmem:[%s10056_s2 + $0x1e4] sm:$0xf0]  ;;  %v5391_v53 = vor.u32 %v7423_v45, %v5390_v42  ;;  %v5382_v55 = vld [vmem:[%s10056_s2 + $0x40] sm:$0xf] }
  0x2e   :  { %5347 = vmatmul.msk.bf16.vlgmr.msra.gmra.mxu3 %vm209_vm0, %v151_v26  ;;  %688 = vmatpush.bf16.msrb.mxu2 %v5535_v39  ;;  %v5591_v54 = vor.u32 %v7473_v52, %v5590_v50  ;;  %v7421_v56 = vld [vmem:[%s10056_s2 + $0x44] sm:$0xf0]  ;;  %v5518_v57 = vld [vmem:[%s10056_s2 + $0x150] sm:$0xf]  ;;  %v5455_v58 = vor.u32 %v7439_v47, %v5454_v46  ;;  %v7455_v59 = vld [vmem:[%s10056_s2 + $0x154] sm:$0xf0] }
  0x2f   :  { %701 = vmatpush.bf16.msrb.mxu3 %v5599_v44  ;;  %v5582_v60 = vld [vmem:[%s10056_s2 + $0x1d0] sm:$0xf]  ;;  %v7471_v61 = vld [vmem:[%s10056_s2 + $0x1d4] sm:$0xf0]  ;;  %v5446_v62 = vld [vmem:[%s10056_s2 + $0xc0] sm:$0xf]  ;;  %v5519_v0 = vor.u32 %v7455_v59, %v5518_v57  ;;  %v5383_v1 = vor.u32 %v7421_v56, %v5382_v55 }
  0x30   :  { %663 = vmatpush.bf16.msrb.mxu0 %v5399_v38  ;;  %v7437_v63 = vld [vmem:[%s10056_s2 + $0xc4] sm:$0xf0]  ;;  %v5583_v2 = vor.u32 %v7471_v61, %v5582_v60  ;;  %v5374_v3 = vld [vmem:[%s10056_s2 + $0x30] sm:$0xf]  ;;  %v5510_v4 = vld [vmem:[%s10056_s2 + $0x140] sm:$0xf] }
  0x31   :  { %676 = vmatpush.bf16.msrb.mxu1 %v5463_v43  ;;  %v7453_v5 = vld [vmem:[%s10056_s2 + $0x144] sm:$0xf0]  ;;  %v5447_v6 = vor.u32 %v7437_v63, %v5446_v62  ;;  %v7419_v7 = vld [vmem:[%s10056_s2 + $0x34] sm:$0xf0]  ;;  %v5574_v8 = vld [vmem:[%s10056_s2 + $0x1c0] sm:$0xf] }
  0x32   :  { %689 = vmatpush.bf16.msrb.mxu2 %v5527_v51  ;;  %v7469_v9 = vld [vmem:[%s10056_s2 + $0x1c4] sm:$0xf0]  ;;  %v5438_v10 = vld [vmem:[%s10056_s2 + $0xb0] sm:$0xf]  ;;  %v7435_v11 = vld [vmem:[%s10056_s2 + $0xb4] sm:$0xf0]  ;;  %v5511_v12 = vor.u32 %v7453_v5, %v5510_v4  ;;  %v5375_v13 = vor.u32 %v7419_v7, %v5374_v3 }
  0x33   :  { %702 = vmatpush.bf16.msrb.mxu3 %v5591_v54  ;;  %v5575_v14 = vor.u32 %v7469_v9, %v5574_v8  ;;  %v5366_v15 = vld [vmem:[%s10056_s2 + $0x20] sm:$0xf]  ;;  %v5502_v16 = vld [vmem:[%s10056_s2 + $0x130] sm:$0xf]  ;;  %v7451_v17 = vld [vmem:[%s10056_s2 + $0x134] sm:$0xf0]  ;;  %v5439_v18 = vor.u32 %v7435_v11, %v5438_v10 }
  0x34   :  { %664 = vmatpush.bf16.msrb.mxu0 %v5391_v53  ;;  %v7417_v19 = vld [vmem:[%s10056_s2 + $0x24] sm:$0xf0]  ;;  %v5566_v20 = vld [vmem:[%s10056_s2 + $0x1b0] sm:$0xf]  ;;  %v7467_v21 = vld [vmem:[%s10056_s2 + $0x1b4] sm:$0xf0]  ;;  %v5503_v24 = vor.u32 %v7451_v17, %v5502_v16 }
  0x35   :  { %677 = vmatpush.bf16.msrb.mxu1 %v5455_v58  ;;  %v5430_v22 = vld [vmem:[%s10056_s2 + $0xa0] sm:$0xf]  ;;  %v7433_v23 = vld [vmem:[%s10056_s2 + $0xa4] sm:$0xf0]  ;;  %v5367_v25 = vor.u32 %v7417_v19, %v5366_v15  ;;  %v5567_v26 = vor.u32 %v7467_v21, %v5566_v20  ;;  %v5358_v27 = vld [vmem:[%s10056_s2 + $0x10] sm:$0xf] }
  0x36   :  { %690 = vmatpush.bf16.msrb.mxu2 %v5519_v0  ;;  %v5494_v28 = vld [vmem:[%s10056_s2 + $0x120] sm:$0xf]  ;;  %v7449_v29 = vld [vmem:[%s10056_s2 + $0x124] sm:$0xf0]  ;;  %v5431_v30 = vor.u32 %v7433_v23, %v5430_v22  ;;  %v7415_v31 = vld [vmem:[%s10056_s2 + $0x14] sm:$0xf0] }
  0x37   :  { %703 = vmatpush.bf16.msrb.mxu3 %v5583_v2  ;;  %v5558_v32 = vld [vmem:[%s10056_s2 + $0x1a0] sm:$0xf]  ;;  %v7465_v33 = vld [vmem:[%s10056_s2 + $0x1a4] sm:$0xf0]  ;;  %v5422_v34 = vld [vmem:[%s10056_s2 + $0x90] sm:$0xf]  ;;  %v5495_v36 = vor.u32 %v7449_v29, %v5494_v28  ;;  %v5359_v38 = vor.u32 %v7415_v31, %v5358_v27 }
  0x38   :  { %665 = vmatpush.bf16.msrb.mxu0 %v5383_v1  ;;  %v7431_v35 = vld [vmem:[%s10056_s2 + $0x94] sm:$0xf0]  ;;  %v5350_v37 = vld [vmem:[%s10056_s2] sm:$0xf]  ;;  %v5559_v39 = vor.u32 %v7465_v33, %v5558_v32  ;;  %v7413_v40 = vld [vmem:[%s10056_s2 + $0x4] sm:$0xf0] }
  0x39   :  { %678 = vmatpush.bf16.msrb.mxu1 %v5447_v6  ;;  %v5486_v41 = vld [vmem:[%s10056_s2 + $0x110] sm:$0xf]  ;;  %v7447_v42 = vld [vmem:[%s10056_s2 + $0x114] sm:$0xf0]  ;;  %v5423_v43 = vor.u32 %v7431_v35, %v5422_v34  ;;  %v5414_v44 = vld [vmem:[%s10056_s2 + $0x80] sm:$0xf]  ;;  %v5351_v53 = vor.u32 %v7413_v40, %v5350_v37 }
  0x3a   :  { %691 = vmatpush.bf16.msrb.mxu2 %v5511_v12  ;;  %v5550_v45 = vld [vmem:[%s10056_s2 + $0x190] sm:$0xf]  ;;  %v7463_v46 = vld [vmem:[%s10056_s2 + $0x194] sm:$0xf0]  ;;  %v7429_v47 = vld [vmem:[%s10056_s2 + $0x84] sm:$0xf0]  ;;  %v5487_v52 = vor.u32 %v7447_v42, %v5486_v41 }
  0x3b   :  { %704 = vmatpush.bf16.msrb.mxu3 %v5575_v14  ;;  %v7426_v48 = vld [vmem:[%s10056_s2 + $0x74] sm:$0xf]  ;;  %v5408_v49 = vld [vmem:[%s10056_s2 + $0x78] sm:$0xf0]  ;;  %v5551_v54 = vor.u32 %v7463_v46, %v5550_v45  ;;  %v7424_v55 = vld [vmem:[%s10056_s2 + $0x64] sm:$0xf]  ;;  %v5415_v59 = vor.u32 %v7429_v47, %v5414_v44 }
  0x3c   :  { %666 = vmatpush.bf16.msrb.mxu0 %v5375_v13  ;;  %v7442_v50 = vld [vmem:[%s10056_s2 + $0xf4] sm:$0xf]  ;;  %v5472_v51 = vld [vmem:[%s10056_s2 + $0xf8] sm:$0xf0]  ;;  %v5478_v56 = vld [vmem:[%s10056_s2 + $0x100] sm:$0xf]  ;;  %v5411_v60 = vor.u32 %v7426_v48, %v5408_v49 }
  0x3d   :  { %679 = vmatpush.bf16.msrb.mxu1 %v5439_v18  ;;  %v7445_v57 = vld [vmem:[%s10056_s2 + $0x104] sm:$0xf0]  ;;  %v5542_v58 = vld [vmem:[%s10056_s2 + $0x180] sm:$0xf]  ;;  %v7458_v62 = vld [vmem:[%s10056_s2 + $0x174] sm:$0xf]  ;;  %v5475_v0 = vor.u32 %v7442_v50, %v5472_v51 }
  0x3e   :  { %692 = vmatpush.bf16.msrb.mxu2 %v5503_v24  ;;  %v7461_v61 = vld [vmem:[%s10056_s2 + $0x184] sm:$0xf0]  ;;  %v5536_v63 = vld [vmem:[%s10056_s2 + $0x178] sm:$0xf0]  ;;  %v5400_v1 = vld [vmem:[%s10056_s2 + $0x68] sm:$0xf0]  ;;  %v5479_v6 = vor.u32 %v7445_v57, %v5478_v56 }
  0x3f   :  { %705 = vmatpush.bf16.msrb.mxu3 %v5567_v26  ;;  %v7474_v2 = vld [vmem:[%s10056_s2 + $0x1f4] sm:$0xf]  ;;  %v5600_v3 = vld [vmem:[%s10056_s2 + $0x1f8] sm:$0xf0]  ;;  %v7440_v4 = vld [vmem:[%s10056_s2 + $0xe4] sm:$0xf]  ;;  %v5543_v7 = vor.u32 %v7461_v61, %v5542_v58  ;;  %v5539_v8 = vor.u32 %v7458_v62, %v5536_v63  ;;  %v5403_v9 = vor.u32 %v7424_v55, %v5400_v1 }
  0x40   :  { %667 = vmatpush.bf16.msrb.mxu0 %v5367_v25  ;;  %v5464_v5 = vld [vmem:[%s10056_s2 + $0xe8] sm:$0xf0]  ;;  %v5603_v10 = vor.u32 %v7474_v2, %v5600_v3  ;;  %v7422_v12 = vld [vmem:[%s10056_s2 + $0x54] sm:$0xf]  ;;  %v5392_v13 = vld [vmem:[%s10056_s2 + $0x58] sm:$0xf0] }
  0x41   :  { %680 = vmatpush.bf16.msrb.mxu1 %v5431_v30  ;;  %v5467_v11 = vor.u32 %v7440_v4, %v5464_v5  ;;  %v7438_v14 = vld [vmem:[%s10056_s2 + $0xd4] sm:$0xf]  ;;  %v5395_v15 = vor.u32 %v7422_v12, %v5392_v13  ;;  %v5456_v16 = vld [vmem:[%s10056_s2 + $0xd8] sm:$0xf0]  ;;  %v7456_v18 = vld [vmem:[%s10056_s2 + $0x164] sm:$0xf] }
  0x42   :  { %693 = vmatpush.bf16.msrb.mxu2 %v5495_v36  ;;  %v5459_v17 = vor.u32 %v7438_v14, %v5456_v16  ;;  %v5528_v19 = vld [vmem:[%s10056_s2 + $0x168] sm:$0xf0]  ;;  %v7472_v21 = vld [vmem:[%s10056_s2 + $0x1e4] sm:$0xf]  ;;  %v7454_v30 = vld [vmem:[%s10056_s2 + $0x154] sm:$0xf] }
  0x43   :  { %706 = vmatpush.bf16.msrb.mxu3 %v5559_v39  ;;  %v5531_v20 = vor.u32 %v7456_v18, %v5528_v19  ;;  %v5592_v22 = vld [vmem:[%s10056_s2 + $0x1e8] sm:$0xf0]  ;;  %v7420_v24 = vld [vmem:[%s10056_s2 + $0x44] sm:$0xf]  ;;  %v5520_v31 = vld [vmem:[%s10056_s2 + $0x158] sm:$0xf0] }
  0x44   :  { %668 = vmatpush.bf16.msrb.mxu0 %v5359_v38  ;;  %v5595_v23 = vor.u32 %v7472_v21, %v5592_v22  ;;  %v5384_v25 = vld [vmem:[%s10056_s2 + $0x48] sm:$0xf0]  ;;  %v7436_v26 = vld [vmem:[%s10056_s2 + $0xc4] sm:$0xf]  ;;  %v7470_v32 = vld [vmem:[%s10056_s2 + $0x1d4] sm:$0xf]  ;;  %v5523_v33 = vor.u32 %v7454_v30, %v5520_v31 }
  0x45   :  { %681 = vmatpush.bf16.msrb.mxu1 %v5423_v43  ;;  %v5387_v27 = vor.u32 %v7420_v24, %v5384_v25  ;;  %v5448_v28 = vld [vmem:[%s10056_s2 + $0xc8] sm:$0xf0]  ;;  %v5584_v34 = vld [vmem:[%s10056_s2 + $0x1d8] sm:$0xf0]  ;;  %v7418_v36 = vld [vmem:[%s10056_s2 + $0x34] sm:$0xf] }
  0x46   :  { %694 = vmatpush.bf16.msrb.mxu2 %v5487_v52  ;;  %v5451_v29 = vor.u32 %v7436_v26, %v5448_v28  ;;  %v5587_v35 = vor.u32 %v7470_v32, %v5584_v34  ;;  %v5376_v37 = vld [vmem:[%s10056_s2 + $0x38] sm:$0xf0]  ;;  %v7434_v39 = vld [vmem:[%s10056_s2 + $0xb4] sm:$0xf]  ;;  %v7452_v42 = vld [vmem:[%s10056_s2 + $0x144] sm:$0xf] }
  0x47   :  { %707 = vmatpush.bf16.msrb.mxu3 %v5551_v54  ;;  %v5379_v38 = vor.u32 %v7418_v36, %v5376_v37  ;;  %v5440_v40 = vld [vmem:[%s10056_s2 + $0xb8] sm:$0xf0]  ;;  %v5512_v43 = vld [vmem:[%s10056_s2 + $0x148] sm:$0xf0]  ;;  %v7468_v44 = vld [vmem:[%s10056_s2 + $0x1c4] sm:$0xf] }
  0x48   :  { %669 = vmatpush.bf16.msrb.mxu0 %v5351_v53  ;;  %v5443_v41 = vor.u32 %v7434_v39, %v5440_v40  ;;  %v5515_v45 = vor.u32 %v7452_v42, %v5512_v43  ;;  %v5576_v46 = vld [vmem:[%s10056_s2 + $0x1c8] sm:$0xf0]  ;;  %v7416_v48 = vld [vmem:[%s10056_s2 + $0x24] sm:$0xf]  ;;  %v7450_v54 = vld [vmem:[%s10056_s2 + $0x134] sm:$0xf] }
  0x49   :  { %682 = vmatpush.bf16.msrb.mxu1 %v5415_v59  ;;  %v5579_v47 = vor.u32 %v7468_v44, %v5576_v46  ;;  %v5368_v49 = vld [vmem:[%s10056_s2 + $0x28] sm:$0xf0]  ;;  %v7432_v50 = vld [vmem:[%s10056_s2 + $0xa4] sm:$0xf]  ;;  %v5504_v55 = vld [vmem:[%s10056_s2 + $0x138] sm:$0xf0] }
  0x4a   :  { %695 = vmatpush.bf16.msrb.mxu2 %v5479_v6  ;;  %v5371_v51 = vor.u32 %v7416_v48, %v5368_v49  ;;  %v5432_v52 = vld [vmem:[%s10056_s2 + $0xa8] sm:$0xf0]  ;;  %v7466_v56 = vld [vmem:[%s10056_s2 + $0x1b4] sm:$0xf]  ;;  %v5507_v57 = vor.u32 %v7450_v54, %v5504_v55  ;;  %v5568_v58 = vld [vmem:[%s10056_s2 + $0x1b8] sm:$0xf0] }
  0x4b   :  { %708 = vmatpush.bf16.msrb.mxu3 %v5543_v7  ;;  %v5435_v53 = vor.u32 %v7432_v50, %v5432_v52  ;;  %v5571_v59 = vor.u32 %v7466_v56, %v5568_v58  ;;  %v5360_v61 = vld [vmem:[%s10056_s2 + $0x18] sm:$0xf0]  ;;  %v7430_v62 = vld [vmem:[%s10056_s2 + $0x94] sm:$0xf]  ;;  %v7448_v1 = vld [vmem:[%s10056_s2 + $0x124] sm:$0xf] }
  0x4c   :  { %714 = vmatpush.bf16.msra.mxu0 %v5411_v60  ;;  %v7414_v60 = vld [vmem:[%s10056_s2 + $0x14] sm:$0xf]  ;;  %v5496_v2 = vld [vmem:[%s10056_s2 + $0x128] sm:$0xf0]  ;;  %v7464_v5 = vld [vmem:[%s10056_s2 + $0x1a4] sm:$0xf] }
  0x4d   :  { %727 = vmatpush.bf16.msra.mxu1 %v5475_v0  ;;  %v5363_v63 = vor.u32 %v7414_v60, %v5360_v61  ;;  %v5424_v0 = vld [vmem:[%s10056_s2 + $0x98] sm:$0xf0]  ;;  %v5499_v4 = vor.u32 %v7448_v1, %v5496_v2  ;;  %v5560_v6 = vld [vmem:[%s10056_s2 + $0x1a8] sm:$0xf0]  ;;  %v7412_v7 = vld [vmem:[%s10056_s2 + $0x4] sm:$0xf] }
  0x4e   :  { %740 = vmatpush.bf16.msra.mxu2 %v5539_v8  ;;  %v5427_v3 = vor.u32 %v7430_v62, %v5424_v0  ;;  %v5563_v8 = vor.u32 %v7464_v5, %v5560_v6  ;;  %v7446_v14 = vld [vmem:[%s10056_s2 + $0x114] sm:$0xf]  ;;  %v5552_v18 = vld [vmem:[%s10056_s2 + $0x198] sm:$0xf0]  ;;  %v5480_v21 = vld [vmem:[%s10056_s2 + $0x108] sm:$0xf0] }
  0x4f   :  { %753 = vmatpush.bf16.msra.mxu3 %v5603_v10  ;;  %v7428_v10 = vld [vmem:[%s10056_s2 + $0x84] sm:$0xf]  ;;  %v7462_v16 = vld [vmem:[%s10056_s2 + $0x194] sm:$0xf]  ;;  %v5544_v24 = vld [vmem:[%s10056_s2 + $0x188] sm:$0xf0] }
  0x50   :  { %715 = vmatpush.bf16.msra.mxu0 %v5403_v9  ;;  %v5352_v9 = vld [vmem:[%s10056_s2 + $0x8] sm:$0xf0]  ;;  %v5555_v19 = vor.u32 %v7462_v16, %v5552_v18  ;;  %v7460_v22 = vld [vmem:[%s10056_s2 + $0x184] sm:$0xf]  ;;  %v147_v25 = vld [vmem:[#allocation13] sm:$0xf] }
  0x51   :  { %728 = vmatpush.bf16.msra.mxu1 %v5467_v11  ;;  %v5416_v11 = vld [vmem:[%s10056_s2 + $0x88] sm:$0xf0]  ;;  %v5355_v12 = vor.u32 %v7412_v7, %v5352_v9  ;;  %v5547_v26 = vor.u32 %v7460_v22, %v5544_v24  ;;  %v162_v28 = vperm.slane %v147_v25, 1  ;;  %v5718_v32 = vld [vmem:[#allocation5 + $0xe0] sm:$0xf]  ;;  %v163_v37 = vperm.slane %v147_v25, 2 }
  0x52   :  { %741 = vmatpush.bf16.msra.mxu2 %v5531_v20  ;;  %v5419_v13 = vor.u32 %v7428_v10, %v5416_v11  ;;  %v7444_v20 = vld [vmem:[%s10056_s2 + $0x104] sm:$0xf]  ;;  %v7502_v42 = vld [vmem:[#allocation5 + $0xcc] sm:$0xf0]  ;;  %v5846_v43 = vld [vmem:[#allocation5 + $0x1e0] sm:$0xf] }
  0x53   :  { %754 = vmatpush.bf16.msra.mxu3 %v5595_v23  ;;  %v5483_v23 = vor.u32 %v7444_v20, %v5480_v21  ;;  %v5720_v48 = vld [vmem:[#allocation5 + $0xf0] sm:$0xf0]  ;;  %v5686_v54 = vld [vmem:[#allocation5 + $0xa0] sm:$0xf]  ;;  %v7534_v56 = vld [vmem:[#allocation5 + $0x1cc] sm:$0xf0] }
  0x54   :  { %716 = vmatpush.bf16.msra.mxu0 %v5395_v15  ;;  %v5488_v15 = vld [vmem:[%s10056_s2 + $0x118] sm:$0xf0]  ;;  %v5830_v55 = vld [vmem:[#allocation5 + $0x1c0] sm:$0xf]  ;;  %v7536_v60 = vld [vmem:[#allocation5 + $0x1e4] sm:$0xf] }
  0x55   :  { %729 = vmatpush.bf16.msra.mxu1 %v5459_v17  ;;  %v5491_v17 = vor.u32 %v7446_v14, %v5488_v15  ;;  %v5848_v61 = vld [vmem:[#allocation5 + $0x1f0] sm:$0xf0]  ;;  %v5831_v62 = vor.u32 %v7534_v56, %v5830_v55  ;;  %v5670_v6 = vld [vmem:[#allocation5 + $0x80] sm:$0xf]  ;;  %v7494_v9 = vld [vmem:[#allocation5 + $0x8c] sm:$0xf0] }
  0x56   :  { %742 = vmatpush.bf16.msra.mxu2 %v5523_v33  ;;  %v7506_v33 = vld [vmem:[#allocation5 + $0xec] sm:$0xf0]  ;;  %v5851_v7 = vor.u32 %v7536_v60, %v5848_v61  ;;  %v7532_v10 = vld [vmem:[#allocation5 + $0x1c4] sm:$0xf]  ;;  %v5832_v11 = vld [vmem:[#allocation5 + $0x1d0] sm:$0xf0] }
  0x57   :  { %755 = vmatpush.bf16.msra.mxu3 %v5587_v35  ;;  %v5719_v39 = vor.u32 %v7506_v33, %v5718_v32  ;;  %v7496_v15 = vld [vmem:[#allocation5 + $0xa4] sm:$0xf]  ;;  %v5688_v16 = vld [vmem:[#allocation5 + $0xb0] sm:$0xf0]  ;;  %v5835_v18 = vor.u32 %v7532_v10, %v5832_v11  ;;  %v7490_v20 = vld [vmem:[#allocation5 + $0x6c] sm:$0xf0] }
  0x58   :  { %717 = vmatpush.bf16.msra.mxu0 %v5387_v27  ;;  %v161_v27 = vperm.slane %v147_v25, 0  ;;  %v5691_v21 = vor.u32 %v7496_v15, %v5688_v16  ;;  %v7492_v22 = vld [vmem:[#allocation5 + $0x84] sm:$0xf]  ;;  %v5640_v33 = vld [vmem:[#allocation5 + $0x50] sm:$0xf0]  ;;  %vm4095_vm8 = vcmask 523264  }
  0x59   :  { %730 = vmatpush.bf16.msra.mxu1 %v5451_v29  ;;  %v7484_v32 = vld [vmem:[#allocation5 + $0x44] sm:$0xf]  ;;  %v7507_v60 = vld [vmem:[#allocation5 + $0xf4] sm:$0xf0]  ;;  %v7505_v61 = vld [vmem:[#allocation5 + $0xec] sm:$0xf] }
  0x5a   :  { %743 = vmatpush.bf16.msra.mxu2 %v5515_v45  ;;  %v7538_v45 = vld [vmem:[#allocation5 + $0x1ec] sm:$0xf0]  ;;  %v7524_v56 = vld [vmem:[#allocation5 + $0x184] sm:$0xf]  ;;  %v7501_v10 = vld [vmem:[#allocation5 + $0xcc] sm:$0xf] }
  0x5b   :  { %756 = vmatpush.bf16.msra.mxu3 %v5579_v47  ;;  %v7504_v47 = vld [vmem:[#allocation5 + $0xe4] sm:$0xf]  ;;  %v5847_v49 = vor.u32 %v7538_v45, %v5846_v43  ;;  %v5816_v45 = vld [vmem:[#allocation5 + $0x1b0] sm:$0xf0]  ;;  %v5712_v11 = vld [vmem:[#allocation5 + $0xd8] sm:$0xf0] }
  0x5c   :  { %718 = vmatpush.bf16.msra.mxu0 %v5379_v38  ;;  %v164_v38 = vperm.slane %v147_v25, 3  ;;  %v5723_v1 = vor.u32 %v7504_v47, %v5720_v48  ;;  %v5638_v25 = vld [vmem:[#allocation5 + $0x40] sm:$0xf]  ;;  %v7478_v48 = vld [vmem:[#allocation5 + $0xc] sm:$0xf0]  ;;  %s5299_s24 = sshll.u32 %s10065_s11, 4  ;;  %s5300_s24 = int_to_ptr.hbm [resolvable:$true] %s5299_s24 }
  0x5d   :  { %731 = vmatpush.bf16.msra.mxu1 %v5443_v41  ;;  %v5702_v41 = vld [vmem:[#allocation5 + $0xc0] sm:$0xf]  ;;  %v7516_v15 = vld [vmem:[#allocation5 + $0x144] sm:$0xf] }
  0x5e   :  { %744 = vmatpush.bf16.msra.mxu2 %v5507_v57  ;;  %v5606_v47 = vld [vmem:[#allocation5] sm:$0xf] }
  0x5f   :  { %757 = vmatpush.bf16.msra.mxu3 %v5571_v59  ;;  %v7498_v59 = vld [vmem:[#allocation5 + $0xac] sm:$0xf0] }
  0x60   :  { %719 = vmatpush.bf16.msra.mxu0 %v5371_v51  ;;  %v5687_v5 = vor.u32 %v7498_v59, %v5686_v54 }
  0x61   :  { %732 = vmatpush.bf16.msra.mxu1 %v5435_v53  ;;  %v5703_v53 = vor.u32 %v7502_v42, %v5702_v41  ;;  %v5624_v41 = vld [vmem:[#allocation5 + $0x30] sm:$0xf0] }
  0x62   :  { %745 = vmatpush.bf16.msra.mxu2 %v5499_v4  ;;  %v5704_v4 = vld [vmem:[#allocation5 + $0xd0] sm:$0xf0] }
  0x63   :  { %758 = vmatpush.bf16.msra.mxu3 %v5563_v8 }
  0x64   :  { %720 = vmatpush.bf16.msra.mxu0 %v5363_v63 }
  0x65   :  { %733 = vmatpush.bf16.msra.mxu1 %v5427_v3  ;;  %v7500_v3 = vld [vmem:[#allocation5 + $0xc4] sm:$0xf] }
  0x66   :  { %746 = vmatpush.bf16.msra.mxu2 %v5491_v17  ;;  %v5671_v17 = vor.u32 %v7494_v9, %v5670_v6  ;;  %v5710_v6 = vld [vmem:[#allocation5 + $0xc8] sm:$0xf] }
  0x67   :  { %759 = vmatpush.bf16.msra.mxu3 %v5555_v19  ;;  %v5654_v19 = vld [vmem:[#allocation5 + $0x60] sm:$0xf] }
  0x68   :  { %721 = vmatpush.bf16.msra.mxu0 %v5355_v12  ;;  %v5655_v24 = vor.u32 %v7490_v20, %v5654_v19  ;;  %v7499_v19 = vld [vmem:[#allocation5 + $0xb4] sm:$0xf0] }
  0x69   :  { %734 = vmatpush.bf16.msra.mxu1 %v5419_v13  ;;  %v5707_v13 = vor.u32 %v7500_v3, %v5704_v4  ;;  %v7520_v3 = vld [vmem:[#allocation5 + $0x164] sm:$0xf] }
  0x6a   :  { %747 = vmatpush.bf16.msra.mxu2 %v5483_v23  ;;  %v5672_v23 = vld [vmem:[#allocation5 + $0x90] sm:$0xf0] }
  0x6b   :  { %760 = vmatpush.bf16.msra.mxu3 %v5547_v26  ;;  %v7486_v26 = vld [vmem:[#allocation5 + $0x4c] sm:$0xf0] }
  0xa8   :  { %v222_v29 = vpop.f32.mrf.mxu0 }
  0xa9   :  { %v223_v30 = vadd.f32 %v222_v29, %v161_v27  ;;  %v235_v31 = vpop.f32.mrf.mxu1  ;;  %v5675_v27 = vor.u32 %v7492_v22, %v5672_v23  ;;  %v5656_v29 = vld [vmem:[#allocation5 + $0x70] sm:$0xf0]  ;;  %v7497_v22 = vld [vmem:[#allocation5 + $0xac] sm:$0xf]  ;;  %v5696_v23 = vld [vmem:[#allocation5 + $0xb8] sm:$0xf0] }
  0xaa   :  { %v236_v34 = vadd.f32 %v235_v31, %v162_v28  ;;  %v7488_v28 = vld [vmem:[#allocation5 + $0x64] sm:$0xf] }
  0xab   :  { %v265_v35 = vmax.f32 %v223_v30, 0.0  ;;  %v5639_v30 = vor.u32 %v7486_v26, %v5638_v25  ;;  %v5659_v31 = vor.u32 %v7488_v28, %v5656_v29  ;;  %v5750_v25 = vld [vmem:[#allocation5 + $0x120] sm:$0xf]  ;;  %v7514_v26 = vld [vmem:[#allocation5 + $0x12c] sm:$0xf0] }
  0xac   :  { %v266_v36 = vmax.f32 %v236_v34, 0.0  ;;  %v5643_v34 = vor.u32 %v7484_v32, %v5640_v33  ;;  %v5751_v28 = vor.u32 %v7514_v26, %v5750_v25  ;;  %v5752_v29 = vld [vmem:[#allocation5 + $0x130] sm:$0xf0]  ;;  %v7495_v32 = vld [vmem:[#allocation5 + $0x94] sm:$0xf0] }
  0xad   :  { %v8644_v40 = vpack.c.bf16 %v265_v35, %v265_v35  ;;  %v5622_v35 = vld [vmem:[#allocation5 + $0x20] sm:$0xf]  ;;  %v7493_v33 = vld [vmem:[#allocation5 + $0x8c] sm:$0xf]  ;;  %v5616_v25 = vld [vmem:[#allocation5 + $0x18] sm:$0xf0] }
  0xae   :  { %v8646_v44 = vpack.c.bf16 %v266_v36, %v266_v36  ;;  %v7482_v36 = vld [vmem:[#allocation5 + $0x2c] sm:$0xf0] }
  0xaf   :  { %670 = vmatmul.bf16.vlgmr.msrb.gmra.mxu0 %v8644_v40 }
  0xb0   :  { %v248_v46 = vpop.f32.mrf.mxu2  ;;  %683 = vmatmul.bf16.vlgmr.msrb.gmra.mxu1 %v8646_v44  ;;  %v224_v52 = vpop.f32.mrf.mxu0  ;;  %1154 = vmatpush.bf16.msrb.mxu0 %v5719_v39  ;;  %v7530_v39 = vld [vmem:[#allocation5 + $0x1ac] sm:$0xf0] }
  0xb1   :  { %v249_v50 = vadd.f32 %v248_v46, %v163_v37  ;;  %v261_v51 = vpop.f32.mrf.mxu3  ;;  %v237_v58 = vpop.f32.mrf.mxu1  ;;  %1167 = vmatpush.bf16.msrb.mxu1 %v5847_v49  ;;  %v5814_v37 = vld [vmem:[#allocation5 + $0x1a0] sm:$0xf]  ;;  %v7476_v52 = vld [vmem:[#allocation5 + $0x4] sm:$0xf] }
  0xb2   :  { %v262_v57 = vadd.f32 %v261_v51, %v164_v38  ;;  %v5623_v38 = vor.u32 %v7482_v36, %v5622_v35  ;;  %v5815_v42 = vor.u32 %v7530_v39, %v5814_v37  ;;  %v5798_v49 = vld [vmem:[#allocation5 + $0x180] sm:$0xf]  ;;  %v7526_v51 = vld [vmem:[#allocation5 + $0x18c] sm:$0xf0]  ;;  %v5726_v58 = vld [vmem:[#allocation5 + $0xe8] sm:$0xf] }
  0xb3   :  { %v267_v63 = vmax.f32 %v249_v50, 0.0  ;;  %v5607_v50 = vor.u32 %v7478_v48, %v5606_v47  ;;  %v5799_v54 = vor.u32 %v7526_v51, %v5798_v49  ;;  %v5734_v37 = vld [vmem:[#allocation5 + $0x100] sm:$0xf]  ;;  %v7508_v39 = vld [vmem:[#allocation5 + $0x104] sm:$0xf] }
  0xb4   :  { %v268_v0 = vmax.f32 %v262_v57, 0.0  ;;  %1155 = vmatpush.bf16.msrb.mxu0 %v5703_v53  ;;  %v5608_v53 = vld [vmem:[#allocation5 + $0x10] sm:$0xf0]  ;;  %v7539_v47 = vld [vmem:[#allocation5 + $0x1f4] sm:$0xf0] }
  0xb5   :  { %v271_v2 = vpack.c.bf16 %v267_v63, %v267_v63  ;;  %1168 = vmatpush.bf16.msrb.mxu1 %v5831_v62  ;;  %v5611_v55 = vor.u32 %v7476_v52, %v5608_v53  ;;  %v5800_v57 = vld [vmem:[#allocation5 + $0x190] sm:$0xf0]  ;;  %v5728_v62 = vld [vmem:[#allocation5 + $0xf8] sm:$0xf0]  ;;  %v5727_v63 = vor.u32 %v7507_v60, %v5726_v58  ;;  %v7489_v48 = vld [vmem:[#allocation5 + $0x6c] sm:$0xf] }
  0xb6   :  { %v272_v8 = vpack.c.bf16 %v268_v0, %v268_v0  ;;  %v5803_v59 = vor.u32 %v7524_v56, %v5800_v57  ;;  %v5731_v0 = vor.u32 %v7505_v61, %v5728_v62  ;;  %v7537_v51 = vld [vmem:[#allocation5 + $0x1ec] sm:$0xf]  ;;  %v5856_v52 = vld [vmem:[#allocation5 + $0x1f8] sm:$0xf0]  ;;  %v7487_v56 = vld [vmem:[#allocation5 + $0x54] sm:$0xf0] }
  0xb7   :  { %696 = vmatmul.bf16.vlgmr.msrb.gmra.mxu2 %v271_v2  ;;  %v5838_v57 = vld [vmem:[#allocation5 + $0x1c8] sm:$0xf]  ;;  %v7485_v60 = vld [vmem:[#allocation5 + $0x4c] sm:$0xf]  ;;  %v5648_v61 = vld [vmem:[#allocation5 + $0x58] sm:$0xf0] }
  0xb8   :  { %709 = vmatmul.bf16.vlgmr.msrb.gmra.mxu3 %v272_v8  ;;  %v250_v12 = vpop.f32.mrf.mxu2  ;;  %1180 = vmatpush.bf16.msrb.mxu2 %v5723_v1  ;;  %v5782_v1 = vld [vmem:[#allocation5 + $0x160] sm:$0xf] }
  0xb9   :  { %v263_v14 = vpop.f32.mrf.mxu3  ;;  %1156 = vmatpush.bf16.msrb.mxu0 %v5687_v5  ;;  %1193 = vmatpush.bf16.msrb.mxu3 %v5851_v7  ;;  %v5784_v5 = vld [vmem:[#allocation5 + $0x170] sm:$0xf0]  ;;  %v7503_v7 = vld [vmem:[#allocation5 + $0xd4] sm:$0xf0]  ;;  %v5715_v12 = vor.u32 %v7501_v10, %v5712_v11  ;;  %v5632_v10 = vld [vmem:[#allocation5 + $0x38] sm:$0xf0] }
  0xba   :  { %1169 = vmatpush.bf16.msrb.mxu1 %v5815_v42  ;;  %v5711_v9 = vor.u32 %v7503_v7, %v5710_v6  ;;  %v7518_v14 = vld [vmem:[#allocation5 + $0x14c] sm:$0xf0]  ;;  %v5662_v42 = vld [vmem:[#allocation5 + $0x68] sm:$0xf] }
  0xbb   :  { %v5822_v6 = vld [vmem:[#allocation5 + $0x1a8] sm:$0xf] }
  0xbc   :  { %1181 = vmatpush.bf16.msrb.mxu2 %v5707_v13  ;;  %v5766_v13 = vld [vmem:[#allocation5 + $0x140] sm:$0xf] }
  0xbd   :  { %1157 = vmatpush.bf16.msrb.mxu0 %v5671_v17  ;;  %1194 = vmatpush.bf16.msrb.mxu3 %v5835_v18  ;;  %v5767_v16 = vor.u32 %v7518_v14, %v5766_v13  ;;  %v5768_v17 = vld [vmem:[#allocation5 + $0x150] sm:$0xf0]  ;;  %v5694_v18 = vld [vmem:[#allocation5 + $0xa8] sm:$0xf]  ;;  %v7529_v13 = vld [vmem:[#allocation5 + $0x1ac] sm:$0xf] }
  0xbe   :  { %1170 = vmatpush.bf16.msrb.mxu1 %v5799_v54  ;;  %v5771_v20 = vor.u32 %v7516_v15, %v5768_v17  ;;  %v5859_v54 = vor.u32 %v7537_v51, %v5856_v52  ;;  %v5824_v14 = vld [vmem:[#allocation5 + $0x1b8] sm:$0xf0] }
  0xbf   :  { %722 = vmatmul.bf16.vlgmr.msra.gmra.mxu0 %v8644_v40  ;;  %v7480_v40 = vld [vmem:[#allocation5 + $0x24] sm:$0xf]  ;;  %v5827_v17 = vor.u32 %v7529_v13, %v5824_v14 }
  0xc0   :  { %1182 = vmatpush.bf16.msrb.mxu2 %v5691_v21  ;;  %735 = vmatmul.bf16.vlgmr.msra.gmra.mxu1 %v8646_v44  ;;  %v5627_v43 = vor.u32 %v7480_v40, %v5624_v41  ;;  %v7528_v44 = vld [vmem:[#allocation5 + $0x1a4] sm:$0xf]  ;;  %v5695_v21 = vor.u32 %v7499_v19, %v5694_v18  ;;  %v5736_v41 = vld [vmem:[#allocation5 + $0x110] sm:$0xf0]  ;;  %v5614_v19 = vld [vmem:[#allocation5 + $0x8] sm:$0xf] }
  0xc1   :  { %1158 = vmatpush.bf16.msrb.mxu0 %v5655_v24  ;;  %v5819_v46 = vor.u32 %v7528_v44, %v5816_v45  ;;  %v5699_v24 = vor.u32 %v7497_v22, %v5696_v23  ;;  %v5739_v44 = vor.u32 %v7508_v39, %v5736_v41  ;;  %v7527_v23 = vld [vmem:[#allocation5 + $0x194] sm:$0xf0]  ;;  %v7517_v41 = vld [vmem:[#allocation5 + $0x14c] sm:$0xf] }
  0xc2   :  { %v7519_v39 = vld [vmem:[#allocation5 + $0x154] sm:$0xf0] }
  0xc3   :  { %1195 = vmatpush.bf16.msrb.mxu3 %v5819_v46  ;;  %v5854_v46 = vld [vmem:[#allocation5 + $0x1e8] sm:$0xf] }
  0xc4   :  { %1183 = vmatpush.bf16.msrb.mxu2 %v5675_v27  ;;  %v7512_v27 = vld [vmem:[#allocation5 + $0x124] sm:$0xf]  ;;  %v5855_v49 = vor.u32 %v7539_v47, %v5854_v46  ;;  %v5758_v47 = vld [vmem:[#allocation5 + $0x128] sm:$0xf] }
  0xc5   :  { %1159 = vmatpush.bf16.msrb.mxu0 %v5639_v30  ;;  %v5678_v30 = vld [vmem:[#allocation5 + $0x88] sm:$0xf] }
  0xc6   :  { %v5679_v35 = vor.u32 %v7495_v32, %v5678_v30  ;;  %v7523_v32 = vld [vmem:[#allocation5 + $0x174] sm:$0xf0] }
  0xc7   :  { %748 = vmatmul.bf16.vlgmr.msra.gmra.mxu2 %v271_v2  ;;  %v7522_v2 = vld [vmem:[#allocation5 + $0x16c] sm:$0xf0]  ;;  %1196 = vmatpush.bf16.msrb.mxu3 %v5803_v59  ;;  %v7535_v59 = vld [vmem:[#allocation5 + $0x1d4] sm:$0xf0] }
  0xc8   :  { %761 = vmatmul.bf16.vlgmr.msra.gmra.mxu3 %v272_v8  ;;  %1184 = vmatpush.bf16.msrb.mxu2 %v5659_v31  ;;  %v5783_v4 = vor.u32 %v7522_v2, %v5782_v1  ;;  %v5787_v8 = vor.u32 %v7520_v3, %v5784_v5  ;;  %v5755_v31 = vor.u32 %v7512_v27, %v5752_v29  ;;  %v5840_v1 = vld [vmem:[#allocation5 + $0x1d8] sm:$0xf0]  ;;  %v8652_v2 = vld [vmem:[#allocation13 + $0x4] sm:$0x3]  ;;  %v7483_v5 = vld [vmem:[#allocation5 + $0x34] sm:$0xf0] }
  0xc9   :  { %1160 = vmatpush.bf16.msrb.mxu0 %v5623_v38  ;;  %v7510_v38 = vld [vmem:[#allocation5 + $0x10c] sm:$0xf0]  ;;  %v5839_v62 = vor.u32 %v7535_v59, %v5838_v57  ;;  %v338_v15 = vperm.slane %v8652_v2, 0  ;;  %v5808_v29 = vld [vmem:[#allocation5 + $0x198] sm:$0xf0] }
  0xca   :  { %1171 = vmatpush.bf16.msrb.mxu1 %v5783_v4  ;;  %v5735_v40 = vor.u32 %v7510_v38, %v5734_v37  ;;  %v5630_v4 = vld [vmem:[#allocation5 + $0x28] sm:$0xf]  ;;  %v7511_v59 = vld [vmem:[#allocation5 + $0x114] sm:$0xf0] }
  0xcb   :  { %1197 = vmatpush.bf16.msrb.mxu3 %v5787_v8  ;;  %v5631_v7 = vor.u32 %v7483_v5, %v5630_v4  ;;  %v7531_v8 = vld [vmem:[#allocation5 + $0x1b4] sm:$0xf0]  ;;  %v5774_v38 = vld [vmem:[#allocation5 + $0x148] sm:$0xf]  ;;  %v339_v4 = vperm.slane %v8652_v2, 1 }
  0xcc   :  { %1185 = vmatpush.bf16.msrb.mxu2 %v5643_v34  ;;  %v5680_v34 = vld [vmem:[#allocation5 + $0x98] sm:$0xf0]  ;;  %v5823_v11 = vor.u32 %v7531_v8, %v5822_v6 }
  0xcd   :  { %1161 = vmatpush.bf16.msrb.mxu0 %v5607_v50  ;;  %v5683_v36 = vor.u32 %v7493_v33, %v5680_v34  ;;  %v5664_v50 = vld [vmem:[#allocation5 + $0x78] sm:$0xf0]  ;;  %v7521_v33 = vld [vmem:[#allocation5 + $0x16c] sm:$0xf] }
  0xce   :  { %1172 = vmatpush.bf16.msrb.mxu1 %v5767_v16  ;;  %v5667_v53 = vor.u32 %v7489_v48, %v5664_v50  ;;  %v7515_v48 = vld [vmem:[#allocation5 + $0x134] sm:$0xf0]  ;;  %v5760_v50 = vld [vmem:[#allocation5 + $0x138] sm:$0xf0] }
  0xcf   :  { %1198 = vmatpush.bf16.msrb.mxu3 %v5771_v20  ;;  %v7479_v20 = vld [vmem:[#allocation5 + $0x14] sm:$0xf0] }
  0xd0   :  { %1186 = vmatpush.bf16.msrb.mxu2 %v5627_v43  ;;  %v7491_v43 = vld [vmem:[#allocation5 + $0x74] sm:$0xf0]  ;;  %v5615_v22 = vor.u32 %v7479_v20, %v5614_v19  ;;  %v1272_v19 = vld [vmem:[#allocation7 + $0x70] sm:$0xff]  ;;  %v1271_v20 = vld [vmem:[#allocation7 + $0x68] sm:$0xff] }
  0xd1   :  { %1206 = vmatpush.bf16.msra.mxu0 %v5727_v63  ;;  %v5663_v45 = vor.u32 %v7491_v43, %v5662_v42  ;;  %v5651_v63 = vor.u32 %v7485_v60, %v5648_v61  ;;  %v5776_v42 = vld [vmem:[#allocation5 + $0x158] sm:$0xf0]  ;;  %v7509_v60 = vld [vmem:[#allocation5 + $0x10c] sm:$0xf] }
  0xd2   :  { %1173 = vmatpush.bf16.msrb.mxu1 %v5751_v28  ;;  %v7525_v28 = vld [vmem:[#allocation5 + $0x18c] sm:$0xf]  ;;  %v5779_v46 = vor.u32 %v7517_v41, %v5776_v42  ;;  %v5744_v61 = vld [vmem:[#allocation5 + $0x118] sm:$0xf0]  ;;  %v1302_v42 = vld [vmem:[#allocation7 + $0x160] sm:$0xff] }
  0xd3   :  { %1199 = vmatpush.bf16.msrb.mxu3 %v5755_v31  ;;  %v5811_v30 = vor.u32 %v7525_v28, %v5808_v29  ;;  %v5790_v31 = vld [vmem:[#allocation5 + $0x168] sm:$0xf]  ;;  %v1273_v2 = vld [vmem:[#allocation7 + $0x78] sm:$0xff]  ;;  %v1286_v28 = vld [vmem:[#allocation7 + $0xe0] sm:$0xff] }
  0xd4   :  { %1187 = vmatpush.bf16.msrb.mxu2 %v5611_v55  ;;  %v5646_v55 = vld [vmem:[#allocation5 + $0x48] sm:$0xf]  ;;  %v1266_v29 = vld [vmem:[#allocation7 + $0x40] sm:$0xff]  ;;  %v1281_v41 = vld [vmem:[#allocation7 + $0xb8] sm:$0xff] }
  0xd5   :  { %1207 = vmatpush.bf16.msra.mxu0 %v5711_v9  ;;  %v5647_v58 = vor.u32 %v7487_v56, %v5646_v55  ;;  %v7481_v9 = vld [vmem:[#allocation5 + $0x2c] sm:$0xf]  ;;  %v5742_v56 = vld [vmem:[#allocation5 + $0x108] sm:$0xf] }
  0xd6   :  { %1174 = vmatpush.bf16.msrb.mxu1 %v5735_v40 }
  0xd7   :  { %1200 = vmatpush.bf16.msrb.mxu3 %v5739_v44 }
  0xd8   :  { %1232 = vmatpush.bf16.msra.mxu2 %v5731_v0  ;;  %v7533_v0 = vld [vmem:[#allocation5 + $0x1cc] sm:$0xf] }
  0xd9   :  { %1208 = vmatpush.bf16.msra.mxu0 %v5695_v21  ;;  %v5843_v3 = vor.u32 %v7533_v0, %v5840_v1  ;;  %v5806_v21 = vld [vmem:[#allocation5 + $0x188] sm:$0xf]  ;;  %v5743_v0 = vor.u32 %v7511_v59, %v5742_v56  ;;  %v5747_v1 = vor.u32 %v7509_v60, %v5744_v61  ;;  %v1318_v56 = vld [vmem:[#allocation7 + $0x1e0] sm:$0xff]  ;;  %v1317_v60 = vld [vmem:[#allocation7 + $0x1d8] sm:$0xff] }
  0xda   :  { %1219 = vmatpush.bf16.msra.mxu1 %v5855_v49  ;;  %v5807_v26 = vor.u32 %v7527_v23, %v5806_v21  ;;  %v7513_v49 = vld [vmem:[#allocation5 + $0x12c] sm:$0xf]  ;;  %v1270_v21 = vld [vmem:[#allocation7 + $0x60] sm:$0xff]  ;;  %v1269_v23 = vld [vmem:[#allocation7 + $0x58] sm:$0xff] }
  0xdb   :  { %1245 = vmatpush.bf16.msra.mxu3 %v5859_v54  ;;  %v5759_v54 = vor.u32 %v7515_v48, %v5758_v47  ;;  %v5763_v55 = vor.u32 %v7513_v49, %v5760_v50  ;;  %v1320_v47 = vld [vmem:[#allocation7 + $0x1f0] sm:$0xff]  ;;  %v1279_v49 = vld [vmem:[#allocation7 + $0xa8] sm:$0xff]  ;;  %v1298_v59 = vld [vmem:[#allocation7 + $0x140] sm:$0xff] }
  0xdc   :  { %1233 = vmatpush.bf16.msra.mxu2 %v5715_v12  ;;  %v5635_v12 = vor.u32 %v7481_v9, %v5632_v10  ;;  %v1260_v48 = vld [vmem:[#allocation7 + $0x10] sm:$0xff] }
  0xdd   :  { %1209 = vmatpush.bf16.msra.mxu0 %v5679_v35  ;;  %v5791_v35 = vor.u32 %v7523_v32, %v5790_v31  ;;  %v1265_v31 = vld [vmem:[#allocation7 + $0x38] sm:$0xff]  ;;  %v1284_v32 = vld [vmem:[#allocation7 + $0xd0] sm:$0xff] }
  0xde   :  { %1220 = vmatpush.bf16.msra.mxu1 %v5839_v62  ;;  %v1300_v50 = vld [vmem:[#allocation7 + $0x150] sm:$0xff] }
  0xdf   :  { %1246 = vmatpush.bf16.msra.mxu3 %v5843_v3  ;;  %v1276_v61 = vld [vmem:[#allocation7 + $0x90] sm:$0xff] }
  0xe0   :  { %1234 = vmatpush.bf16.msra.mxu2 %v5699_v24  ;;  %v7477_v24 = vld [vmem:[#allocation5 + $0xc] sm:$0xf] }
  0xe1   :  { %1210 = vmatpush.bf16.msra.mxu0 %v5663_v45  ;;  %v5619_v27 = vor.u32 %v7477_v24, %v5616_v25  ;;  %v5775_v45 = vor.u32 %v7519_v39, %v5774_v38  ;;  %v1288_v24 = vld [vmem:[#allocation7 + $0xf0] sm:$0xff]  ;;  %v1282_v38 = vld [vmem:[#allocation7 + $0xc0] sm:$0xff]  ;;  %v1303_v39 = vld [vmem:[#allocation7 + $0x168] sm:$0xff] }
  0xe2   :  { %1221 = vmatpush.bf16.msra.mxu1 %v5823_v11  ;;  %v1268_v25 = vld [vmem:[#allocation7 + $0x50] sm:$0xff] }
  0xe3   :  { %1247 = vmatpush.bf16.msra.mxu3 %v5827_v17 }
  0xe4   :  { %1235 = vmatpush.bf16.msra.mxu2 %v5683_v36  ;;  %v5792_v36 = vld [vmem:[#allocation5 + $0x178] sm:$0xf0] }
  0xe5   :  { %1211 = vmatpush.bf16.msra.mxu0 %v5647_v58  ;;  %v5795_v37 = vor.u32 %v7521_v33, %v5792_v36  ;;  %v1305_v33 = vld [vmem:[#allocation7 + $0x178] sm:$0xff]  ;;  %v1304_v36 = vld [vmem:[#allocation7 + $0x170] sm:$0xff] }
  0xe6   :  { %1222 = vmatpush.bf16.msra.mxu1 %v5807_v26  ;;  %v1287_v26 = vld [vmem:[#allocation7 + $0xe8] sm:$0xff] }
  0xe7   :  { %1248 = vmatpush.bf16.msra.mxu3 %v5811_v30  ;;  %v1285_v30 = vld [vmem:[#allocation7 + $0xd8] sm:$0xff] }
  0xe8   :  { %1236 = vmatpush.bf16.msra.mxu2 %v5667_v53 }
  0xe9   :  { %1212 = vmatpush.bf16.msra.mxu0 %v5631_v7 }
  0xea   :  { %1223 = vmatpush.bf16.msra.mxu1 %v5791_v35  ;;  %v1283_v35 = vld [vmem:[#allocation7 + $0xc8] sm:$0xff] }
  0xeb   :  { %1249 = vmatpush.bf16.msra.mxu3 %v5795_v37  ;;  %v1263_v37 = vld [vmem:[#allocation7 + $0x28] sm:$0xff] }
  0xec   :  { %1237 = vmatpush.bf16.msra.mxu2 %v5651_v63 }
  0xed   :  { %1213 = vmatpush.bf16.msra.mxu0 %v5615_v22  ;;  %v1289_v22 = vld [vmem:[#allocation7 + $0xf8] sm:$0xff] }
  0xee   :  { %1224 = vmatpush.bf16.msra.mxu1 %v5775_v45  ;;  %v1280_v45 = vld [vmem:[#allocation7 + $0xb0] sm:$0xff] }
  0xef   :  { %1250 = vmatpush.bf16.msra.mxu3 %v5779_v46  ;;  %v1301_v46 = vld [vmem:[#allocation7 + $0x158] sm:$0xff] }
  0xf0   :  { %1238 = vmatpush.bf16.msra.mxu2 %v5635_v12 }
  0xf2   :  { %1225 = vmatpush.bf16.msra.mxu1 %v5759_v54  ;;  %v1299_v54 = vld [vmem:[#allocation7 + $0x148] sm:$0xff] }
  0xf3   :  { %1251 = vmatpush.bf16.msra.mxu3 %v5763_v55 }
  0xf4   :  { %1239 = vmatpush.bf16.msra.mxu2 %v5619_v27  ;;  %v1267_v27 = vld [vmem:[#allocation7 + $0x48] sm:$0xff] }
  0xf6   :  { %1226 = vmatpush.bf16.msra.mxu1 %v5743_v0  ;;  %v1275_v0 = vld [vmem:[#allocation7 + $0x88] sm:$0xff] }
  0xf7   :  { %1252 = vmatpush.bf16.msra.mxu3 %v5747_v1  ;;  %v1296_v1 = vld [vmem:[#allocation7 + $0x130] sm:$0xff] }
 0x12c   :  { %v671_v16 = vpop.f32.mrf.mxu0 }
 0x12d   :  { %v684_v18 = vpop.f32.mrf.mxu1  ;;  %v672_v34 = vadd.f32 %v671_v16, %v338_v15 }
 0x12f   :  { %v685_v44 = vadd.f32 %v684_v18, %v672_v34  ;;  %v1264_v34 = vld [vmem:[#allocation7 + $0x30] sm:$0xff] }
 0x134   :  { %v673_v40 = vpop.f32.mrf.mxu0 }
 0x135   :  { %v686_v43 = vpop.f32.mrf.mxu1  ;;  %v1262_v40 = vld [vmem:[#allocation7 + $0x20] sm:$0xff] }
 0x136   :  { %v1321_v43 = vld [vmem:[#allocation7 + $0x1f8] sm:$0xff] }
 0x13a   :  { %v697_v51 = vpop.f32.mrf.mxu2 }
 0x13b   :  { %v698_v52 = vadd.f32 %v697_v51, %v685_v44  ;;  %v710_v53 = vpop.f32.mrf.mxu3  ;;  %v1261_v44 = vld [vmem:[#allocation7 + $0x18] sm:$0xff]  ;;  %v1319_v51 = vld [vmem:[#allocation7 + $0x1e8] sm:$0xff] }
 0x13c   :  { %v723_v58 = vpop.f32.mrf.mxu0 }
 0x13d   :  { %v711_v57 = vadd.f32 %v710_v53, %v698_v52  ;;  %v736_v62 = vpop.f32.mrf.mxu1  ;;  %v724_v7 = vadd.f32 %v723_v58, %v339_v4  ;;  %v1259_v52 = vld [vmem:[#allocation7 + $0x8] sm:$0xff]  ;;  %v1278_v53 = vld [vmem:[#allocation7 + $0xa0] sm:$0xff]  ;;  %v1277_v58 = vld [vmem:[#allocation7 + $0x98] sm:$0xff] }
 0x13f   :  { %v766_v63 = vmax.f32 %v711_v57, 0.0  ;;  %v737_v10 = vadd.f32 %v736_v62, %v724_v7  ;;  %v1258_v57 = vld [vmem:[#allocation7] sm:$0xff]  ;;  %v1297_v62 = vld [vmem:[#allocation7 + $0x138] sm:$0xff] }
 0x140   :  { %v1314_v7 = vld [vmem:[#allocation7 + $0x1c0] sm:$0xff] }
 0x141   :  { %v768_v3 = vpack.c.bf16 %v766_v63, %v766_v63  ;;  %v1316_v63 = vld [vmem:[#allocation7 + $0x1d0] sm:$0xff] }
 0x142   :  { %v699_v5 = vpop.f32.mrf.mxu2 }
 0x143   :  { %v712_v6 = vpop.f32.mrf.mxu3  ;;  %1162 = vmatmul.bf16.vlgmr.msrb.gmra.mxu0 %v768_v3  ;;  %1188 = vmatmul.bf16.vlgmr.msrb.gmra.mxu2 %v768_v3  ;;  %v1274_v5 = vld [vmem:[#allocation7 + $0x80] sm:$0xff] }
 0x144   :  { %v725_v8 = vpop.f32.mrf.mxu0  ;;  %1445 = vmatpush.msrb.mxu0 %v1273_v2  ;;  %1485 = vmatpush.msrb.mxu2 %v1305_v33  ;;  %v1295_v6 = vld [vmem:[#allocation7 + $0x128] sm:$0xff]  ;;  %v1290_v2 = vld [vmem:[#allocation7 + $0x100] sm:$0xff] }
 0x145   :  { %v738_v9 = vpop.f32.mrf.mxu1 }
 0x146   :  { %1446 = vmatpush.msrb.mxu0 %v1272_v19  ;;  %1486 = vmatpush.msrb.mxu2 %v1304_v36  ;;  %v1294_v9 = vld [vmem:[#allocation7 + $0x120] sm:$0xff]  ;;  %v1309_v19 = vld [vmem:[#allocation7 + $0x198] sm:$0xff] }
 0x148   :  { %1447 = vmatpush.msrb.mxu0 %v1271_v20  ;;  %1487 = vmatpush.msrb.mxu2 %v1303_v39 }
 0x14a   :  { %v749_v11 = vpop.f32.mrf.mxu2  ;;  %1448 = vmatpush.msrb.mxu0 %v1270_v21  ;;  %1488 = vmatpush.msrb.mxu2 %v1302_v42 }
 0x14b   :  { %v750_v12 = vadd.f32 %v749_v11, %v737_v10  ;;  %v762_v13 = vpop.f32.mrf.mxu3  ;;  %v1313_v10 = vld [vmem:[#allocation7 + $0x1b8] sm:$0xff] }
 0x14c   :  { %1449 = vmatpush.msrb.mxu0 %v1269_v23  ;;  %1489 = vmatpush.msrb.mxu2 %v1301_v46  ;;  %v1293_v11 = vld [vmem:[#allocation7 + $0x118] sm:$0xff] }
 0x14d   :  { %v763_v14 = vadd.f32 %v762_v13, %v750_v12  ;;  %v1312_v12 = vld [vmem:[#allocation7 + $0x1b0] sm:$0xff] }
 0x14e   :  { %1450 = vmatpush.msrb.mxu0 %v1268_v25  ;;  %1490 = vmatpush.msrb.mxu2 %v1300_v50  ;;  %v1292_v13 = vld [vmem:[#allocation7 + $0x110] sm:$0xff]  ;;  %v1307_v25 = vld [vmem:[#allocation7 + $0x188] sm:$0xff] }
 0x14f   :  { %v767_v15 = vmax.f32 %v763_v14, 0.0  ;;  %v1311_v14 = vld [vmem:[#allocation7 + $0x1a8] sm:$0xff] }
 0x150   :  { %1451 = vmatpush.msrb.mxu0 %v1267_v27  ;;  %1491 = vmatpush.msrb.mxu2 %v1299_v54 }
 0x151   :  { %v769_v16 = vpack.c.bf16 %v767_v15, %v767_v15 }
 0x152   :  { %v751_v17 = vpop.f32.mrf.mxu2  ;;  %1452 = vmatpush.msrb.mxu0 %v1266_v29  ;;  %1492 = vmatpush.msrb.mxu2 %v1298_v59  ;;  %v1438_v29 = vlaneseq }
 0x153   :  { %v764_v18 = vpop.f32.mrf.mxu3  ;;  %1175 = vmatmul.bf16.vlgmr.msrb.gmra.mxu1 %v769_v16  ;;  %1201 = vmatmul.bf16.vlgmr.msrb.gmra.mxu3 %v769_v16  ;;  %v1310_v17 = vld [vmem:[#allocation7 + $0x1a0] sm:$0xff] }
 0x154   :  { %1214 = vmatmul.bf16.vlgmr.msra.gmra.mxu0 %v768_v3  ;;  %1240 = vmatmul.bf16.vlgmr.msra.gmra.mxu2 %v768_v3  ;;  %v1315_v3 = vld [vmem:[#allocation7 + $0x1c8] sm:$0xff] }
 0x155   :  { %1465 = vmatpush.msrb.mxu1 %v1289_v22  ;;  %1453 = vmatpush.msrb.mxu0 %v1265_v31  ;;  %v1308_v22 = vld [vmem:[#allocation7 + $0x190] sm:$0xff] }
 0x156   :  { %1505 = vmatpush.msrb.mxu3 %v1321_v43  ;;  %1493 = vmatpush.msrb.mxu2 %v1297_v62 }
 0x157   :  { %1466 = vmatpush.msrb.mxu1 %v1288_v24  ;;  %1454 = vmatpush.msrb.mxu0 %v1264_v34 }
 0x158   :  { %1506 = vmatpush.msrb.mxu3 %v1320_v47  ;;  %1494 = vmatpush.msrb.mxu2 %v1296_v1 }
 0x159   :  { %1467 = vmatpush.msrb.mxu1 %v1287_v26  ;;  %1455 = vmatpush.msrb.mxu0 %v1263_v37 }
 0x15a   :  { %1507 = vmatpush.msrb.mxu3 %v1319_v51  ;;  %1495 = vmatpush.msrb.mxu2 %v1295_v6 }
 0x15b   :  { %1468 = vmatpush.msrb.mxu1 %v1286_v28  ;;  %1456 = vmatpush.msrb.mxu0 %v1262_v40 }
 0x15c   :  { %1508 = vmatpush.msrb.mxu3 %v1318_v56  ;;  %1496 = vmatpush.msrb.mxu2 %v1294_v9 }
 0x15d   :  { %1469 = vmatpush.msrb.mxu1 %v1285_v30  ;;  %1457 = vmatpush.msrb.mxu0 %v1261_v44  ;;  %v1306_v30 = vld [vmem:[#allocation7 + $0x180] sm:$0xff] }
 0x15e   :  { %1509 = vmatpush.msrb.mxu3 %v1317_v60  ;;  %1497 = vmatpush.msrb.mxu2 %v1293_v11 }
 0x15f   :  { %1470 = vmatpush.msrb.mxu1 %v1284_v32  ;;  %1458 = vmatpush.msrb.mxu0 %v1260_v48 }
 0x160   :  { %1510 = vmatpush.msrb.mxu3 %v1316_v63  ;;  %1498 = vmatpush.msrb.mxu2 %v1292_v13 }
 0x161   :  { %1471 = vmatpush.msrb.mxu1 %v1283_v35  ;;  %1459 = vmatpush.msrb.mxu0 %v1259_v52 }
 0x162   :  { %1511 = vmatpush.msrb.mxu3 %v1315_v3 }
 0x163   :  { %1227 = vmatmul.bf16.vlgmr.msra.gmra.mxu1 %v769_v16  ;;  %1253 = vmatmul.bf16.vlgmr.msra.gmra.mxu3 %v769_v16  ;;  %v1291_v16 = vld [vmem:[#allocation7 + $0x108] sm:$0xff] }
 0x164   :  { %1472 = vmatpush.msrb.mxu1 %v1282_v38  ;;  %1460 = vmatpush.msrb.mxu0 %v1258_v57 }
 0x165   :  { %1512 = vmatpush.msrb.mxu3 %v1314_v7  ;;  %1499 = vmatpush.msrb.mxu2 %v1291_v16 }
 0x166   :  { %1473 = vmatpush.msrb.mxu1 %v1281_v41  ;;  %v8667_v41 = vshrl.u32 %v1438_v29, 7 }
 0x167   :  { %1513 = vmatpush.msrb.mxu3 %v1313_v10  ;;  %1500 = vmatpush.msrb.mxu2 %v1290_v2 }
 0x168   :  { %1474 = vmatpush.msrb.mxu1 %v1280_v45  ;;  %vm1440_vm1 = vcmp.eq.s32.totalorder %v8667_v41, 0  ;;  %v7841_v41 = vld [vmem:[%s10063_s9 + $0x164] sm:$0xf0] }
 0x169   :  { %1514 = vmatpush.msrb.mxu3 %v1312_v12 }
 0x16a   :  { %1475 = vmatpush.msrb.mxu1 %v1279_v49 }
 0x16b   :  { %1515 = vmatpush.msrb.mxu3 %v1311_v14 }
 0x16c   :  { %1476 = vmatpush.msrb.mxu1 %v1278_v53 }
 0x16d   :  { %1516 = vmatpush.msrb.mxu3 %v1310_v17 }
 0x16e   :  { %1477 = vmatpush.msrb.mxu1 %v1277_v58 }
 0x16f   :  { %1517 = vmatpush.msrb.mxu3 %v1309_v19 }
 0x170   :  { %1478 = vmatpush.msrb.mxu1 %v1276_v61 }
 0x171   :  { %1518 = vmatpush.msrb.mxu3 %v1308_v22 }
 0x172   :  { %1479 = vmatpush.msrb.mxu1 %v1275_v0 }
 0x173   :  { %1519 = vmatpush.msrb.mxu3 %v1307_v25 }
 0x174   :  { %1480 = vmatpush.msrb.mxu1 %v1274_v5 }
 0x175   :  { %1520 = vmatpush.msrb.mxu3 %v1306_v30 }
 0x1c0   :  { %v1163_v55 = vpop.f32.mrf.mxu0 }
 0x1c6   :  { %v1189_v4 = vpop.f32.mrf.mxu2 }
 0x1c8   :  { %v1165_v8 = vpop.f32.mrf.mxu0 }
 0x1ce   :  { %v1191_v15 = vpop.f32.mrf.mxu2 }
 0x1d0   :  { %v1176_v18 = vpop.f32.mrf.mxu1 }
 0x1d1   :  { %v8656_v20 = vadd.f32 %v1176_v18, %v1163_v55  ;;  %v1215_v21 = vpop.f32.mrf.mxu0 }
 0x1d3   :  { %v1386_v23 = vrot.slane %v8656_v20, 4  ;;  %v1410_v24 = vmul.f32 %v8656_v20, %v8656_v20 }
 0x1d5   :  { %v1387_v26 = vadd.f32 %v1386_v23, %v8656_v20  ;;  %v1414_v27 = vrot.slane %v1410_v24, 4 }
 0x1d6   :  { %v1202_v28 = vpop.f32.mrf.mxu3 }
 0x1d7   :  { %v1388_v31 = vrot.slane %v1387_v26, 2  ;;  %v1415_v32 = vadd.f32 %v1414_v27, %v1410_v24  ;;  %v8662_v33 = vadd.f32 %v1202_v28, %v1189_v4  ;;  %v1241_v34 = vpop.f32.mrf.mxu2 }
 0x1d8   :  { %v1178_v35 = vpop.f32.mrf.mxu1 }
 0x1d9   :  { %v1392_v36 = vrot.slane %v8662_v33, 4  ;;  %v1411_v37 = vmul.f32 %v8662_v33, %v8662_v33  ;;  %v1217_v38 = vpop.f32.mrf.mxu0  ;;  %v1389_v39 = vadd.f32 %v1388_v31, %v1387_v26  ;;  %v1416_v40 = vrot.slane %v1415_v32, 2  ;;  %v1383_v35 = vld [vmem:[#allocation8 + $0x1e8] sm:$0xff] }
 0x1da   :  { %1570 = vmatpush.msra.mxu1 %v1383_v35  ;;  %v1378_v38 = vld [vmem:[#allocation8 + $0x1c0] sm:$0xff]  ;;  %v1331_v35 = vld [vmem:[#allocation8 + $0x48] sm:$0xff] }
 0x1db   :  { %v1393_v42 = vadd.f32 %v1392_v36, %v8662_v33  ;;  %v1420_v43 = vrot.slane %v1411_v37, 4  ;;  %v1390_v44 = vrot.slane %v1389_v39, 1  ;;  %v1417_v45 = vadd.f32 %v1416_v40, %v1415_v32  ;;  %v1384_v36 = vld [vmem:[#allocation8 + $0x1f0] sm:$0xff] }
 0x1dc   :  { %1590 = vmatpush.msra.mxu2 %v1384_v36  ;;  %v1380_v40 = vld [vmem:[#allocation8 + $0x1d0] sm:$0xff] }
 0x1dd   :  { %v1394_v46 = vrot.slane %v1393_v42, 2  ;;  %v1421_v47 = vadd.f32 %v1420_v43, %v1411_v37  ;;  %v1418_v48 = vrot.slane %v1417_v45, 1  ;;  %v1391_v51 = vadd.f32 %v1390_v44, %v1389_v39  ;;  %v1385_v37 = vld [vmem:[#allocation8 + $0x1f8] sm:$0xff]  ;;  %v1379_v39 = vld [vmem:[#allocation8 + $0x1c8] sm:$0xff]  ;;  %v1374_v43 = vld [vmem:[#allocation8 + $0x1a0] sm:$0xff] }
 0x1de   :  { %v1204_v49 = vpop.f32.mrf.mxu3  ;;  %1610 = vmatpush.msra.mxu3 %v1385_v37  ;;  %1571 = vmatpush.msra.mxu1 %v1379_v39  ;;  %v1375_v44 = vld [vmem:[#allocation8 + $0x1a8] sm:$0xff]  ;;  %v1332_v36 = vld [vmem:[#allocation8 + $0x50] sm:$0xff]  ;;  %v1333_v37 = vld [vmem:[#allocation8 + $0x58] sm:$0xff] }
 0x1df   :  { %v1243_v50 = vpop.f32.mrf.mxu2  ;;  %v1419_v52 = vadd.f32 %v1418_v48, %v1417_v45  ;;  %v1395_v53 = vadd.f32 %v1394_v46, %v1393_v42  ;;  %v1422_v54 = vrot.slane %v1421_v47, 2  ;;  %v1381_v42 = vld [vmem:[#allocation8 + $0x1d8] sm:$0xff]  ;;  %1591 = vmatpush.msra.mxu2 %v1380_v40  ;;  %v1376_v45 = vld [vmem:[#allocation8 + $0x1b0] sm:$0xff]  ;;  %v1371_v48 = vld [vmem:[#allocation8 + $0x188] sm:$0xff] }
 0x1e0   :  { %v1228_v55 = vpop.f32.mrf.mxu1  ;;  %1611 = vmatpush.msra.mxu3 %v1381_v42  ;;  %1572 = vmatpush.msra.mxu1 %v1375_v44  ;;  %v1377_v46 = vld [vmem:[#allocation8 + $0x1b8] sm:$0xff]  ;;  %v1372_v49 = vld [vmem:[#allocation8 + $0x190] sm:$0xff]  ;;  %v1327_v39 = vld [vmem:[#allocation8 + $0x28] sm:$0xff] }
 0x1e1   :  { %v8671_v56 = vadd.f32 %v1228_v55, %v1215_v21  ;;  %v1441_v57 = vsel %vm1440_vm1, %v1391_v51, %v1419_v52  ;;  %v1396_v58 = vrot.slane %v1395_v53, 1  ;;  %v1423_v59 = vadd.f32 %v1422_v54, %v1421_v47  ;;  %1592 = vmatpush.msra.mxu2 %v1376_v45  ;;  %v1370_v47 = vld [vmem:[#allocation8 + $0x180] sm:$0xff]  ;;  %v1373_v50 = vld [vmem:[#allocation8 + $0x198] sm:$0xff]  ;;  %v1367_v52 = vld [vmem:[#allocation8 + $0x168] sm:$0xff] }
 0x1e2   :  { %1461 = vmatmul.f32.vlgmr.msrb.gmra.mxu0 %v1441_v57  ;;  %1612 = vmatpush.msra.mxu3 %v1377_v46  ;;  %v1366_v51 = vld [vmem:[#allocation8 + $0x160] sm:$0xff]  ;;  %v1369_v54 = vld [vmem:[#allocation8 + $0x178] sm:$0xff]  ;;  %v1363_v57 = vld [vmem:[#allocation8 + $0x148] sm:$0xff] }
 0x1e3   :  { %v1398_v60 = vrot.slane %v8671_v56, 4  ;;  %v1412_v61 = vmul.f32 %v8671_v56, %v8671_v56  ;;  %v1424_v62 = vrot.slane %v1423_v59, 1  ;;  %v1397_v1 = vadd.f32 %v1396_v58, %v1395_v53  ;;  %1573 = vmatpush.msra.mxu1 %v1371_v48  ;;  %1593 = vmatpush.msra.mxu2 %v1372_v49  ;;  %v1368_v53 = vld [vmem:[#allocation8 + $0x170] sm:$0xff]  ;;  %v1362_v55 = vld [vmem:[#allocation8 + $0x140] sm:$0xff]  ;;  %v1323_v45 = vld [vmem:[#allocation8 + $0x8] sm:$0xff] }
 0x1e4   :  { %1613 = vmatpush.msra.mxu3 %v1373_v50  ;;  %v1364_v58 = vld [vmem:[#allocation8 + $0x150] sm:$0xff]  ;;  %v1322_v44 = vld [vmem:[#allocation8] sm:$0xff] }
 0x1e5   :  { %v1399_v63 = vadd.f32 %v1398_v60, %v8671_v56  ;;  %v1426_v0 = vrot.slane %v1412_v61, 4  ;;  %v1425_v3 = vadd.f32 %v1424_v62, %v1423_v59  ;;  %1574 = vmatpush.msra.mxu1 %v1367_v52  ;;  %1594 = vmatpush.msra.mxu2 %v1368_v53  ;;  %v1365_v59 = vld [vmem:[#allocation8 + $0x158] sm:$0xff]  ;;  %v1358_v60 = vld [vmem:[#allocation8 + $0x120] sm:$0xff]  ;;  %v1360_v62 = vld [vmem:[#allocation8 + $0x130] sm:$0xff] }
 0x1e6   :  { %v1254_v4 = vpop.f32.mrf.mxu3  ;;  %1614 = vmatpush.msra.mxu3 %v1369_v54  ;;  %v1328_v42 = vld [vmem:[#allocation8 + $0x30] sm:$0xff]  ;;  %v6086_v50 = vld [vmem:[#allocation10 + $0x1c0] sm:$0xf] }
 0x1e7   :  { %v1400_v5 = vrot.slane %v1399_v63, 2  ;;  %v1427_v6 = vadd.f32 %v1426_v0, %v1412_v61  ;;  %v8679_v7 = vadd.f32 %v1254_v4, %v1241_v34  ;;  %v1442_v8 = vsel %vm1440_vm1, %v1397_v1, %v1425_v3  ;;  %v1382_v34 = vld [vmem:[#allocation8 + $0x1e0] sm:$0xff]  ;;  %1575 = vmatpush.msra.mxu1 %v1363_v57  ;;  %1595 = vmatpush.msra.mxu2 %v1364_v58  ;;  %v1359_v61 = vld [vmem:[#allocation8 + $0x128] sm:$0xff]  ;;  %v1356_v3 = vld [vmem:[#allocation8 + $0x110] sm:$0xff] }
 0x1e8   :  { %v1230_v9 = vpop.f32.mrf.mxu1  ;;  %1481 = vmatmul.f32.vlgmr.msrb.gmra.mxu1 %v1442_v8  ;;  %1550 = vmatpush.msra.mxu0 %v1382_v34  ;;  %v1354_v0 = vld [vmem:[#allocation8 + $0x100] sm:$0xff]  ;;  %v1355_v1 = vld [vmem:[#allocation8 + $0x108] sm:$0xff]  ;;  %v1357_v4 = vld [vmem:[#allocation8 + $0x118] sm:$0xff] }
 0x1e9   :  { %v1404_v10 = vrot.slane %v8679_v7, 4  ;;  %v1413_v11 = vmul.f32 %v8679_v7, %v8679_v7  ;;  %v1401_v12 = vadd.f32 %v1400_v5, %v1399_v63  ;;  %v1428_v13 = vrot.slane %v1427_v6, 2  ;;  %1615 = vmatpush.msra.mxu3 %v1365_v59  ;;  %1576 = vmatpush.msra.mxu1 %v1359_v61  ;;  %v1361_v63 = vld [vmem:[#allocation8 + $0x138] sm:$0xff]  ;;  %v1350_v5 = vld [vmem:[#allocation8 + $0xe0] sm:$0xff]  ;;  %v1352_v8 = vld [vmem:[#allocation8 + $0xf0] sm:$0xff] }
 0x1ea   :  { %1551 = vmatpush.msra.mxu0 %v1378_v38  ;;  %1596 = vmatpush.msra.mxu2 %v1360_v62  ;;  %v1353_v9 = vld [vmem:[#allocation8 + $0xf8] sm:$0xff]  ;;  %v1330_v34 = vld [vmem:[#allocation8 + $0x40] sm:$0xff]  ;;  %v1324_v46 = vld [vmem:[#allocation8 + $0x10] sm:$0xff] }
 0x1eb   :  { %v1405_v14 = vadd.f32 %v1404_v10, %v8679_v7  ;;  %v1432_v15 = vrot.slane %v1413_v11, 4  ;;  %v1402_v16 = vrot.slane %v1401_v12, 1  ;;  %v1429_v17 = vadd.f32 %v1428_v13, %v1427_v6  ;;  %1616 = vmatpush.msra.mxu3 %v1361_v63  ;;  %1577 = vmatpush.msra.mxu1 %v1355_v1  ;;  %v1351_v6 = vld [vmem:[#allocation8 + $0xe8] sm:$0xff]  ;;  %v1346_v10 = vld [vmem:[#allocation8 + $0xc0] sm:$0xff] }
 0x1ec   :  { %1552 = vmatpush.msra.mxu0 %v1374_v43  ;;  %1597 = vmatpush.msra.mxu2 %v1356_v3  ;;  %v1326_v38 = vld [vmem:[#allocation8 + $0x20] sm:$0xff]  ;;  %v1329_v43 = vld [vmem:[#allocation8 + $0x38] sm:$0xff] }
 0x1ed   :  { %v1406_v18 = vrot.slane %v1405_v14, 2  ;;  %v1433_v2 = vadd.f32 %v1432_v15, %v1413_v11  ;;  %v1430_v19 = vrot.slane %v1429_v17, 1  ;;  %v1403_v22 = vadd.f32 %v1402_v16, %v1401_v12  ;;  %1617 = vmatpush.msra.mxu3 %v1357_v4  ;;  %1578 = vmatpush.msra.mxu1 %v1351_v6  ;;  %v1347_v11 = vld [vmem:[#allocation8 + $0xc8] sm:$0xff]  ;;  %v1348_v12 = vld [vmem:[#allocation8 + $0xd0] sm:$0xff]  ;;  %v1342_v15 = vld [vmem:[#allocation8 + $0xa0] sm:$0xff] }
 0x1ee   :  { %v1256_v21 = vpop.f32.mrf.mxu3  ;;  %1553 = vmatpush.msra.mxu0 %v1370_v47  ;;  %1598 = vmatpush.msra.mxu2 %v1352_v8  ;;  %v1343_v16 = vld [vmem:[#allocation8 + $0xa8] sm:$0xff]  ;;  %v1325_v47 = vld [vmem:[#allocation8 + $0x18] sm:$0xff]  ;;  %v6342_v53 = vld [vmem:[#allocation10 + $0x3c0] sm:$0xf] }
 0x1ef   :  { %v1431_v23 = vadd.f32 %v1430_v19, %v1429_v17  ;;  %v1407_v24 = vadd.f32 %v1406_v18, %v1405_v14  ;;  %v1434_v25 = vrot.slane %v1433_v2, 2  ;;  %1618 = vmatpush.msra.mxu3 %v1353_v9  ;;  %1579 = vmatpush.msra.mxu1 %v1347_v11  ;;  %v1349_v14 = vld [vmem:[#allocation8 + $0xd8] sm:$0xff]  ;;  %v1344_v17 = vld [vmem:[#allocation8 + $0xb0] sm:$0xff]  ;;  %v7664_v54 = vld [vmem:[#allocation10 + $0x3dc] sm:$0xf0] }
 0x1f0   :  { %1554 = vmatpush.msra.mxu0 %v1366_v51  ;;  %1599 = vmatpush.msra.mxu2 %v1348_v12  ;;  %v1345_v19 = vld [vmem:[#allocation8 + $0xb8] sm:$0xff]  ;;  %v7600_v51 = vld [vmem:[#allocation10 + $0x1dc] sm:$0xf0]  ;;  %v6343_v58 = vor.u32 %v7664_v54, %v6342_v53 }
 0x1f1   :  { %v1443_v26 = vsel %vm1440_vm1, %v1403_v22, %v1431_v23  ;;  %v1408_v27 = vrot.slane %v1407_v24, 1  ;;  %v1435_v28 = vadd.f32 %v1434_v25, %v1433_v2  ;;  %1619 = vmatpush.msra.mxu3 %v1349_v14  ;;  %1580 = vmatpush.msra.mxu1 %v1343_v16  ;;  %v1338_v22 = vld [vmem:[#allocation8 + $0x80] sm:$0xff]  ;;  %v1339_v23 = vld [vmem:[#allocation8 + $0x88] sm:$0xff]  ;;  %v1341_v25 = vld [vmem:[#allocation8 + $0x98] sm:$0xff]  ;;  %v6087_v52 = vor.u32 %v7600_v51, %v6086_v50 }
 0x1f2   :  { %1501 = vmatmul.f32.vlgmr.msrb.gmra.mxu2 %v1443_v26  ;;  %1555 = vmatpush.msra.mxu0 %v1362_v55  ;;  %v6054_v55 = vld [vmem:[#allocation10 + $0x180] sm:$0xf] }
 0x1f3   :  { %v1436_v29 = vrot.slane %v1435_v28, 1  ;;  %v1409_v30 = vadd.f32 %v1408_v27, %v1407_v24  ;;  %1600 = vmatpush.msra.mxu2 %v1344_v17  ;;  %1620 = vmatpush.msra.mxu3 %v1345_v19  ;;  %v1340_v24 = vld [vmem:[#allocation8 + $0x90] sm:$0xff]  ;;  %v1334_v27 = vld [vmem:[#allocation8 + $0x60] sm:$0xff] }
 0x1f4   :  { %1556 = vmatpush.msra.mxu0 %v1358_v60  ;;  %1581 = vmatpush.msra.mxu1 %v1339_v23  ;;  %v7592_v59 = vld [vmem:[#allocation10 + $0x19c] sm:$0xf0] }
 0x1f5   :  { %v1437_v31 = vadd.f32 %v1436_v29, %v1435_v28  ;;  %1601 = vmatpush.msra.mxu2 %v1340_v24  ;;  %1621 = vmatpush.msra.mxu3 %v1341_v25  ;;  %v1335_v28 = vld [vmem:[#allocation8 + $0x68] sm:$0xff]  ;;  %v1336_v29 = vld [vmem:[#allocation8 + $0x70] sm:$0xff]  ;;  %v6310_v60 = vld [vmem:[#allocation10 + $0x380] sm:$0xf]  ;;  %v6055_v62 = vor.u32 %v7592_v59, %v6054_v55 }
 0x1f6   :  { %1557 = vmatpush.msra.mxu0 %v1354_v0  ;;  %1582 = vmatpush.msra.mxu1 %v1335_v28  ;;  %v7656_v61 = vld [vmem:[#allocation10 + $0x39c] sm:$0xf0] }
 0x1f7   :  { %v1444_v32 = vsel %vm1440_vm1, %v1409_v30, %v1437_v31  ;;  %v1337_v31 = vld [vmem:[#allocation8 + $0x78] sm:$0xff]  ;;  %1602 = vmatpush.msra.mxu2 %v1336_v29  ;;  %v6598_v63 = vld [vmem:[#allocation10 + $0x5c0] sm:$0xf]  ;;  %v6311_v4 = vor.u32 %v7656_v61, %v6310_v60 }
 0x1f8   :  { %1521 = vmatmul.f32.vlgmr.msrb.gmra.mxu3 %v1444_v32  ;;  %1558 = vmatpush.msra.mxu0 %v1350_v5  ;;  %v7728_v0 = vld [vmem:[#allocation10 + $0x5dc] sm:$0xf0] }
 0x1f9   :  { %1622 = vmatpush.msra.mxu3 %v1337_v31  ;;  %1583 = vmatpush.msra.mxu1 %v1331_v35  ;;  %v6854_v1 = vld [vmem:[#allocation10 + $0x7c0] sm:$0xf]  ;;  %v6599_v5 = vor.u32 %v7728_v0, %v6598_v63 }
 0x1fa   :  { %1559 = vmatpush.msra.mxu0 %v1346_v10  ;;  %1603 = vmatpush.msra.mxu2 %v1332_v36  ;;  %v7792_v6 = vld [vmem:[#allocation10 + $0x7dc] sm:$0xf0] }
 0x1fb   :  { %1623 = vmatpush.msra.mxu3 %v1333_v37  ;;  %1584 = vmatpush.msra.mxu1 %v1327_v39  ;;  %v6022_v8 = vld [vmem:[#allocation10 + $0x140] sm:$0xf]  ;;  %v6855_v9 = vor.u32 %v7792_v6, %v6854_v1 }
 0x1fc   :  { %1560 = vmatpush.msra.mxu0 %v1342_v15  ;;  %1604 = vmatpush.msra.mxu2 %v1328_v42  ;;  %v7584_v10 = vld [vmem:[#allocation10 + $0x15c] sm:$0xf0] }
 0x1fd   :  { %1624 = vmatpush.msra.mxu3 %v1329_v43  ;;  %1585 = vmatpush.msra.mxu1 %v1323_v45  ;;  %v6278_v11 = vld [vmem:[#allocation10 + $0x340] sm:$0xf]  ;;  %v6023_v16 = vor.u32 %v7584_v10, %v6022_v8 }
 0x1fe   :  { %1561 = vmatpush.msra.mxu0 %v1338_v22  ;;  %1605 = vmatpush.msra.mxu2 %v1324_v46  ;;  %v7648_v12 = vld [vmem:[#allocation10 + $0x35c] sm:$0xf0] }
 0x1ff   :  { %1625 = vmatpush.msra.mxu3 %v1325_v47  ;;  %3203 = vmatpush.bf16.msrb.mxu1 %v6343_v58  ;;  %v7720_v14 = vld [vmem:[#allocation10 + $0x59c] sm:$0xf0] }
 0x200   :  { %1562 = vmatpush.msra.mxu0 %v1334_v27  ;;  %3216 = vmatpush.bf16.msrb.mxu2 %v6599_v5  ;;  %v6822_v15 = vld [vmem:[#allocation10 + $0x780] sm:$0xf] }
 0x201   :  { %3229 = vmatpush.bf16.msrb.mxu3 %v6855_v9  ;;  %v7576_v19 = vld [vmem:[#allocation10 + $0x11c] sm:$0xf0] }
 0x202   :  { %1563 = vmatpush.msra.mxu0 %v1330_v34  ;;  %v6246_v23 = vld [vmem:[#allocation10 + $0x300] sm:$0xf] }
 0x203   :  { %3204 = vmatpush.bf16.msrb.mxu1 %v6311_v4  ;;  %v7640_v24 = vld [vmem:[#allocation10 + $0x31c] sm:$0xf0] }
 0x204   :  { %1564 = vmatpush.msra.mxu0 %v1326_v38  ;;  %v6534_v25 = vld [vmem:[#allocation10 + $0x540] sm:$0xf]  ;;  %v6247_v37 = vor.u32 %v7640_v24, %v6246_v23 }
 0x205   :  { %v6790_v27 = vld [vmem:[#allocation10 + $0x740] sm:$0xf] }
 0x206   :  { %1565 = vmatpush.msra.mxu0 %v1322_v44  ;;  %v7776_v28 = vld [vmem:[#allocation10 + $0x75c] sm:$0xf0] }
 0x207   :  { %v6791_v31 = vor.u32 %v7776_v28, %v6790_v27  ;;  %v6502_v34 = vld [vmem:[#allocation10 + $0x500] sm:$0xf]  ;;  %v7596_v27 = vld [vmem:[#allocation10 + $0x1c4] sm:$0xf] }
 0x208   :  { %3190 = vmatpush.bf16.msrb.mxu0 %v6087_v52  ;;  %v7704_v35 = vld [vmem:[#allocation10 + $0x51c] sm:$0xf0]  ;;  %v6088_v28 = vld [vmem:[#allocation10 + $0x1e0] sm:$0xf0] }
 0x209   :  { %v7568_v38 = vld [vmem:[#allocation10 + $0xdc] sm:$0xf0]  ;;  %v6503_v46 = vor.u32 %v7704_v35, %v6502_v34 }
 0x20a   :  { %v6758_v39 = vld [vmem:[#allocation10 + $0x700] sm:$0xf] }
 0x20b   :  { %v7768_v42 = vld [vmem:[#allocation10 + $0x71c] sm:$0xf0] }
 0x20c   :  { %3191 = vmatpush.bf16.msrb.mxu0 %v6055_v62  ;;  %v6214_v44 = vld [vmem:[#allocation10 + $0x2c0] sm:$0xf] }
 0x20d   :  { %v7632_v45 = vld [vmem:[#allocation10 + $0x2dc] sm:$0xf0] }
 0x20e   :  { %v5926_v50 = vld [vmem:[#allocation10 + $0x80] sm:$0xf]  ;;  %v6215_v53 = vor.u32 %v7632_v45, %v6214_v44  ;;  %v6091_v45 = vor.u32 %v7596_v27, %v6088_v28  ;;  %v6216_v27 = vld [vmem:[#allocation10 + $0x2e0] sm:$0xf0] }
 0x20f   :  { %v6470_v51 = vld [vmem:[#allocation10 + $0x4c0] sm:$0xf] }
 0x210   :  { %3192 = vmatpush.bf16.msrb.mxu0 %v6023_v16  ;;  %v7696_v52 = vld [vmem:[#allocation10 + $0x4dc] sm:$0xf0] }
 0x211   :  { %v7560_v54 = vld [vmem:[#allocation10 + $0x9c] sm:$0xf0]  ;;  %v6471_v61 = vor.u32 %v7696_v52, %v6470_v51  ;;  %v6312_v51 = vld [vmem:[#allocation10 + $0x3a0] sm:$0xf0] }
 0x212   :  { %v6726_v55 = vld [vmem:[#allocation10 + $0x6c0] sm:$0xf]  ;;  %v5927_v0 = vor.u32 %v7560_v54, %v5926_v50  ;;  %v7652_v50 = vld [vmem:[#allocation10 + $0x384] sm:$0xf] }
 0x213   :  { %v6182_v59 = vld [vmem:[#allocation10 + $0x280] sm:$0xf] }
 0x214   :  { %v7624_v60 = vld [vmem:[#allocation10 + $0x29c] sm:$0xf0] }
 0x215   :  { %v5894_v62 = vld [vmem:[#allocation10 + $0x40] sm:$0xf]  ;;  %v6183_v6 = vor.u32 %v7624_v60, %v6182_v59  ;;  %v7716_v59 = vld [vmem:[#allocation10 + $0x584] sm:$0xf] }
 0x216   :  { %v6438_v4 = vld [vmem:[#allocation10 + $0x480] sm:$0xf]  ;;  %v6568_v60 = vld [vmem:[#allocation10 + $0x5a0] sm:$0xf0] }
 0x217   :  { %v7688_v5 = vld [vmem:[#allocation10 + $0x49c] sm:$0xf0] }
 0x218   :  { %v7552_v8 = vld [vmem:[#allocation10 + $0x5c] sm:$0xf0] }
 0x219   :  { %v6694_v9 = vld [vmem:[#allocation10 + $0x680] sm:$0xf]  ;;  %v5895_v16 = vor.u32 %v7552_v8, %v5894_v62  ;;  %v6315_v62 = vor.u32 %v7652_v50, %v6312_v51  ;;  %v6571_v8 = vor.u32 %v7716_v59, %v6568_v60  ;;  %v7548_v51 = vld [vmem:[#allocation10 + $0x44] sm:$0xf] }
 0x21a   :  { %v7752_v10 = vld [vmem:[#allocation10 + $0x69c] sm:$0xf0]  ;;  %v6440_v59 = vld [vmem:[#allocation10 + $0x4a0] sm:$0xf0] }
 0x21b   :  { %v5862_v23 = vld [vmem:[#allocation10] sm:$0xf]  ;;  %v7748_v60 = vld [vmem:[#allocation10 + $0x684] sm:$0xf] }
 0x21c   :  { %v6118_v24 = vld [vmem:[#allocation10 + $0x200] sm:$0xf] }
 0x21d   :  { %v7744_v34 = vld [vmem:[#allocation10 + $0x65c] sm:$0xf0] }
 0x21e   :  { %v7736_v54 = vld [vmem:[#allocation10 + $0x61c] sm:$0xf0] }
 0x25f   :  { %v1462_v18 = vpop.f32.mrf.mxu0 }
 0x265   :  { %v1482_v13 = vpop.f32.mrf.mxu1 }
 0x266   :  { %v1483_v21 = vadd.f32 %v1482_v13, %v1462_v18  ;;  %v6566_v13 = vld [vmem:[#allocation10 + $0x580] sm:$0xf] }
 0x267   :  { %v6567_v17 = vor.u32 %v7720_v14, %v6566_v13  ;;  %v7784_v18 = vld [vmem:[#allocation10 + $0x79c] sm:$0xf0]  ;;  %v6439_v14 = vor.u32 %v7688_v5, %v6438_v4  ;;  %v7644_v4 = vld [vmem:[#allocation10 + $0x344] sm:$0xf] }
 0x268   :  { %v6823_v22 = vor.u32 %v7784_v18, %v6822_v15  ;;  %v7616_v13 = vld [vmem:[#allocation10 + $0x25c] sm:$0xf0]  ;;  %v6280_v5 = vld [vmem:[#allocation10 + $0x360] sm:$0xf0] }
 0x269   :  { %3217 = vmatpush.bf16.msrb.mxu2 %v6567_v17  ;;  %v6695_v17 = vor.u32 %v7752_v10, %v6694_v9  ;;  %v6406_v18 = vld [vmem:[#allocation10 + $0x440] sm:$0xf]  ;;  %v7780_v9 = vld [vmem:[#allocation10 + $0x784] sm:$0xf] }
 0x26a   :  { %3230 = vmatpush.bf16.msrb.mxu3 %v6823_v22  ;;  %v6824_v10 = vld [vmem:[#allocation10 + $0x7a0] sm:$0xf0] }
 0x26e   :  { %3231 = vmatpush.bf16.msrb.mxu3 %v6791_v31  ;;  %v6344_v31 = vld [vmem:[#allocation10 + $0x3e0] sm:$0xf0] }
 0x275   :  { %v1502_v2 = vpop.f32.mrf.mxu2 }
 0x276   :  { %v1503_v26 = vadd.f32 %v1502_v2, %v1483_v21  ;;  %v5990_v2 = vld [vmem:[#allocation10 + $0x100] sm:$0xf]  ;;  %v6279_v21 = vor.u32 %v7648_v12, %v6278_v11 }
 0x277   :  { %v6150_v12 = vld [vmem:[#allocation10 + $0x240] sm:$0xf] }
 0x278   :  { %3205 = vmatpush.bf16.msrb.mxu1 %v6279_v21  ;;  %v6151_v22 = vor.u32 %v7616_v13, %v6150_v12  ;;  %v6536_v12 = vld [vmem:[#allocation10 + $0x560] sm:$0xf0] }
 0x27b   :  { %v1522_v30 = vpop.f32.mrf.mxu3 }
 0x27c   :  { %v1523_v32 = vadd.f32 %v1522_v30, %v1503_v26  ;;  %v7712_v26 = vld [vmem:[#allocation10 + $0x55c] sm:$0xf0]  ;;  %v5991_v30 = vor.u32 %v7576_v19, %v5990_v2  ;;  %3206 = vmatpush.bf16.msrb.mxu1 %v6247_v37 }
 0x27d   :  { %v6535_v29 = vor.u32 %v7712_v26, %v6534_v25  ;;  %v7680_v2 = vld [vmem:[#allocation10 + $0x45c] sm:$0xf0] }
 0x27e   :  { %v8691_v40 = vmul.f32 0.03125, %v1523_v32  ;;  %v5958_v32 = vld [vmem:[#allocation10 + $0xc0] sm:$0xf]  ;;  %3193 = vmatpush.bf16.msrb.mxu0 %v5991_v30  ;;  %v6407_v30 = vor.u32 %v7680_v2, %v6406_v18  ;;  %v6248_v18 = vld [vmem:[#allocation10 + $0x320] sm:$0xf0]  ;;  %v6827_v2 = vor.u32 %v7780_v9, %v6824_v10 }
 0x27f   :  { %3218 = vmatpush.bf16.msrb.mxu2 %v6535_v29  ;;  %v7608_v25 = vld [vmem:[#allocation10 + $0x21c] sm:$0xf0]  ;;  %v7660_v29 = vld [vmem:[#allocation10 + $0x3c4] sm:$0xf] }
 0x280   :  { %v1526_v48 = vmul.f32 %v8691_v40, %v8691_v40  ;;  %3207 = vmatpush.bf16.msrb.mxu1 %v6215_v53  ;;  %v1542_v19 = vsub.f32 0.0, %v8691_v40  ;;  %v7672_v37 = vld [vmem:[#allocation10 + $0x41c] sm:$0xf0]  ;;  %v7676_v9 = vld [vmem:[#allocation10 + $0x444] sm:$0xf] }
 0x281   :  { %v6630_v53 = vld [vmem:[#allocation10 + $0x600] sm:$0xf]  ;;  %v6408_v10 = vld [vmem:[#allocation10 + $0x460] sm:$0xf0] }
 0x282   :  { %v1528_v49 = vrot.slane %v1526_v48, 7  ;;  %v5959_v48 = vor.u32 %v7568_v38, %v5958_v32  ;;  %v6662_v32 = vld [vmem:[#allocation10 + $0x640] sm:$0xf] }
 0x283   :  { %3219 = vmatpush.bf16.msrb.mxu2 %v6503_v46  ;;  %v6347_v46 = vor.u32 %v7660_v29, %v6344_v31  ;;  %v7700_v31 = vld [vmem:[#allocation10 + $0x504] sm:$0xf] }
 0x284   :  { %v1530_v57 = vsub.f32 %v8691_v40, %v1528_v49  ;;  %v6759_v49 = vor.u32 %v7768_v42, %v6758_v39  ;;  %3194 = vmatpush.bf16.msrb.mxu0 %v5959_v48  ;;  %3208 = vmatpush.bf16.msrb.mxu1 %v6183_v6  ;;  %v6119_v39 = vor.u32 %v7608_v25, %v6118_v24  ;;  %v7724_v42 = vld [vmem:[#allocation10 + $0x5c4] sm:$0xf] }
 0x285   :  { %v6663_v48 = vor.u32 %v7744_v34, %v6662_v32  ;;  %v7564_v24 = vld [vmem:[#allocation10 + $0xc4] sm:$0xf] }
 0x286   :  { %v8696_v3 = vadd.f32 1e-05, %v1530_v57  ;;  %v7760_v57 = vld [vmem:[#allocation10 + $0x6dc] sm:$0xf0]  ;;  %3232 = vmatpush.bf16.msrb.mxu3 %v6759_v49  ;;  %v6056_v49 = vld [vmem:[#allocation10 + $0x1a0] sm:$0xf0] }
 0x287   :  { %v6727_v1 = vor.u32 %v7760_v57, %v6726_v55  ;;  %3220 = vmatpush.bf16.msrb.mxu2 %v6471_v61  ;;  %v7788_v57 = vld [vmem:[#allocation10 + $0x7c4] sm:$0xf] }
 0x288   :  { %7940 = vrsqrt.f32 %v8696_v3  ;;  %vm1538_vm3 = vweird.f32 %v8696_v3  ;;  %3195 = vmatpush.bf16.msrb.mxu0 %v5927_v0  ;;  %3209 = vmatpush.bf16.msrb.mxu1 %v6151_v22  ;;  %v6631_v0 = vor.u32 %v7736_v54, %v6630_v53  ;;  %v6792_v22 = vld [vmem:[#allocation10 + $0x760] sm:$0xf0] }
 0x289   :  { %v5960_v25 = vld [vmem:[#allocation10 + $0xe0] sm:$0xf0] }
 0x28a   :  { %3233 = vmatpush.bf16.msrb.mxu3 %v6727_v1  ;;  %v6024_v1 = vld [vmem:[#allocation10 + $0x160] sm:$0xf0]  ;;  %v5963_v29 = vor.u32 %v7564_v24, %v5960_v25 }
 0x28b   :  { %3221 = vmatpush.bf16.msrb.mxu2 %v6439_v14  ;;  %v6283_v14 = vor.u32 %v7644_v4, %v6280_v5  ;;  %v6504_v32 = vld [vmem:[#allocation10 + $0x520] sm:$0xf0] }
 0x28c   :  { %3196 = vmatpush.bf16.msrb.mxu0 %v5895_v16  ;;  %3210 = vmatpush.bf16.msrb.mxu1 %v6119_v39  ;;  %v5992_v16 = vld [vmem:[#allocation10 + $0x120] sm:$0xf0] }
 0x28d   :  { %v7764_v34 = vld [vmem:[#allocation10 + $0x704] sm:$0xf] }
 0x28e   :  { %v7941_v36 = vpop.eup %7940  ;;  %3234 = vmatpush.bf16.msrb.mxu3 %v6695_v17  ;;  %v7636_v17 = vld [vmem:[#allocation10 + $0x304] sm:$0xf] }
 0x28f   :  { %v1533_v43 = vmul.f32 %v7941_v36, %v8696_v3  ;;  %vm1539_vm2 = vweird.f32 %v7941_v36  ;;  %v7544_v3 = vld [vmem:[#allocation10 + $0x1c] sm:$0xf0]  ;;  %3222 = vmatpush.bf16.msrb.mxu2 %v6407_v30  ;;  %v7620_v39 = vld [vmem:[#allocation10 + $0x284] sm:$0xf] }
 0x290   :  { %vm1540_vm4 = vmor %vm1538_vm3, %vm1539_vm2  ;;  %v5863_v38 = vor.u32 %v7544_v3, %v5862_v23  ;;  %v6251_v3 = vor.u32 %v7636_v17, %v6248_v18  ;;  %v7612_v53 = vld [vmem:[#allocation10 + $0x244] sm:$0xf] }
 0x291   :  { %v1534_v47 = vmul.f32 %v7941_v36, %v1533_v43  ;;  %v6600_v43 = vld [vmem:[#allocation10 + $0x5e0] sm:$0xf0] }
 0x292   :  { %v6603_v55 = vor.u32 %v7724_v42, %v6600_v43  ;;  %3197 = vmatpush.bf16.msrb.mxu0 %v5863_v38  ;;  %3235 = vmatpush.bf16.msrb.mxu3 %v6663_v48  ;;  %v5928_v38 = vld [vmem:[#allocation10 + $0xa0] sm:$0xf0] }
 0x293   :  { %v1535_v58 = vmul.f32 0.5, %v1534_v47  ;;  %v7588_v47 = vld [vmem:[#allocation10 + $0x184] sm:$0xf] }
 0x294   :  { %v6059_v61 = vor.u32 %v7588_v47, %v6056_v49  ;;  %v6184_v43 = vld [vmem:[#allocation10 + $0x2a0] sm:$0xf0] }
 0x295   :  { %v1536_v63 = vsub.f32 1.5, %v1535_v58  ;;  %v6856_v58 = vld [vmem:[#allocation10 + $0x7e0] sm:$0xf0] }
 0x296   :  { %v6859_v6 = vor.u32 %v7788_v57, %v6856_v58  ;;  %3236 = vmatpush.bf16.msrb.mxu3 %v6631_v0  ;;  %v7756_v47 = vld [vmem:[#allocation10 + $0x6c4] sm:$0xf] }
 0x297   :  { %v1537_v11 = vmul.f32 %v7941_v36, %v1536_v63  ;;  %v7580_v63 = vld [vmem:[#allocation10 + $0x144] sm:$0xf] }
 0x298   :  { %v6027_v13 = vor.u32 %v7580_v63, %v6024_v1  ;;  %v6728_v49 = vld [vmem:[#allocation10 + $0x6e0] sm:$0xf0] }
 0x299   :  { %v1541_v15 = vsel %vm1540_vm4, %v7941_v36, %v1537_v11  ;;  %v6374_v36 = vld [vmem:[#allocation10 + $0x400] sm:$0xf]  ;;  %v7708_v11 = vld [vmem:[#allocation10 + $0x544] sm:$0xf]  ;;  %v6731_v50 = vor.u32 %v7756_v47, %v6728_v49  ;;  %v7657_v47 = vld [vmem:[#allocation10 + $0x3a4] sm:$0xf0] }
 0x29a   :  { %v1544_v21 = vrot.slane %v1541_v15, 1  ;;  %v1547_v35 = vperm.slane %v1541_v15, 1  ;;  %v6375_v52 = vor.u32 %v7672_v37, %v6374_v36  ;;  %v7572_v15 = vld [vmem:[#allocation10 + $0x104] sm:$0xf] }
 0x29b   :  { %v5995_v23 = vor.u32 %v7572_v15, %v5992_v16  ;;  %v7556_v37 = vld [vmem:[#allocation10 + $0x84] sm:$0xf] }
 0x29c   :  { %v1546_v26 = vmul.f32 %v1544_v21, %v1542_v19  ;;  %3223 = vmatpush.bf16.msrb.mxu2 %v6375_v52  ;;  %v6539_v19 = vor.u32 %v7708_v11, %v6536_v12  ;;  %v7772_v21 = vld [vmem:[#allocation10 + $0x744] sm:$0xf]  ;;  %v5931_v42 = vor.u32 %v7556_v37, %v5928_v38 }
 0x29d   :  { %v6795_v28 = vor.u32 %v7772_v21, %v6792_v22  ;;  %v5896_v52 = vld [vmem:[#allocation10 + $0x60] sm:$0xf0] }
 0x29e   :  { %v1548_v40 = vperm.slane %v1546_v26, 0  ;;  %v7628_v26 = vld [vmem:[#allocation10 + $0x2c4] sm:$0xf]  ;;  %v5899_v54 = vor.u32 %v7548_v51, %v5896_v52 }
 0x29f   :  { %v6219_v30 = vor.u32 %v7628_v26, %v6216_v27  ;;  %v7684_v58 = vld [vmem:[#allocation10 + $0x484] sm:$0xf] }
 0x2a0   :  { %v1549_v44 = vsel %vm1440_vm1, %v1547_v35, %v1548_v40  ;;  %v6507_v35 = vor.u32 %v7700_v31, %v6504_v32  ;;  %v6760_v40 = vld [vmem:[#allocation10 + $0x720] sm:$0xf0]  ;;  %v7601_v31 = vld [vmem:[#allocation10 + $0x1e4] sm:$0xf0] }
 0x2a1   :  { %1566 = vmatmul.f32.vlgmr.msra.gmra.mxu0 %v1549_v44  ;;  %1586 = vmatmul.f32.vlgmr.msra.gmra.mxu1 %v1549_v44  ;;  %v6763_v36 = vor.u32 %v7764_v34, %v6760_v40  ;;  %v7540_v0 = vld [vmem:[#allocation10 + $0x4] sm:$0xf]  ;;  %v6350_v32 = vld [vmem:[#allocation10 + $0x3c8] sm:$0xf] }
 0x2a2   :  { %1606 = vmatmul.f32.vlgmr.msra.gmra.mxu2 %v1549_v44  ;;  %1626 = vmatmul.f32.vlgmr.msra.gmra.mxu3 %v1549_v44  ;;  %v6187_v44 = vor.u32 %v7620_v39, %v6184_v43  ;;  %v5864_v1 = vld [vmem:[#allocation10 + $0x20] sm:$0xf0]  ;;  %v7665_v34 = vld [vmem:[#allocation10 + $0x3e4] sm:$0xf0] }
 0x2a3   :  { %3242 = vmatpush.bf16.msra.mxu0 %v6091_v45  ;;  %3255 = vmatpush.bf16.msra.mxu1 %v6347_v46  ;;  %v7692_v45 = vld [vmem:[#allocation10 + $0x4c4] sm:$0xf]  ;;  %v5867_v5 = vor.u32 %v7540_v0, %v5864_v1  ;;  %v6351_v43 = vor.u32 %v7665_v34, %v6350_v32  ;;  %v7705_v32 = vld [vmem:[#allocation10 + $0x524] sm:$0xf0] }
 0x2a4   :  { %3268 = vmatpush.bf16.msra.mxu2 %v6603_v55  ;;  %3281 = vmatpush.bf16.msra.mxu3 %v6859_v6  ;;  %v6472_v46 = vld [vmem:[#allocation10 + $0x4e0] sm:$0xf0]  ;;  %v6766_v34 = vld [vmem:[#allocation10 + $0x708] sm:$0xf] }
 0x2a5   :  { %v6475_v48 = vor.u32 %v7692_v45, %v6472_v46  ;;  %v6152_v55 = vld [vmem:[#allocation10 + $0x260] sm:$0xf0]  ;;  %v6318_v46 = vld [vmem:[#allocation10 + $0x388] sm:$0xf] }
 0x2a6   :  { %v6155_v57 = vor.u32 %v7612_v53, %v6152_v55  ;;  %v7604_v4 = vld [vmem:[#allocation10 + $0x204] sm:$0xf]  ;;  %v6606_v53 = vld [vmem:[#allocation10 + $0x5c8] sm:$0xf] }
 0x2a7   :  { %3243 = vmatpush.bf16.msra.mxu0 %v6059_v61  ;;  %3256 = vmatpush.bf16.msra.mxu1 %v6315_v62  ;;  %v6443_v61 = vor.u32 %v7684_v58, %v6440_v59  ;;  %v6696_v62 = vld [vmem:[#allocation10 + $0x6a0] sm:$0xf0]  ;;  %v6862_v55 = vld [vmem:[#allocation10 + $0x7c8] sm:$0xf]  ;;  %v6319_v59 = vor.u32 %v7657_v47, %v6318_v46 }
 0x2a8   :  { %3269 = vmatpush.bf16.msra.mxu2 %v6571_v8  ;;  %3282 = vmatpush.bf16.msra.mxu3 %v6827_v2  ;;  %v6699_v63 = vor.u32 %v7748_v60, %v6696_v62  ;;  %v6120_v6 = vld [vmem:[#allocation10 + $0x220] sm:$0xf0]  ;;  %v7793_v60 = vld [vmem:[#allocation10 + $0x7e4] sm:$0xf0] }
 0x2a9   :  { %v6123_v8 = vor.u32 %v7604_v4, %v6120_v6  ;;  %v7740_v11 = vld [vmem:[#allocation10 + $0x644] sm:$0xf]  ;;  %v6286_v62 = vld [vmem:[#allocation10 + $0x348] sm:$0xf]  ;;  %v6863_v4 = vor.u32 %v7793_v60, %v6862_v55 }
 0x2aa   :  { %v6664_v12 = vld [vmem:[#allocation10 + $0x660] sm:$0xf0]  ;;  %v6574_v6 = vld [vmem:[#allocation10 + $0x588] sm:$0xf] }
 0x2ab   :  { %3244 = vmatpush.bf16.msra.mxu0 %v6027_v13  ;;  %3257 = vmatpush.bf16.msra.mxu1 %v6283_v14  ;;  %v6411_v13 = vor.u32 %v7676_v9, %v6408_v10  ;;  %v6667_v14 = vor.u32 %v7740_v11, %v6664_v12  ;;  %v7668_v15 = vld [vmem:[#allocation10 + $0x404] sm:$0xf]  ;;  %v6830_v12 = vld [vmem:[#allocation10 + $0x788] sm:$0xf] }
 0x2ac   :  { %3270 = vmatpush.bf16.msra.mxu2 %v6539_v19  ;;  %3283 = vmatpush.bf16.msra.mxu3 %v6795_v28  ;;  %v6376_v16 = vld [vmem:[#allocation10 + $0x420] sm:$0xf0]  ;;  %v6094_v28 = vld [vmem:[#allocation10 + $0x1c8] sm:$0xf] }
 0x2ad   :  { %v6379_v17 = vor.u32 %v7668_v15, %v6376_v16  ;;  %v7732_v18 = vld [vmem:[#allocation10 + $0x604] sm:$0xf]  ;;  %v7577_v15 = vld [vmem:[#allocation10 + $0x124] sm:$0xf0] }
 0x2ae   :  { %v6632_v2 = vld [vmem:[#allocation10 + $0x620] sm:$0xf0]  ;;  %v6254_v16 = vld [vmem:[#allocation10 + $0x308] sm:$0xf] }
 0x2af   :  { %3245 = vmatpush.bf16.msra.mxu0 %v5995_v23  ;;  %3258 = vmatpush.bf16.msra.mxu1 %v6251_v3  ;;  %v6635_v19 = vor.u32 %v7732_v18, %v6632_v2  ;;  %v7697_v46 = vld [vmem:[#allocation10 + $0x4e4] sm:$0xf0] }
 0x2b0   :  { %3271 = vmatpush.bf16.msra.mxu2 %v6507_v35  ;;  %3284 = vmatpush.bf16.msra.mxu3 %v6763_v36  ;;  %v6734_v47 = vld [vmem:[#allocation10 + $0x6c8] sm:$0xf] }
 0x2b1   :  { %v6702_v60 = vld [vmem:[#allocation10 + $0x688] sm:$0xf] }
 0x2b3   :  { %3246 = vmatpush.bf16.msra.mxu0 %v5963_v29  ;;  %3259 = vmatpush.bf16.msra.mxu1 %v6219_v30 }
 0x2b4   :  { %3272 = vmatpush.bf16.msra.mxu2 %v6475_v48  ;;  %3285 = vmatpush.bf16.msra.mxu3 %v6731_v50 }
 0x2b7   :  { %3247 = vmatpush.bf16.msra.mxu0 %v5931_v42  ;;  %3260 = vmatpush.bf16.msra.mxu1 %v6187_v44  ;;  %v6095_v42 = vor.u32 %v7601_v31, %v6094_v28  ;;  %v6062_v44 = vld [vmem:[#allocation10 + $0x188] sm:$0xf] }
 0x2b8   :  { %3273 = vmatpush.bf16.msra.mxu2 %v6443_v61  ;;  %3286 = vmatpush.bf16.msra.mxu3 %v6699_v63  ;;  %v6030_v61 = vld [vmem:[#allocation10 + $0x148] sm:$0xf] }
 0x2b9   :  { %v7649_v63 = vld [vmem:[#allocation10 + $0x364] sm:$0xf0] }
 0x2ba   :  { %v6287_v11 = vor.u32 %v7649_v63, %v6286_v62  ;;  %v7633_v28 = vld [vmem:[#allocation10 + $0x2e4] sm:$0xf0] }
 0x2bb   :  { %3248 = vmatpush.bf16.msra.mxu0 %v5899_v54  ;;  %3261 = vmatpush.bf16.msra.mxu1 %v6155_v57  ;;  %v7729_v54 = vld [vmem:[#allocation10 + $0x5e4] sm:$0xf0] }
 0x2bc   :  { %3274 = vmatpush.bf16.msra.mxu2 %v6411_v13  ;;  %3287 = vmatpush.bf16.msra.mxu3 %v6667_v14  ;;  %v6607_v1 = vor.u32 %v7729_v54, %v6606_v53  ;;  %v7785_v13 = vld [vmem:[#allocation10 + $0x7a4] sm:$0xf0] }
 0x2bd   :  { %v5998_v14 = vld [vmem:[#allocation10 + $0x108] sm:$0xf]  ;;  %v6831_v2 = vor.u32 %v7785_v13, %v6830_v12  ;;  %v6352_v12 = vld [vmem:[#allocation10 + $0x3e8] sm:$0xf0] }
 0x2be   :  { %v6510_v31 = vld [vmem:[#allocation10 + $0x508] sm:$0xf] }
 0x2bf   :  { %3249 = vmatpush.bf16.msra.mxu0 %v5867_v5  ;;  %3262 = vmatpush.bf16.msra.mxu1 %v6123_v8  ;;  %v7721_v8 = vld [vmem:[#allocation10 + $0x5a4] sm:$0xf0] }
 0x2c0   :  { %3275 = vmatpush.bf16.msra.mxu2 %v6379_v17  ;;  %3288 = vmatpush.bf16.msra.mxu3 %v6635_v19  ;;  %v7641_v17 = vld [vmem:[#allocation10 + $0x324] sm:$0xf0]  ;;  %v6575_v18 = vor.u32 %v7721_v8, %v6574_v6 }
 0x2c1   :  { %v6542_v19 = vld [vmem:[#allocation10 + $0x548] sm:$0xf] }
 0x2c2   :  { %v6158_v53 = vld [vmem:[#allocation10 + $0x248] sm:$0xf] }
 0x2c3   :  { %v7617_v54 = vld [vmem:[#allocation10 + $0x264] sm:$0xf0] }
 0x2c4   :  { %v6159_v62 = vor.u32 %v7617_v54, %v6158_v53  ;;  %v5870_v63 = vld [vmem:[#allocation10 + $0x8] sm:$0xf]  ;;  %v6000_v53 = vld [vmem:[#allocation10 + $0x128] sm:$0xf0] }
 0x2c5   :  { %v6414_v13 = vld [vmem:[#allocation10 + $0x448] sm:$0xf]  ;;  %v7637_v54 = vld [vmem:[#allocation10 + $0x30c] sm:$0xf] }
 0x31e   :  { %v1567_v21 = vpop.f32.mrf.mxu0  ;;  %v1587_v22 = vpop.f32.mrf.mxu1 }
 0x31f   :  { %v1630_v23 = vperm.slane %v1567_v21, 0  ;;  %v1631_v3 = vperm.slane %v1587_v22, 0  ;;  %v1638_v25 = vperm.slane %v1567_v21, 1  ;;  %v1639_v27 = vperm.slane %v1587_v22, 1 }
 0x320   :  { %v5999_v21 = vor.u32 %v7577_v15, %v5998_v14  ;;  %v6255_v22 = vor.u32 %v7641_v17, %v6254_v16  ;;  %v7681_v14 = vld [vmem:[#allocation10 + $0x464] sm:$0xf0] }
 0x321   :  { %v1634_v24 = vmul.f32 %v1630_v23, %v8656_v20  ;;  %v1635_v26 = vmul.f32 %v1631_v3, %v8662_v33  ;;  %v7593_v20 = vld [vmem:[#allocation10 + $0x1a4] sm:$0xf0] }
 0x322   :  { %v6063_v52 = vor.u32 %v7593_v20, %v6062_v44  ;;  %v7713_v23 = vld [vmem:[#allocation10 + $0x564] sm:$0xf0] }
 0x323   :  { %v1642_v29 = vadd.f32 %v1638_v25, %v1634_v24  ;;  %v1643_v30 = vadd.f32 %v1639_v27, %v1635_v26  ;;  %v6798_v3 = vld [vmem:[#allocation10 + $0x748] sm:$0xf] }
 0x324   :  { %v7777_v24 = vld [vmem:[#allocation10 + $0x764] sm:$0xf0] }
 0x325   :  { %v1646_v35 = vmax.f32 %v1642_v29, 0.0  ;;  %v1647_v40 = vmax.f32 %v1643_v30, 0.0  ;;  %v1607_v36 = vpop.f32.mrf.mxu2  ;;  %v1627_v37 = vpop.f32.mrf.mxu3  ;;  %v5966_v25 = vld [vmem:[#allocation10 + $0xc8] sm:$0xf]  ;;  %v6543_v29 = vor.u32 %v7713_v23, %v6542_v19  ;;  %v6799_v30 = vor.u32 %v7777_v24, %v6798_v3  ;;  %v7653_v23 = vld [vmem:[#allocation10 + $0x38c] sm:$0xf] }
 0x326   :  { %v1632_v38 = vperm.slane %v1607_v36, 0  ;;  %v1633_v39 = vperm.slane %v1627_v37, 0  ;;  %v1640_v49 = vperm.slane %v1607_v36, 1  ;;  %v1641_v51 = vperm.slane %v1627_v37, 1  ;;  %v7569_v26 = vld [vmem:[#allocation10 + $0xe4] sm:$0xf0] }
 0x327   :  { %v8707_v45 = vpack.c.bf16 %v1646_v35, %v1646_v35  ;;  %v8709_v33 = vpack.c.bf16 %v1647_v40, %v1647_v40  ;;  %v6222_v27 = vld [vmem:[#allocation10 + $0x2c8] sm:$0xf]  ;;  %v5967_v40 = vor.u32 %v7569_v26, %v5966_v25  ;;  %v6415_v3 = vor.u32 %v7681_v14, %v6414_v13  ;;  %v6320_v25 = vld [vmem:[#allocation10 + $0x3a8] sm:$0xf0] }
 0x328   :  { %v1636_v48 = vmul.f32 %v1632_v38, %v8671_v56  ;;  %v1637_v50 = vmul.f32 %v1633_v39, %v8679_v7  ;;  %v7585_v56 = vld [vmem:[#allocation10 + $0x164] sm:$0xf0]  ;;  %v6223_v36 = vor.u32 %v7633_v28, %v6222_v27  ;;  %v6768_v13 = vld [vmem:[#allocation10 + $0x728] sm:$0xf0] }
 0x329   :  { %3198 = vmatmul.bf16.vlgmr.msrb.gmra.mxu0 %v8707_v45  ;;  %3211 = vmatmul.bf16.vlgmr.msrb.gmra.mxu1 %v8709_v33  ;;  %v6031_v5 = vor.u32 %v7585_v56, %v6030_v61  ;;  %v7769_v35 = vld [vmem:[#allocation10 + $0x724] sm:$0xf0] }
 0x32a   :  { %v1644_v57 = vadd.f32 %v1640_v49, %v1636_v48  ;;  %v1645_v58 = vadd.f32 %v1641_v51, %v1637_v50  ;;  %3294 = vmatpush.bf16.msrb.mxu0 %v6095_v42  ;;  %3307 = vmatpush.bf16.msrb.mxu1 %v6351_v43  ;;  %v5934_v37 = vld [vmem:[#allocation10 + $0x88] sm:$0xf]  ;;  %v6511_v43 = vor.u32 %v7705_v32, %v6510_v31  ;;  %v6608_v31 = vld [vmem:[#allocation10 + $0x5e8] sm:$0xf0] }
 0x32b   :  { %v7561_v38 = vld [vmem:[#allocation10 + $0xa4] sm:$0xf0]  ;;  %v6767_v44 = vor.u32 %v7769_v35, %v6766_v34  ;;  %v7789_v32 = vld [vmem:[#allocation10 + $0x7cc] sm:$0xf] }
 0x32c   :  { %v1648_v7 = vmax.f32 %v1644_v57, 0.0  ;;  %v1649_v0 = vmax.f32 %v1645_v58, 0.0  ;;  %v6190_v39 = vld [vmem:[#allocation10 + $0x288] sm:$0xf]  ;;  %v5935_v49 = vor.u32 %v7561_v38, %v5934_v37  ;;  %v6864_v34 = vld [vmem:[#allocation10 + $0x7e8] sm:$0xf0] }
 0x32d   :  { %v7625_v42 = vld [vmem:[#allocation10 + $0x2a4] sm:$0xf0] }
 0x32e   :  { %v8715_v9 = vpack.c.bf16 %v1648_v7, %v1648_v7  ;;  %v8717_v10 = vpack.c.bf16 %v1649_v0, %v1649_v0  ;;  %3295 = vmatpush.bf16.msrb.mxu0 %v6063_v52  ;;  %3308 = vmatpush.bf16.msrb.mxu1 %v6319_v59  ;;  %v6478_v20 = vld [vmem:[#allocation10 + $0x4c8] sm:$0xf]  ;;  %v6191_v50 = vor.u32 %v7625_v42, %v6190_v39  ;;  %v6032_v39 = vld [vmem:[#allocation10 + $0x168] sm:$0xf0] }
 0x32f   :  { %v7761_v48 = vld [vmem:[#allocation10 + $0x6e4] sm:$0xf0]  ;;  %v6479_v55 = vor.u32 %v7697_v46, %v6478_v20  ;;  %v7645_v42 = vld [vmem:[#allocation10 + $0x34c] sm:$0xf]  ;;  %v6867_v20 = vor.u32 %v7789_v32, %v6864_v34 }
 0x330   :  { %3224 = vmatmul.bf16.vlgmr.msrb.gmra.mxu2 %v8715_v9  ;;  %3237 = vmatmul.bf16.vlgmr.msrb.gmra.mxu3 %v8717_v10  ;;  %v5902_v51 = vld [vmem:[#allocation10 + $0x48] sm:$0xf]  ;;  %v6735_v57 = vor.u32 %v7761_v48, %v6734_v47  ;;  %v7717_v46 = vld [vmem:[#allocation10 + $0x58c] sm:$0xf] }
 0x331   :  { %3320 = vmatpush.bf16.msrb.mxu2 %v6607_v1  ;;  %3333 = vmatpush.bf16.msrb.mxu3 %v6863_v4  ;;  %v7553_v52 = vld [vmem:[#allocation10 + $0x64] sm:$0xf0]  ;;  %v7597_v4 = vld [vmem:[#allocation10 + $0x1cc] sm:$0xf] }
 0x332   :  { %3296 = vmatpush.bf16.msrb.mxu0 %v6031_v5  ;;  %3309 = vmatpush.bf16.msrb.mxu1 %v6287_v11  ;;  %v6446_v58 = vld [vmem:[#allocation10 + $0x488] sm:$0xf]  ;;  %v5903_v56 = vor.u32 %v7553_v52, %v5902_v51  ;;  %v6096_v5 = vld [vmem:[#allocation10 + $0x1e8] sm:$0xf0] }
 0x333   :  { %v7689_v59 = vld [vmem:[#allocation10 + $0x4a4] sm:$0xf0]  ;;  %v7661_v11 = vld [vmem:[#allocation10 + $0x3cc] sm:$0xf] }
 0x334   :  { %v7753_v61 = vld [vmem:[#allocation10 + $0x6a4] sm:$0xf0]  ;;  %v6447_v6 = vor.u32 %v7689_v59, %v6446_v58  ;;  %v6355_v19 = vor.u32 %v7661_v11, %v6352_v12  ;;  %v6576_v47 = vld [vmem:[#allocation10 + $0x5a8] sm:$0xf0] }
 0x335   :  { %3321 = vmatpush.bf16.msrb.mxu2 %v6575_v18  ;;  %3334 = vmatpush.bf16.msrb.mxu3 %v6831_v2  ;;  %v7545_v7 = vld [vmem:[#allocation10 + $0x24] sm:$0xf0]  ;;  %v6703_v8 = vor.u32 %v7753_v61, %v6702_v60  ;;  %v6099_v2 = vor.u32 %v7597_v4, %v6096_v5  ;;  %v7781_v48 = vld [vmem:[#allocation10 + $0x78c] sm:$0xf] }
 0x336   :  { %3297 = vmatpush.bf16.msrb.mxu0 %v5999_v21  ;;  %3310 = vmatpush.bf16.msrb.mxu1 %v6255_v22  ;;  %v6126_v0 = vld [vmem:[#allocation10 + $0x208] sm:$0xf]  ;;  %v5871_v17 = vor.u32 %v7545_v7, %v5870_v63  ;;  %v7589_v21 = vld [vmem:[#allocation10 + $0x18c] sm:$0xf] }
 0x337   :  { %v7609_v1 = vld [vmem:[#allocation10 + $0x224] sm:$0xf0]  ;;  %v6064_v22 = vld [vmem:[#allocation10 + $0x1a8] sm:$0xf0] }
 0x338   :  { %v6670_v15 = vld [vmem:[#allocation10 + $0x648] sm:$0xf]  ;;  %v6127_v18 = vor.u32 %v7609_v1, %v6126_v0  ;;  %v6067_v35 = vor.u32 %v7589_v21, %v6064_v22  ;;  %v7573_v52 = vld [vmem:[#allocation10 + $0x10c] sm:$0xf] }
 0x339   :  { %3322 = vmatpush.bf16.msrb.mxu2 %v6543_v29  ;;  %3335 = vmatpush.bf16.msrb.mxu3 %v6799_v30  ;;  %v7745_v16 = vld [vmem:[#allocation10 + $0x664] sm:$0xf0]  ;;  %v7725_v30 = vld [vmem:[#allocation10 + $0x5cc] sm:$0xf] }
 0x33a   :  { %3250 = vmatmul.bf16.vlgmr.msra.gmra.mxu0 %v8707_v45  ;;  %3263 = vmatmul.bf16.vlgmr.msra.gmra.mxu1 %v8709_v33  ;;  %v6671_v24 = vor.u32 %v7745_v16, %v6670_v15  ;;  %v6382_v26 = vld [vmem:[#allocation10 + $0x408] sm:$0xf]  ;;  %v7709_v59 = vld [vmem:[#allocation10 + $0x54c] sm:$0xf] }
 0x33b   :  { %3298 = vmatpush.bf16.msrb.mxu0 %v5967_v40  ;;  %3311 = vmatpush.bf16.msrb.mxu1 %v6223_v36  ;;  %v7673_v27 = vld [vmem:[#allocation10 + $0x424] sm:$0xf0]  ;;  %v6323_v40 = vor.u32 %v7653_v23, %v6320_v25  ;;  %v7581_v36 = vld [vmem:[#allocation10 + $0x14c] sm:$0xf] }
 0x33c   :  { %v6638_v28 = vld [vmem:[#allocation10 + $0x608] sm:$0xf]  ;;  %v6383_v37 = vor.u32 %v7673_v27, %v6382_v26  ;;  %v6544_v60 = vld [vmem:[#allocation10 + $0x568] sm:$0xf0] }
 0x33d   :  { %3323 = vmatpush.bf16.msrb.mxu2 %v6511_v43  ;;  %3336 = vmatpush.bf16.msrb.mxu3 %v6767_v44  ;;  %v7737_v29 = vld [vmem:[#allocation10 + $0x624] sm:$0xf0]  ;;  %v6288_v43 = vld [vmem:[#allocation10 + $0x368] sm:$0xf0]  ;;  %v6611_v44 = vor.u32 %v7725_v30, %v6608_v31  ;;  %v6547_v5 = vor.u32 %v7709_v59, %v6544_v60  ;;  %v6070_v60 = vld [vmem:[#allocation10 + $0x190] sm:$0xf] }
 0x33e   :  { %v6639_v38 = vor.u32 %v7737_v29, %v6638_v28  ;;  %v6291_v51 = vor.u32 %v7645_v42, %v6288_v43  ;;  %v7773_v61 = vld [vmem:[#allocation10 + $0x74c] sm:$0xf] }
 0x33f   :  { %3299 = vmatpush.bf16.msrb.mxu0 %v5935_v49  ;;  %3312 = vmatpush.bf16.msrb.mxu1 %v6191_v50  ;;  %v6832_v49 = vld [vmem:[#allocation10 + $0x7a8] sm:$0xf0]  ;;  %v6035_v50 = vor.u32 %v7581_v36, %v6032_v39 }
 0x340   :  { %3276 = vmatmul.bf16.vlgmr.msra.gmra.mxu2 %v8715_v9  ;;  %3289 = vmatmul.bf16.vlgmr.msra.gmra.mxu3 %v8717_v10  ;;  %v6835_v58 = vor.u32 %v7781_v48, %v6832_v49  ;;  %v7565_v7 = vld [vmem:[#allocation10 + $0xcc] sm:$0xf]  ;;  %v6358_v49 = vld [vmem:[#allocation10 + $0x3d0] sm:$0xf] }
 0x341   :  { %3324 = vmatpush.bf16.msrb.mxu2 %v6479_v55  ;;  %3337 = vmatpush.bf16.msrb.mxu3 %v6735_v57  ;;  %v6256_v55 = vld [vmem:[#allocation10 + $0x328] sm:$0xf0]  ;;  %v6579_v57 = vor.u32 %v7717_v46, %v6576_v47  ;;  %v7602_v46 = vld [vmem:[#allocation10 + $0x1ec] sm:$0xf0] }
 0x342   :  { %v6259_v63 = vor.u32 %v7637_v54, %v6256_v55  ;;  %v5968_v0 = vld [vmem:[#allocation10 + $0xe8] sm:$0xf0] }
 0x343   :  { %3300 = vmatpush.bf16.msrb.mxu0 %v5903_v56  ;;  %3313 = vmatpush.bf16.msrb.mxu1 %v6159_v62  ;;  %v6800_v56 = vld [vmem:[#allocation10 + $0x768] sm:$0xf0]  ;;  %v6003_v62 = vor.u32 %v7573_v52, %v6000_v53  ;;  %v5971_v14 = vor.u32 %v7565_v7, %v5968_v0  ;;  %v7658_v7 = vld [vmem:[#allocation10 + $0x3ac] sm:$0xf0] }
 0x344   :  { %v7629_v1 = vld [vmem:[#allocation10 + $0x2cc] sm:$0xf] }
 0x345   :  { %3325 = vmatpush.bf16.msrb.mxu2 %v6447_v6  ;;  %3338 = vmatpush.bf16.msrb.mxu3 %v6703_v8  ;;  %v6224_v4 = vld [vmem:[#allocation10 + $0x2e8] sm:$0xf0]  ;;  %v6803_v6 = vor.u32 %v7773_v61, %v6800_v56  ;;  %v7594_v61 = vld [vmem:[#allocation10 + $0x1ac] sm:$0xf0] }
 0x346   :  { %v7701_v8 = vld [vmem:[#allocation10 + $0x50c] sm:$0xf]  ;;  %v6227_v15 = vor.u32 %v7629_v1, %v6224_v4  ;;  %v6326_v56 = vld [vmem:[#allocation10 + $0x390] sm:$0xf] }
 0x347   :  { %3301 = vmatpush.bf16.msrb.mxu0 %v5871_v17  ;;  %3314 = vmatpush.bf16.msrb.mxu1 %v6127_v18  ;;  %v6512_v11 = vld [vmem:[#allocation10 + $0x528] sm:$0xf0] }
 0x348   :  { %v7765_v12 = vld [vmem:[#allocation10 + $0x70c] sm:$0xf] }
 0x349   :  { %3326 = vmatpush.bf16.msrb.mxu2 %v6415_v3  ;;  %3339 = vmatpush.bf16.msrb.mxu3 %v6671_v24  ;;  %v7557_v16 = vld [vmem:[#allocation10 + $0x8c] sm:$0xf]  ;;  %v6771_v21 = vor.u32 %v7765_v12, %v6768_v13  ;;  %v7794_v12 = vld [vmem:[#allocation10 + $0x7ec] sm:$0xf0]  ;;  %v6071_v13 = vor.u32 %v7594_v61, %v6070_v60 }
 0x34a   :  { %3302 = vmatmul.bf16.vlgmr.msrb.gmra.mxu0 %v8707_v45  ;;  %3315 = vmatmul.bf16.vlgmr.msrb.gmra.mxu1 %v8709_v33  ;;  %v5936_v17 = vld [vmem:[#allocation10 + $0xa8] sm:$0xf0]  ;;  %v7626_v60 = vld [vmem:[#allocation10 + $0x2ac] sm:$0xf0] }
 0x34b   :  { %3346 = vmatpush.bf16.msra.mxu0 %v6099_v2  ;;  %3359 = vmatpush.bf16.msra.mxu1 %v6355_v19  ;;  %v7621_v18 = vld [vmem:[#allocation10 + $0x28c] sm:$0xf]  ;;  %v6515_v19 = vor.u32 %v7701_v8, %v6512_v11  ;;  %v5939_v25 = vor.u32 %v7557_v16, %v5936_v17  ;;  %v7730_v8 = vld [vmem:[#allocation10 + $0x5ec] sm:$0xf0] }
 0x34c   :  { %v6192_v2 = vld [vmem:[#allocation10 + $0x2a8] sm:$0xf0]  ;;  %v6870_v11 = vld [vmem:[#allocation10 + $0x7d0] sm:$0xf] }
 0x34d   :  { %3327 = vmatpush.bf16.msrb.mxu2 %v6383_v37  ;;  %3340 = vmatpush.bf16.msrb.mxu3 %v6639_v38  ;;  %v7693_v22 = vld [vmem:[#allocation10 + $0x4cc] sm:$0xf]  ;;  %v6195_v26 = vor.u32 %v7621_v18, %v6192_v2  ;;  %v6038_v17 = vld [vmem:[#allocation10 + $0x150] sm:$0xf] }
 0x34e   :  { %v6480_v23 = vld [vmem:[#allocation10 + $0x4e8] sm:$0xf0]  ;;  %v7586_v18 = vld [vmem:[#allocation10 + $0x16c] sm:$0xf0] }
 0x34f   :  { %3347 = vmatpush.bf16.msra.mxu0 %v6067_v35  ;;  %3360 = vmatpush.bf16.msra.mxu1 %v6323_v40  ;;  %v7757_v3 = vld [vmem:[#allocation10 + $0x6cc] sm:$0xf]  ;;  %v6483_v31 = vor.u32 %v7693_v22, %v6480_v23  ;;  %v7650_v22 = vld [vmem:[#allocation10 + $0x36c] sm:$0xf0] }
 0x350   :  { %3328 = vmatmul.bf16.vlgmr.msrb.gmra.mxu2 %v8715_v9  ;;  %3341 = vmatmul.bf16.vlgmr.msrb.gmra.mxu3 %v8717_v10  ;;  %v6736_v24 = vld [vmem:[#allocation10 + $0x6e8] sm:$0xf0]  ;;  %v6582_v23 = vld [vmem:[#allocation10 + $0x590] sm:$0xf] }
 0x351   :  { %3372 = vmatpush.bf16.msra.mxu2 %v6611_v44  ;;  %3385 = vmatpush.bf16.msra.mxu3 %v6867_v20  ;;  %v7549_v27 = vld [vmem:[#allocation10 + $0x4c] sm:$0xf]  ;;  %v6739_v32 = vor.u32 %v7757_v3, %v6736_v24  ;;  %v6102_v20 = vld [vmem:[#allocation10 + $0x1d0] sm:$0xf] }
 0x352   :  { %v5904_v28 = vld [vmem:[#allocation10 + $0x68] sm:$0xf0]  ;;  %v7722_v3 = vld [vmem:[#allocation10 + $0x5ac] sm:$0xf0] }
 0x353   :  { %3348 = vmatpush.bf16.msra.mxu0 %v6035_v50  ;;  %3361 = vmatpush.bf16.msra.mxu1 %v6291_v51  ;;  %v7613_v29 = vld [vmem:[#allocation10 + $0x24c] sm:$0xf]  ;;  %v5907_v37 = vor.u32 %v7549_v27, %v5904_v28  ;;  %v7666_v50 = vld [vmem:[#allocation10 + $0x3ec] sm:$0xf0] }
 0x354   :  { %v6160_v30 = vld [vmem:[#allocation10 + $0x268] sm:$0xf0]  ;;  %v6359_v59 = vor.u32 %v7666_v50, %v6358_v49  ;;  %v6838_v24 = vld [vmem:[#allocation10 + $0x790] sm:$0xf] }
 0x355   :  { %3373 = vmatpush.bf16.msra.mxu2 %v6579_v57  ;;  %3386 = vmatpush.bf16.msra.mxu3 %v6835_v58  ;;  %v7685_v34 = vld [vmem:[#allocation10 + $0x48c] sm:$0xf]  ;;  %v6163_v38 = vor.u32 %v7613_v29, %v6160_v30  ;;  %v6103_v58 = vor.u32 %v7602_v46, %v6102_v20  ;;  %v6006_v28 = vld [vmem:[#allocation10 + $0x110] sm:$0xf]  ;;  %v6583_v30 = vor.u32 %v7722_v3, %v6582_v23  ;;  %v7598_v3 = vld [vmem:[#allocation10 + $0x1d4] sm:$0xf] }
 0x356   :  { %v6448_v35 = vld [vmem:[#allocation10 + $0x4a8] sm:$0xf0]  ;;  %v7578_v29 = vld [vmem:[#allocation10 + $0x12c] sm:$0xf0] }
 0x357   :  { %3349 = vmatpush.bf16.msra.mxu0 %v6003_v62  ;;  %3362 = vmatpush.bf16.msra.mxu1 %v6259_v63  ;;  %v7749_v40 = vld [vmem:[#allocation10 + $0x68c] sm:$0xf]  ;;  %v6451_v47 = vor.u32 %v7685_v34, %v6448_v35  ;;  %v7642_v34 = vld [vmem:[#allocation10 + $0x32c] sm:$0xf0] }
 0x358   :  { %v6704_v36 = vld [vmem:[#allocation10 + $0x6a8] sm:$0xf0]  ;;  %v6550_v35 = vld [vmem:[#allocation10 + $0x550] sm:$0xf] }
 0x359   :  { %3374 = vmatpush.bf16.msra.mxu2 %v6547_v5  ;;  %3387 = vmatpush.bf16.msra.mxu3 %v6803_v6  ;;  %v7541_v39 = vld [vmem:[#allocation10 + $0xc] sm:$0xf]  ;;  %v6707_v48 = vor.u32 %v7749_v40, %v6704_v36  ;;  %v6614_v6 = vld [vmem:[#allocation10 + $0x5d0] sm:$0xf] }
 0x35a   :  { %v5872_v42 = vld [vmem:[#allocation10 + $0x28] sm:$0xf0]  ;;  %v6615_v2 = vor.u32 %v7730_v8, %v6614_v6  ;;  %v7714_v40 = vld [vmem:[#allocation10 + $0x56c] sm:$0xf0] }
 0x35b   :  { %3350 = vmatpush.bf16.msra.mxu0 %v5971_v14  ;;  %3363 = vmatpush.bf16.msra.mxu1 %v6227_v15  ;;  %v7605_v43 = vld [vmem:[#allocation10 + $0x20c] sm:$0xf]  ;;  %v5875_v55 = vor.u32 %v7541_v39, %v5872_v42  ;;  %v6327_v14 = vor.u32 %v7658_v7, %v6326_v56  ;;  %v6806_v36 = vld [vmem:[#allocation10 + $0x750] sm:$0xf] }
 0x35c   :  { %v6128_v44 = vld [vmem:[#allocation10 + $0x228] sm:$0xf0]  ;;  %v5974_v42 = vld [vmem:[#allocation10 + $0xd0] sm:$0xf] }
 0x35d   :  { %3375 = vmatpush.bf16.msra.mxu2 %v6515_v19  ;;  %3388 = vmatpush.bf16.msra.mxu3 %v6771_v21  ;;  %v7677_v51 = vld [vmem:[#allocation10 + $0x44c] sm:$0xf]  ;;  %v6131_v57 = vor.u32 %v7605_v43, %v6128_v44  ;;  %v6871_v19 = vor.u32 %v7794_v12, %v6870_v11  ;;  %v6294_v21 = vld [vmem:[#allocation10 + $0x350] sm:$0xf]  ;;  %v6551_v44 = vor.u32 %v7714_v40, %v6550_v35  ;;  %v7590_v40 = vld [vmem:[#allocation10 + $0x194] sm:$0xf] }
 0x35e   :  { %v6416_v52 = vld [vmem:[#allocation10 + $0x468] sm:$0xf0]  ;;  %v6295_v27 = vor.u32 %v7650_v22, %v6294_v21  ;;  %v7570_v43 = vld [vmem:[#allocation10 + $0xec] sm:$0xf0] }
 0x35f   :  { %3351 = vmatpush.bf16.msra.mxu0 %v5939_v25  ;;  %3364 = vmatpush.bf16.msra.mxu1 %v6195_v26  ;;  %v7741_v53 = vld [vmem:[#allocation10 + $0x64c] sm:$0xf]  ;;  %v6419_v62 = vor.u32 %v7677_v51, %v6416_v52  ;;  %v7786_v25 = vld [vmem:[#allocation10 + $0x7ac] sm:$0xf0]  ;;  %v6039_v26 = vor.u32 %v7586_v18, %v6038_v17  ;;  %v5975_v52 = vor.u32 %v7570_v43, %v5974_v42  ;;  %v6328_v42 = vld [vmem:[#allocation10 + $0x3b0] sm:$0xf0] }
 0x360   :  { %v6672_v54 = vld [vmem:[#allocation10 + $0x668] sm:$0xf0]  ;;  %v6230_v46 = vld [vmem:[#allocation10 + $0x2d0] sm:$0xf] }
 0x361   :  { %3376 = vmatpush.bf16.msra.mxu2 %v6483_v31  ;;  %3389 = vmatpush.bf16.msra.mxu3 %v6739_v32  ;;  %v6675_v63 = vor.u32 %v7741_v53, %v6672_v54  ;;  %v7669_v0 = vld [vmem:[#allocation10 + $0x40c] sm:$0xf]  ;;  %v6839_v31 = vor.u32 %v7786_v25, %v6838_v24  ;;  %v6262_v32 = vld [vmem:[#allocation10 + $0x310] sm:$0xf]  ;;  %v6104_v24 = vld [vmem:[#allocation10 + $0x1f0] sm:$0xf0] }
 0x362   :  { %v6384_v1 = vld [vmem:[#allocation10 + $0x428] sm:$0xf0]  ;;  %v6263_v39 = vor.u32 %v7642_v34, %v6262_v32  ;;  %v7706_v49 = vld [vmem:[#allocation10 + $0x52c] sm:$0xf0]  ;;  %v7662_v25 = vld [vmem:[#allocation10 + $0x3d4] sm:$0xf]  ;;  %v6107_v34 = vor.u32 %v7598_v3, %v6104_v24 }
 0x363   :  { %3352 = vmatpush.bf16.msra.mxu0 %v5907_v37  ;;  %3365 = vmatpush.bf16.msra.mxu1 %v6163_v38  ;;  %v7733_v4 = vld [vmem:[#allocation10 + $0x60c] sm:$0xf]  ;;  %v6387_v15 = vor.u32 %v7669_v0, %v6384_v1  ;;  %v7778_v37 = vld [vmem:[#allocation10 + $0x76c] sm:$0xf0]  ;;  %v6007_v38 = vor.u32 %v7578_v29, %v6006_v28  ;;  %v6232_v3 = vld [vmem:[#allocation10 + $0x2f0] sm:$0xf0] }
 0x364   :  { %v6640_v5 = vld [vmem:[#allocation10 + $0x628] sm:$0xf0]  ;;  %v6807_v20 = vor.u32 %v7778_v37, %v6806_v36  ;;  %v6774_v50 = vld [vmem:[#allocation10 + $0x710] sm:$0xf]  ;;  %v6072_v36 = vld [vmem:[#allocation10 + $0x1b0] sm:$0xf0] }
 0x365   :  { %3377 = vmatpush.bf16.msra.mxu2 %v6451_v47  ;;  %3390 = vmatpush.bf16.msra.mxu3 %v6707_v48  ;;  %v6643_v16 = vor.u32 %v7733_v4, %v6640_v5  ;;  %v7634_v47 = vld [vmem:[#allocation10 + $0x2ec] sm:$0xf0]  ;;  %v7654_v37 = vld [vmem:[#allocation10 + $0x394] sm:$0xf] }
 0x366   :  { %v6518_v48 = vld [vmem:[#allocation10 + $0x510] sm:$0xf]  ;;  %v6231_v53 = vor.u32 %v7634_v47, %v6230_v46  ;;  %v7726_v47 = vld [vmem:[#allocation10 + $0x5d4] sm:$0xf] }
 0x367   :  { %3353 = vmatpush.bf16.msra.mxu0 %v5875_v55  ;;  %3366 = vmatpush.bf16.msra.mxu1 %v6131_v57  ;;  %v7770_v51 = vld [vmem:[#allocation10 + $0x72c] sm:$0xf0]  ;;  %v6519_v57 = vor.u32 %v7706_v49, %v6518_v48  ;;  %v6616_v48 = vld [vmem:[#allocation10 + $0x5f0] sm:$0xf0] }
 0x368   :  { %v5942_v54 = vld [vmem:[#allocation10 + $0x90] sm:$0xf]  ;;  %v7790_v49 = vld [vmem:[#allocation10 + $0x7d4] sm:$0xf] }
 0x369   :  { %3378 = vmatpush.bf16.msra.mxu2 %v6419_v62  ;;  %3391 = vmatpush.bf16.msra.mxu3 %v6675_v63  ;;  %v7562_v55 = vld [vmem:[#allocation10 + $0xac] sm:$0xf0]  ;;  %v7702_v24 = vld [vmem:[#allocation10 + $0x514] sm:$0xf] }
 0x36a   :  { %3354 = vmatmul.bf16.vlgmr.msra.gmra.mxu0 %v8707_v45  ;;  %3367 = vmatmul.bf16.vlgmr.msra.gmra.mxu1 %v8709_v33  ;;  %v6486_v61 = vld [vmem:[#allocation10 + $0x4d0] sm:$0xf]  ;;  %v5943_v7 = vor.u32 %v7562_v55, %v5942_v54  ;;  %v7582_v55 = vld [vmem:[#allocation10 + $0x154] sm:$0xf] }
 0x36b   :  { %3398 = vmatpush.bf16.msrb.mxu0 %v6103_v58  ;;  %3411 = vmatpush.bf16.msrb.mxu1 %v6359_v59  ;;  %v6775_v58 = vor.u32 %v7770_v51, %v6774_v50  ;;  %v6198_v59 = vld [vmem:[#allocation10 + $0x290] sm:$0xf]  ;;  %v6872_v50 = vld [vmem:[#allocation10 + $0x7f0] sm:$0xf0]  ;;  %v6075_v51 = vor.u32 %v7590_v40, %v6072_v36 }
 0x36c   :  { %v7698_v56 = vld [vmem:[#allocation10 + $0x4ec] sm:$0xf0]  ;;  %v6199_v0 = vor.u32 %v7626_v60, %v6198_v59  ;;  %v6875_v59 = vor.u32 %v7790_v49, %v6872_v50  ;;  %v7646_v60 = vld [vmem:[#allocation10 + $0x354] sm:$0xf] }
 0x36d   :  { %3379 = vmatpush.bf16.msra.mxu2 %v6387_v15  ;;  %3392 = vmatpush.bf16.msra.mxu3 %v6643_v16  ;;  %v6742_v62 = vld [vmem:[#allocation10 + $0x6d0] sm:$0xf]  ;;  %v6487_v5 = vor.u32 %v7698_v56, %v6486_v61  ;;  %v6296_v61 = vld [vmem:[#allocation10 + $0x370] sm:$0xf0] }
 0x36e   :  { %v7762_v63 = vld [vmem:[#allocation10 + $0x6ec] sm:$0xf0]  ;;  %v7718_v56 = vld [vmem:[#allocation10 + $0x594] sm:$0xf] }
 0x36f   :  { %3399 = vmatpush.bf16.msrb.mxu0 %v6071_v13  ;;  %3412 = vmatpush.bf16.msrb.mxu1 %v6327_v14  ;;  %v5910_v1 = vld [vmem:[#allocation10 + $0x50] sm:$0xf]  ;;  %v6743_v6 = vor.u32 %v7762_v63, %v6742_v62  ;;  %v6584_v62 = vld [vmem:[#allocation10 + $0x5b0] sm:$0xf0] }
 0x370   :  { %3380 = vmatmul.bf16.vlgmr.msra.gmra.mxu2 %v8715_v9  ;;  %3393 = vmatmul.bf16.vlgmr.msra.gmra.mxu3 %v8717_v10  ;;  %v7554_v4 = vld [vmem:[#allocation10 + $0x6c] sm:$0xf0]  ;;  %v7782_v63 = vld [vmem:[#allocation10 + $0x794] sm:$0xf] }
 0x371   :  { %3424 = vmatpush.bf16.msrb.mxu2 %v6615_v2  ;;  %3437 = vmatpush.bf16.msrb.mxu3 %v6871_v19  ;;  %v6166_v8 = vld [vmem:[#allocation10 + $0x250] sm:$0xf]  ;;  %v5911_v16 = vor.u32 %v7554_v4, %v5910_v1  ;;  %v6299_v1 = vor.u32 %v7646_v60, %v6296_v61  ;;  %v7574_v4 = vld [vmem:[#allocation10 + $0x114] sm:$0xf] }
 0x372   :  { %v7618_v11 = vld [vmem:[#allocation10 + $0x26c] sm:$0xf0]  ;;  %v6200_v40 = vld [vmem:[#allocation10 + $0x2b0] sm:$0xf0] }
 0x373   :  { %3400 = vmatpush.bf16.msrb.mxu0 %v6039_v26  ;;  %3413 = vmatpush.bf16.msrb.mxu1 %v6295_v27  ;;  %v6454_v12 = vld [vmem:[#allocation10 + $0x490] sm:$0xf]  ;;  %v6167_v17 = vor.u32 %v7618_v11, %v6166_v8  ;;  %v6360_v26 = vld [vmem:[#allocation10 + $0x3f0] sm:$0xf0] }
 0x374   :  { %v7690_v13 = vld [vmem:[#allocation10 + $0x4ac] sm:$0xf0]  ;;  %v6363_v35 = vor.u32 %v7662_v25, %v6360_v26  ;;  %v7638_v11 = vld [vmem:[#allocation10 + $0x314] sm:$0xf] }
 0x375   :  { %3425 = vmatpush.bf16.msrb.mxu2 %v6583_v30  ;;  %3438 = vmatpush.bf16.msrb.mxu3 %v6839_v31  ;;  %v6710_v14 = vld [vmem:[#allocation10 + $0x690] sm:$0xf]  ;;  %v6455_v21 = vor.u32 %v7690_v13, %v6454_v12  ;;  %v6264_v12 = vld [vmem:[#allocation10 + $0x330] sm:$0xf0] }
 0x376   :  { %v7754_v15 = vld [vmem:[#allocation10 + $0x6ac] sm:$0xf0]  ;;  %v7710_v13 = vld [vmem:[#allocation10 + $0x554] sm:$0xf] }
 0x377   :  { %3401 = vmatpush.bf16.msrb.mxu0 %v6007_v38  ;;  %3414 = vmatpush.bf16.msrb.mxu1 %v6263_v39  ;;  %v5878_v18 = vld [vmem:[#allocation10 + $0x10] sm:$0xf]  ;;  %v6711_v22 = vor.u32 %v7754_v15, %v6710_v14  ;;  %v6552_v14 = vld [vmem:[#allocation10 + $0x570] sm:$0xf0] }
 0x378   :  { %v7546_v2 = vld [vmem:[#allocation10 + $0x2c] sm:$0xf0]  ;;  %v7774_v15 = vld [vmem:[#allocation10 + $0x754] sm:$0xf] }
 0x379   :  { %3426 = vmatpush.bf16.msrb.mxu2 %v6551_v44  ;;  %3439 = vmatpush.bf16.msrb.mxu3 %v6807_v20  ;;  %v6134_v19 = vld [vmem:[#allocation10 + $0x210] sm:$0xf]  ;;  %v5879_v31 = vor.u32 %v7546_v2, %v5878_v18  ;;  %v6267_v18 = vor.u32 %v7638_v11, %v6264_v12  ;;  %v7566_v2 = vld [vmem:[#allocation10 + $0xd4] sm:$0xf] }
 0x37a   :  { %v7610_v23 = vld [vmem:[#allocation10 + $0x22c] sm:$0xf0]  ;;  %v6520_v25 = vld [vmem:[#allocation10 + $0x530] sm:$0xf0] }
 0x37b   :  { %3402 = vmatpush.bf16.msrb.mxu0 %v5975_v52  ;;  %3415 = vmatpush.bf16.msrb.mxu1 %v6231_v53  ;;  %v6422_v27 = vld [vmem:[#allocation10 + $0x450] sm:$0xf]  ;;  %v6135_v32 = vor.u32 %v7610_v23, %v6134_v19  ;;  %v6331_v52 = vor.u32 %v7654_v37, %v6328_v42  ;;  %v5976_v19 = vld [vmem:[#allocation10 + $0xf0] sm:$0xf0] }
 0x37c   :  { %v7682_v28 = vld [vmem:[#allocation10 + $0x46c] sm:$0xf0]  ;;  %v7630_v23 = vld [vmem:[#allocation10 + $0x2d4] sm:$0xf] }
 0x37d   :  { %3427 = vmatpush.bf16.msrb.mxu2 %v6519_v57  ;;  %3440 = vmatpush.bf16.msrb.mxu3 %v6775_v58  ;;  %v6678_v29 = vld [vmem:[#allocation10 + $0x650] sm:$0xf]  ;;  %v6423_v38 = vor.u32 %v7682_v28, %v6422_v27  ;;  %v6040_v57 = vld [vmem:[#allocation10 + $0x170] sm:$0xf0]  ;;  %v6619_v58 = vor.u32 %v7726_v47, %v6616_v48  ;;  %v5979_v28 = vor.u32 %v7566_v2, %v5976_v19  ;;  %v7659_v2 = vld [vmem:[#allocation10 + $0x3b4] sm:$0xf0] }
 0x37e   :  { %v7746_v30 = vld [vmem:[#allocation10 + $0x66c] sm:$0xf0]  ;;  %v7766_v26 = vld [vmem:[#allocation10 + $0x714] sm:$0xf] }
 0x37f   :  { %3403 = vmatpush.bf16.msrb.mxu0 %v5943_v7  ;;  %3416 = vmatpush.bf16.msrb.mxu1 %v6199_v0  ;;  %v6679_v39 = vor.u32 %v7746_v30, %v6678_v29  ;;  %v6390_v43 = vld [vmem:[#allocation10 + $0x410] sm:$0xf]  ;;  %v6840_v7 = vld [vmem:[#allocation10 + $0x7b0] sm:$0xf0]  ;;  %v6043_v0 = vor.u32 %v7582_v55, %v6040_v57  ;;  %v6235_v29 = vor.u32 %v7630_v23, %v6232_v3  ;;  %v6622_v3 = vld [vmem:[#allocation10 + $0x5d8] sm:$0xf] }
 0x380   :  { %v7674_v44 = vld [vmem:[#allocation10 + $0x42c] sm:$0xf0]  ;;  %v6843_v8 = vor.u32 %v7782_v63, %v6840_v7  ;;  %v6776_v27 = vld [vmem:[#allocation10 + $0x730] sm:$0xf0]  ;;  %v7603_v63 = vld [vmem:[#allocation10 + $0x1f4] sm:$0xf0] }
 0x381   :  { %3428 = vmatpush.bf16.msrb.mxu2 %v6487_v5  ;;  %3441 = vmatpush.bf16.msrb.mxu3 %v6743_v6  ;;  %v6646_v20 = vld [vmem:[#allocation10 + $0x610] sm:$0xf]  ;;  %v6391_v53 = vor.u32 %v7674_v44, %v6390_v43  ;;  %v6008_v5 = vld [vmem:[#allocation10 + $0x130] sm:$0xf0]  ;;  %v6587_v6 = vor.u32 %v7718_v56, %v6584_v62  ;;  %v6110_v62 = vld [vmem:[#allocation10 + $0x1d8] sm:$0xf] }
 0x382   :  { %v7738_v46 = vld [vmem:[#allocation10 + $0x62c] sm:$0xf0]  ;;  %v7558_v30 = vld [vmem:[#allocation10 + $0x94] sm:$0xf]  ;;  %v6366_v7 = vld [vmem:[#allocation10 + $0x3d8] sm:$0xf]  ;;  %v6111_v12 = vor.u32 %v7603_v63, %v6110_v62 }
 0x383   :  { %3404 = vmatpush.bf16.msrb.mxu0 %v5911_v16  ;;  %3417 = vmatpush.bf16.msrb.mxu1 %v6167_v17  ;;  %v6647_v54 = vor.u32 %v7738_v46, %v6646_v20  ;;  %v6808_v16 = vld [vmem:[#allocation10 + $0x770] sm:$0xf0]  ;;  %v6011_v17 = vor.u32 %v7574_v4, %v6008_v5 }
 0x384   :  { %v7694_v36 = vld [vmem:[#allocation10 + $0x4d4] sm:$0xf] }
 0x385   :  { %3429 = vmatpush.bf16.msrb.mxu2 %v6455_v21  ;;  %3442 = vmatpush.bf16.msrb.mxu3 %v6711_v22  ;;  %v6555_v21 = vor.u32 %v7710_v13, %v6552_v14  ;;  %v6811_v22 = vor.u32 %v7774_v15, %v6808_v16  ;;  %v6488_v37 = vld [vmem:[#allocation10 + $0x4f0] sm:$0xf0]  ;;  %v6078_v14 = vld [vmem:[#allocation10 + $0x198] sm:$0xf] }
 0x386   :  { %v7550_v44 = vld [vmem:[#allocation10 + $0x54] sm:$0xf]  ;;  %v6491_v46 = vor.u32 %v7694_v36, %v6488_v37  ;;  %v7595_v15 = vld [vmem:[#allocation10 + $0x1b4] sm:$0xf0] }
 0x387   :  { %3405 = vmatpush.bf16.msrb.mxu0 %v5879_v31  ;;  %3418 = vmatpush.bf16.msrb.mxu1 %v6135_v32  ;;  %v5944_v31 = vld [vmem:[#allocation10 + $0xb0] sm:$0xf0]  ;;  %v6523_v32 = vor.u32 %v7702_v24, %v6520_v25  ;;  %v6334_v16 = vld [vmem:[#allocation10 + $0x398] sm:$0xf] }
 0x388   :  { %v5947_v42 = vor.u32 %v7558_v30, %v5944_v31  ;;  %v5912_v20 = vld [vmem:[#allocation10 + $0x70] sm:$0xf0]  ;;  %v7731_v24 = vld [vmem:[#allocation10 + $0x5f4] sm:$0xf0] }
 0x389   :  { %3430 = vmatpush.bf16.msrb.mxu2 %v6423_v38  ;;  %3443 = vmatpush.bf16.msrb.mxu3 %v6679_v39  ;;  %v7758_v38 = vld [vmem:[#allocation10 + $0x6d4] sm:$0xf]  ;;  %v6878_v25 = vld [vmem:[#allocation10 + $0x7d8] sm:$0xf] }
 0x38a   :  { %3406 = vmatmul.bf16.vlgmr.msrb.gmra.mxu0 %v8707_v45  ;;  %3419 = vmatmul.bf16.vlgmr.msrb.gmra.mxu1 %v8709_v33  ;;  %v6744_v39 = vld [vmem:[#allocation10 + $0x6f0] sm:$0xf0]  ;;  %v6046_v31 = vld [vmem:[#allocation10 + $0x158] sm:$0xf] }
 0x38b   :  { %3450 = vmatpush.bf16.msra.mxu0 %v6107_v34  ;;  %3463 = vmatpush.bf16.msra.mxu1 %v6363_v35  ;;  %v6779_v34 = vor.u32 %v7766_v26, %v6776_v27  ;;  %v7622_v35 = vld [vmem:[#allocation10 + $0x294] sm:$0xf]  ;;  %v6747_v47 = vor.u32 %v7758_v38, %v6744_v39  ;;  %v7795_v26 = vld [vmem:[#allocation10 + $0x7f4] sm:$0xf0]  ;;  %v6079_v27 = vor.u32 %v7595_v15, %v6078_v14 }
 0x38c   :  { %v6203_v43 = vor.u32 %v7622_v35, %v6200_v40  ;;  %v7614_v48 = vld [vmem:[#allocation10 + $0x254] sm:$0xf]  ;;  %v6879_v35 = vor.u32 %v7795_v26, %v6878_v25  ;;  %v6302_v40 = vld [vmem:[#allocation10 + $0x358] sm:$0xf] }
 0x38d   :  { %3431 = vmatpush.bf16.msrb.mxu2 %v6391_v53  ;;  %3444 = vmatpush.bf16.msrb.mxu3 %v6647_v54  ;;  %v6168_v49 = vld [vmem:[#allocation10 + $0x270] sm:$0xf0]  ;;  %v5915_v54 = vor.u32 %v7550_v44, %v5912_v20  ;;  %v7651_v36 = vld [vmem:[#allocation10 + $0x374] sm:$0xf0] }
 0x38e   :  { %v7686_v50 = vld [vmem:[#allocation10 + $0x494] sm:$0xf]  ;;  %v6171_v55 = vor.u32 %v7614_v48, %v6168_v49  ;;  %v6590_v37 = vld [vmem:[#allocation10 + $0x598] sm:$0xf]  ;;  %v6303_v44 = vor.u32 %v7651_v36, %v6302_v40 }
 0x38f   :  { %3451 = vmatpush.bf16.msra.mxu0 %v6075_v51  ;;  %3464 = vmatpush.bf16.msra.mxu1 %v6331_v52  ;;  %v6456_v51 = vld [vmem:[#allocation10 + $0x4b0] sm:$0xf0]  ;;  %v7723_v38 = vld [vmem:[#allocation10 + $0x5b4] sm:$0xf0] }
 0x390   :  { %3432 = vmatmul.bf16.vlgmr.msrb.gmra.mxu2 %v8715_v9  ;;  %3445 = vmatmul.bf16.vlgmr.msrb.gmra.mxu3 %v8717_v10  ;;  %v7750_v52 = vld [vmem:[#allocation10 + $0x694] sm:$0xf]  ;;  %v6459_v60 = vor.u32 %v7686_v50, %v6456_v51  ;;  %v6846_v39 = vld [vmem:[#allocation10 + $0x798] sm:$0xf]  ;;  %v6591_v50 = vor.u32 %v7723_v38, %v6590_v37 }
 0x391   :  { %3476 = vmatpush.bf16.msra.mxu2 %v6619_v58  ;;  %3489 = vmatpush.bf16.msra.mxu3 %v6875_v59  ;;  %v6712_v53 = vld [vmem:[#allocation10 + $0x6b0] sm:$0xf0]  ;;  %v7579_v48 = vld [vmem:[#allocation10 + $0x134] sm:$0xf0] }
 0x392   :  { %v7542_v57 = vld [vmem:[#allocation10 + $0x14] sm:$0xf]  ;;  %v6715_v61 = vor.u32 %v7750_v52, %v6712_v53  ;;  %v6270_v52 = vld [vmem:[#allocation10 + $0x318] sm:$0xf] }
 0x393   :  { %3452 = vmatpush.bf16.msra.mxu0 %v6043_v0  ;;  %3465 = vmatpush.bf16.msra.mxu1 %v6299_v1  ;;  %v5880_v58 = vld [vmem:[#allocation10 + $0x30] sm:$0xf0]  ;;  %v7667_v0 = vld [vmem:[#allocation10 + $0x3f4] sm:$0xf0] }
 0x394   :  { %v7606_v59 = vld [vmem:[#allocation10 + $0x214] sm:$0xf]  ;;  %v6367_v13 = vor.u32 %v7667_v0, %v6366_v7  ;;  %v7643_v53 = vld [vmem:[#allocation10 + $0x334] sm:$0xf0] }
 0x395   :  { %3477 = vmatpush.bf16.msra.mxu2 %v6587_v6  ;;  %3490 = vmatpush.bf16.msra.mxu3 %v6843_v8  ;;  %v6136_v56 = vld [vmem:[#allocation10 + $0x230] sm:$0xf0]  ;;  %v5883_v8 = vor.u32 %v7542_v57, %v5880_v58  ;;  %v6814_v57 = vld [vmem:[#allocation10 + $0x758] sm:$0xf] }
 0x396   :  { %v7678_v1 = vld [vmem:[#allocation10 + $0x454] sm:$0xf]  ;;  %v6139_v11 = vor.u32 %v7606_v59, %v6136_v56  ;;  %v7779_v58 = vld [vmem:[#allocation10 + $0x774] sm:$0xf0] }
 0x397   :  { %3453 = vmatpush.bf16.msra.mxu0 %v6011_v17  ;;  %3466 = vmatpush.bf16.msra.mxu1 %v6267_v18  ;;  %v6424_v4 = vld [vmem:[#allocation10 + $0x470] sm:$0xf0]  ;;  %v7571_v56 = vld [vmem:[#allocation10 + $0xf4] sm:$0xf0]  ;;  %v6815_v63 = vor.u32 %v7779_v58, %v6814_v57 }
 0x398   :  { %v7742_v5 = vld [vmem:[#allocation10 + $0x654] sm:$0xf]  ;;  %v6427_v17 = vor.u32 %v7678_v1, %v6424_v4  ;;  %v6238_v7 = vld [vmem:[#allocation10 + $0x2d8] sm:$0xf] }
 0x399   :  { %3478 = vmatpush.bf16.msra.mxu2 %v6555_v21  ;;  %3491 = vmatpush.bf16.msra.mxu3 %v6811_v22  ;;  %v6680_v6 = vld [vmem:[#allocation10 + $0x670] sm:$0xf0]  ;;  %v7635_v0 = vld [vmem:[#allocation10 + $0x2f4] sm:$0xf0] }
 0x39a   :  { %v6683_v18 = vor.u32 %v7742_v5, %v6680_v6  ;;  %v7670_v19 = vld [vmem:[#allocation10 + $0x414] sm:$0xf]  ;;  %v6526_v1 = vld [vmem:[#allocation10 + $0x518] sm:$0xf] }
 0x39b   :  { %3454 = vmatpush.bf16.msra.mxu0 %v5979_v28  ;;  %3467 = vmatpush.bf16.msra.mxu1 %v6235_v29  ;;  %v6392_v21 = vld [vmem:[#allocation10 + $0x430] sm:$0xf0]  ;;  %v6335_v28 = vor.u32 %v7659_v2, %v6334_v16  ;;  %v7707_v4 = vld [vmem:[#allocation10 + $0x534] sm:$0xf0] }
 0x39c   :  { %v7734_v22 = vld [vmem:[#allocation10 + $0x614] sm:$0xf]  ;;  %v6395_v29 = vor.u32 %v7670_v19, %v6392_v21  ;;  %v6782_v5 = vld [vmem:[#allocation10 + $0x718] sm:$0xf]  ;;  %v6527_v16 = vor.u32 %v7707_v4, %v6526_v1  ;;  %v7655_v1 = vld [vmem:[#allocation10 + $0x39c] sm:$0xf] }
 0x39d   :  { %3479 = vmatpush.bf16.msra.mxu2 %v6523_v32  ;;  %3492 = vmatpush.bf16.msra.mxu3 %v6779_v34  ;;  %v6648_v23 = vld [vmem:[#allocation10 + $0x630] sm:$0xf0]  ;;  %v7587_v32 = vld [vmem:[#allocation10 + $0x174] sm:$0xf0]  ;;  %v6623_v34 = vor.u32 %v7731_v24, %v6622_v3 }
 0x39e   :  { %v6651_v30 = vor.u32 %v7734_v22, %v6648_v23  ;;  %v7771_v6 = vld [vmem:[#allocation10 + $0x734] sm:$0xf0] }
 0x39f   :  { %3455 = vmatpush.bf16.msra.mxu0 %v5947_v42  ;;  %3468 = vmatpush.bf16.msra.mxu1 %v6203_v43  ;;  %v7787_v42 = vld [vmem:[#allocation10 + $0x7b4] sm:$0xf0]  ;;  %v6047_v43 = vor.u32 %v7587_v32, %v6046_v31 }
 0x3a0   :  { %v6847_v51 = vor.u32 %v7787_v42, %v6846_v39  ;;  %v5950_v14 = vld [vmem:[#allocation10 + $0x98] sm:$0xf] }
 0x3a1   :  { %3480 = vmatpush.bf16.msra.mxu2 %v6491_v46  ;;  %3493 = vmatpush.bf16.msra.mxu3 %v6747_v47  ;;  %v6014_v47 = vld [vmem:[#allocation10 + $0x118] sm:$0xf] }
 0x3a2   :  { %v6015_v59 = vor.u32 %v7579_v48, %v6014_v47  ;;  %v7563_v15 = vld [vmem:[#allocation10 + $0xb4] sm:$0xf0] }
 0x3a3   :  { %3456 = vmatpush.bf16.msra.mxu0 %v5915_v54  ;;  %3469 = vmatpush.bf16.msra.mxu1 %v6171_v55  ;;  %v6558_v54 = vld [vmem:[#allocation10 + $0x558] sm:$0xf]  ;;  %v5951_v3 = vor.u32 %v7563_v15, %v5950_v14  ;;  %v7727_v14 = vld [vmem:[#allocation10 + $0x5dc] sm:$0xf] }
 0x3a4   :  { %v7715_v55 = vld [vmem:[#allocation10 + $0x574] sm:$0xf0]  ;;  %v6624_v15 = vld [vmem:[#allocation10 + $0x5f8] sm:$0xf0] }
 0x3a5   :  { %3481 = vmatpush.bf16.msra.mxu2 %v6459_v60  ;;  %3494 = vmatpush.bf16.msra.mxu3 %v6715_v61  ;;  %v6271_v60 = vor.u32 %v7643_v53, %v6270_v52  ;;  %v5982_v61 = vld [vmem:[#allocation10 + $0xd8] sm:$0xf]  ;;  %v6559_v62 = vor.u32 %v7715_v55, %v6558_v54  ;;  %v7663_v52 = vld [vmem:[#allocation10 + $0x3dc] sm:$0xf] }
 0x3a6   :  { %v3199_v20 = vpop.f32.mrf.mxu0  ;;  %v3212_v46 = vpop.f32.mrf.mxu1  ;;  %v7627_v2 = vld [vmem:[#allocation10 + $0x2b4] sm:$0xf0]  ;;  %v6368_v53 = vld [vmem:[#allocation10 + $0x3f8] sm:$0xf0] }
 0x3a7   :  { %3457 = vmatpush.bf16.msra.mxu0 %v5883_v8  ;;  %3470 = vmatpush.bf16.msra.mxu1 %v6139_v11  ;;  %v8739_v49 = vadd.f32 %v3212_v46, %v3199_v20  ;;  %v5983_v8 = vor.u32 %v7571_v56, %v5982_v61  ;;  %v6239_v11 = vor.u32 %v7635_v0, %v6238_v7  ;;  %v6494_v19 = vld [vmem:[#allocation10 + $0x4d8] sm:$0xf]  ;;  %v7591_v7 = vld [vmem:[#allocation10 + $0x19c] sm:$0xf] }
 0x3a8   :  { %v7699_v21 = vld [vmem:[#allocation10 + $0x4f4] sm:$0xf0]  ;;  %v6080_v0 = vld [vmem:[#allocation10 + $0x1b8] sm:$0xf0] }
 0x3a9   :  { %3482 = vmatpush.bf16.msra.mxu2 %v6427_v17  ;;  %3495 = vmatpush.bf16.msra.mxu3 %v6683_v18  ;;  %v6783_v17 = vor.u32 %v7771_v6, %v6782_v5  ;;  %v6206_v18 = vld [vmem:[#allocation10 + $0x298] sm:$0xf]  ;;  %v6336_v6 = vld [vmem:[#allocation10 + $0x3b8] sm:$0xf0] }
 0x3aa   :  { %3458 = vmatmul.bf16.vlgmr.msra.gmra.mxu0 %v8707_v45  ;;  %3471 = vmatmul.bf16.vlgmr.msra.gmra.mxu1 %v8709_v33  ;;  %v6750_v22 = vld [vmem:[#allocation10 + $0x6d8] sm:$0xf]  ;;  %v6207_v24 = vor.u32 %v7627_v2, %v6206_v18 }
 0x3ab   :  { %3502 = vmatpush.bf16.msrb.mxu0 %v6111_v12  ;;  %3515 = vmatpush.bf16.msrb.mxu1 %v6367_v13  ;;  %v7763_v23 = vld [vmem:[#allocation10 + $0x6f4] sm:$0xf0] }
 0x3ac   :  { %v5918_v25 = vld [vmem:[#allocation10 + $0x58] sm:$0xf] }
 0x3ad   :  { %3483 = vmatpush.bf16.msra.mxu2 %v6395_v29  ;;  %3496 = vmatpush.bf16.msra.mxu3 %v6651_v30  ;;  %v7555_v26 = vld [vmem:[#allocation10 + $0x74] sm:$0xf0]  ;;  %v6495_v29 = vor.u32 %v7699_v21, %v6494_v19  ;;  %v6751_v30 = vor.u32 %v7763_v23, %v6750_v22  ;;  %v6083_v19 = vor.u32 %v7591_v7, %v6080_v0  ;;  %v7703_v7 = vld [vmem:[#allocation10 + $0x51c] sm:$0xf] }
 0x3ae   :  { %v3201_v12 = vpop.f32.mrf.mxu0  ;;  %v3214_v13 = vpop.f32.mrf.mxu1  ;;  %v6174_v31 = vld [vmem:[#allocation10 + $0x258] sm:$0xf]  ;;  %v5919_v37 = vor.u32 %v7555_v26, %v5918_v25  ;;  %v6339_v21 = vor.u32 %v7655_v1, %v6336_v6  ;;  %v6627_v25 = vor.u32 %v7727_v14, %v6624_v15  ;;  %v6528_v0 = vld [vmem:[#allocation10 + $0x538] sm:$0xf0] }
 0x3af   :  { %3503 = vmatpush.bf16.msrb.mxu0 %v6079_v27  ;;  %3516 = vmatpush.bf16.msrb.mxu1 %v6335_v28  ;;  %v7619_v32 = vld [vmem:[#allocation10 + $0x274] sm:$0xf0]  ;;  %v7767_v1 = vld [vmem:[#allocation10 + $0x71c] sm:$0xf]  ;;  %v6531_v14 = vor.u32 %v7703_v7, %v6528_v0 }
 0x3b0   :  { %3484 = vmatmul.bf16.vlgmr.msra.gmra.mxu2 %v8715_v9  ;;  %3497 = vmatmul.bf16.vlgmr.msra.gmra.mxu3 %v8717_v10  ;;  %v6718_v40 = vld [vmem:[#allocation10 + $0x698] sm:$0xf]  ;;  %v6175_v38 = vor.u32 %v7619_v32, %v6174_v31  ;;  %v7719_v31 = vld [vmem:[#allocation10 + $0x59c] sm:$0xf] }
 0x3b1   :  { %3528 = vmatpush.bf16.msrb.mxu2 %v6623_v34  ;;  %3541 = vmatpush.bf16.msrb.mxu3 %v6879_v35  ;;  %v6462_v34 = vld [vmem:[#allocation10 + $0x498] sm:$0xf]  ;;  %v6592_v32 = vld [vmem:[#allocation10 + $0x5b8] sm:$0xf0] }
 0x3b2   :  { %v7691_v35 = vld [vmem:[#allocation10 + $0x4b4] sm:$0xf0] }
 0x3b3   :  { %3504 = vmatpush.bf16.msrb.mxu0 %v6047_v43  ;;  %3517 = vmatpush.bf16.msrb.mxu1 %v6303_v44  ;;  %v8743_v27 = vpop.f32.mrf.mxu2  ;;  %v8745_v28 = vpop.f32.mrf.mxu3  ;;  %v7755_v36 = vld [vmem:[#allocation10 + $0x6b4] sm:$0xf0]  ;;  %v6463_v46 = vor.u32 %v7691_v35, %v6462_v34  ;;  %v7783_v34 = vld [vmem:[#allocation10 + $0x79c] sm:$0xf] }
 0x3b4   :  { %v5886_v39 = vld [vmem:[#allocation10 + $0x18] sm:$0xf]  ;;  %v6719_v47 = vor.u32 %v7755_v36, %v6718_v40  ;;  %v6848_v35 = vld [vmem:[#allocation10 + $0x7b8] sm:$0xf0] }
 0x3b5   :  { %3529 = vmatpush.bf16.msrb.mxu2 %v6591_v50  ;;  %3542 = vmatpush.bf16.msrb.mxu3 %v6847_v51  ;;  %v7547_v42 = vld [vmem:[#allocation10 + $0x34] sm:$0xf0]  ;;  %v7599_v50 = vld [vmem:[#allocation10 + $0x1dc] sm:$0xf] }
 0x3b6   :  { %v6142_v43 = vld [vmem:[#allocation10 + $0x218] sm:$0xf]  ;;  %v6112_v51 = vld [vmem:[#allocation10 + $0x1f8] sm:$0xf0] }
 0x3b7   :  { %3505 = vmatpush.bf16.msrb.mxu0 %v6015_v59  ;;  %3518 = vmatpush.bf16.msrb.mxu1 %v6271_v60  ;;  %v8747_v44 = vpop.f32.mrf.mxu0  ;;  %v8749_v20 = vpop.f32.mrf.mxu1  ;;  %v7611_v48 = vld [vmem:[#allocation10 + $0x234] sm:$0xf0]  ;;  %v5887_v59 = vor.u32 %v7547_v42, %v5886_v39  ;;  %v7575_v39 = vld [vmem:[#allocation10 + $0x11c] sm:$0xf] }
 0x3b8   :  { %v6430_v54 = vld [vmem:[#allocation10 + $0x458] sm:$0xf]  ;;  %v6143_v60 = vor.u32 %v7611_v48, %v6142_v43  ;;  %v6016_v42 = vld [vmem:[#allocation10 + $0x138] sm:$0xf0]  ;;  %v6595_v43 = vor.u32 %v7719_v31, %v6592_v32 }
 0x3b9   :  { %3530 = vmatpush.bf16.msrb.mxu2 %v6559_v62  ;;  %3543 = vmatpush.bf16.msrb.mxu3 %v6815_v63  ;;  %v7683_v55 = vld [vmem:[#allocation10 + $0x474] sm:$0xf0]  ;;  %v6115_v62 = vor.u32 %v7599_v50, %v6112_v51  ;;  %v6371_v63 = vor.u32 %v7663_v52, %v6368_v53  ;;  %v6272_v48 = vld [vmem:[#allocation10 + $0x338] sm:$0xf0] }
 0x3ba   :  { %v6686_v57 = vld [vmem:[#allocation10 + $0x658] sm:$0xf]  ;;  %v6431_v4 = vor.u32 %v7683_v55, %v6430_v54  ;;  %v7711_v50 = vld [vmem:[#allocation10 + $0x55c] sm:$0xf] }
 0x3bb   :  { %3506 = vmatpush.bf16.msrb.mxu0 %v5983_v8  ;;  %3519 = vmatpush.bf16.msrb.mxu1 %v6239_v11  ;;  %v7747_v58 = vld [vmem:[#allocation10 + $0x674] sm:$0xf0]  ;;  %v3227_v61 = vpop.f32.mrf.mxu2  ;;  %v3240_v56 = vpop.f32.mrf.mxu3  ;;  %v6560_v51 = vld [vmem:[#allocation10 + $0x578] sm:$0xf0] }
 0x3bc   :  { %v6687_v5 = vor.u32 %v7747_v58, %v6686_v57  ;;  %v6398_v8 = vld [vmem:[#allocation10 + $0x418] sm:$0xf]  ;;  %v7775_v52 = vld [vmem:[#allocation10 + $0x75c] sm:$0xf]  ;;  %v6019_v57 = vor.u32 %v7575_v39, %v6016_v42  ;;  %v6563_v61 = vor.u32 %v7711_v50, %v6560_v51 }
 0x3bd   :  { %3531 = vmatpush.bf16.msrb.mxu2 %v6527_v16  ;;  %3544 = vmatpush.bf16.msrb.mxu3 %v6783_v17  ;;  %v7675_v11 = vld [vmem:[#allocation10 + $0x434] sm:$0xf0]  ;;  %v7791_v16 = vld [vmem:[#allocation10 + $0x7dc] sm:$0xf] }
 0x3be   :  { %v6654_v12 = vld [vmem:[#allocation10 + $0x618] sm:$0xf]  ;;  %v6880_v17 = vld [vmem:[#allocation10 + $0x7f8] sm:$0xf0]  ;;  %v6399_v22 = vor.u32 %v7675_v11, %v6398_v8 }
 0x3bf   :  { %3507 = vmatpush.bf16.msrb.mxu0 %v5951_v3  ;;  %3520 = vmatpush.bf16.msrb.mxu1 %v6207_v24  ;;  %v7739_v13 = vld [vmem:[#allocation10 + $0x634] sm:$0xf0]  ;;  %v3253_v18 = vpop.f32.mrf.mxu0  ;;  %v3266_v2 = vpop.f32.mrf.mxu1  ;;  %v7583_v3 = vld [vmem:[#allocation10 + $0x15c] sm:$0xf]  ;;  %v6883_v26 = vor.u32 %v7791_v16, %v6880_v17 }
 0x3c0   :  { %v6655_v23 = vor.u32 %v7739_v13, %v6654_v12  ;;  %v6048_v24 = vld [vmem:[#allocation10 + $0x178] sm:$0xf0] }
 0x3c1   :  { %3532 = vmatpush.bf16.msrb.mxu2 %v6495_v29  ;;  %3545 = vmatpush.bf16.msrb.mxu3 %v6751_v30  ;;  %v7647_v29 = vld [vmem:[#allocation10 + $0x35c] sm:$0xf] }
 0x3c2   :  { %v6304_v30 = vld [vmem:[#allocation10 + $0x378] sm:$0xf0] }
 0x3c3   :  { %3508 = vmatpush.bf16.msrb.mxu0 %v5919_v37  ;;  %3521 = vmatpush.bf16.msrb.mxu1 %v6175_v38  ;;  %v8753_v40 = vpop.f32.mrf.mxu2  ;;  %v8755_v36 = vpop.f32.mrf.mxu3  ;;  %v6051_v37 = vor.u32 %v7583_v3, %v6048_v24  ;;  %v6307_v38 = vor.u32 %v7647_v29, %v6304_v30  ;;  %v6816_v53 = vld [vmem:[#allocation10 + $0x778] sm:$0xf0] }
 0x3c4   :  { %v6819_v56 = vor.u32 %v7775_v52, %v6816_v53  ;;  %v7559_v12 = vld [vmem:[#allocation10 + $0x9c] sm:$0xf] }
 0x3c5   :  { %3533 = vmatpush.bf16.msrb.mxu2 %v6463_v46  ;;  %3546 = vmatpush.bf16.msrb.mxu3 %v6719_v47  ;;  %v6851_v46 = vor.u32 %v7783_v34, %v6848_v35  ;;  %v7639_v47 = vld [vmem:[#allocation10 + $0x31c] sm:$0xf] }
 0x3c6   :  { %v6275_v58 = vor.u32 %v7639_v47, %v6272_v48  ;;  %v5952_v13 = vld [vmem:[#allocation10 + $0xb8] sm:$0xf0] }
 0x3c7   :  { %3509 = vmatpush.bf16.msrb.mxu0 %v5887_v59  ;;  %3522 = vmatpush.bf16.msrb.mxu1 %v6143_v60  ;;  %v8759_v54 = vpop.f32.mrf.mxu0  ;;  %v8761_v55 = vpop.f32.mrf.mxu1  ;;  %v7567_v59 = vld [vmem:[#allocation10 + $0xdc] sm:$0xf]  ;;  %v5955_v3 = vor.u32 %v7559_v12, %v5952_v13  ;;  %v3636_v12 = vld [vmem:[%s10061_s7 + $0xf0] sm:$0xff] }
 0x3c8   :  { %v5984_v60 = vld [vmem:[#allocation10 + $0xf8] sm:$0xf0] }
 0x3c9   :  { %3534 = vmatpush.bf16.msrb.mxu2 %v6431_v4  ;;  %3547 = vmatpush.bf16.msrb.mxu3 %v6687_v5  ;;  %v6784_v4 = vld [vmem:[#allocation10 + $0x738] sm:$0xf0]  ;;  %v5987_v8 = vor.u32 %v7567_v59, %v5984_v60 }
 0x3ca   :  { %3510 = vmatmul.bf16.vlgmr.msrb.gmra.mxu0 %v8707_v45  ;;  %3523 = vmatmul.bf16.vlgmr.msrb.gmra.mxu1 %v8709_v33  ;;  %v6787_v15 = vor.u32 %v7767_v1, %v6784_v4  ;;  %v7623_v16 = vld [vmem:[#allocation10 + $0x29c] sm:$0xf] }
 0x3cb   :  { %3554 = vmatpush.bf16.msra.mxu0 %v6115_v62  ;;  %3567 = vmatpush.bf16.msra.mxu1 %v6371_v63  ;;  %v7631_v62 = vld [vmem:[#allocation10 + $0x2dc] sm:$0xf]  ;;  %v3279_v5 = vpop.f32.mrf.mxu2  ;;  %v3292_v6 = vpop.f32.mrf.mxu3 }
 0x3cc   :  { %v6240_v63 = vld [vmem:[#allocation10 + $0x2f8] sm:$0xf0] }
 0x3cd   :  { %3535 = vmatpush.bf16.msrb.mxu2 %v6399_v22  ;;  %3548 = vmatpush.bf16.msrb.mxu3 %v6655_v23  ;;  %v6243_v11 = vor.u32 %v7631_v62, %v6240_v63  ;;  %v6208_v17 = vld [vmem:[#allocation10 + $0x2b8] sm:$0xf0]  ;;  %v3226_v63 = vadd.f32 %v8743_v27, %v8739_v49 }
 0x3ce   :  { %v7695_v18 = vld [vmem:[#allocation10 + $0x4dc] sm:$0xf]  ;;  %v6211_v24 = vor.u32 %v7623_v16, %v6208_v17 }
 0x3cf   :  { %3555 = vmatpush.bf16.msra.mxu0 %v6083_v19  ;;  %3568 = vmatpush.bf16.msra.mxu1 %v6339_v21  ;;  %v6496_v2 = vld [vmem:[#allocation10 + $0x4f8] sm:$0xf0]  ;;  %v3305_v22 = vpop.f32.mrf.mxu0  ;;  %v3318_v23 = vpop.f32.mrf.mxu1 }
 0x3d0   :  { %3536 = vmatmul.bf16.vlgmr.msrb.gmra.mxu2 %v8715_v9  ;;  %3549 = vmatmul.bf16.vlgmr.msrb.gmra.mxu3 %v8717_v10  ;;  %v7759_v19 = vld [vmem:[#allocation10 + $0x6dc] sm:$0xf]  ;;  %v6499_v29 = vor.u32 %v7695_v18, %v6496_v2 }
 0x3d1   :  { %3580 = vmatpush.bf16.msra.mxu2 %v6627_v25  ;;  %3593 = vmatpush.bf16.msra.mxu3 %v6883_v26  ;;  %v6752_v21 = vld [vmem:[#allocation10 + $0x6f8] sm:$0xf0] }
 0x3d2   :  { %v7551_v25 = vld [vmem:[#allocation10 + $0x5c] sm:$0xf]  ;;  %v6755_v30 = vor.u32 %v7759_v19, %v6752_v21 }
 0x3d3   :  { %3556 = vmatpush.bf16.msra.mxu0 %v6051_v37  ;;  %3569 = vmatpush.bf16.msra.mxu1 %v6307_v38  ;;  %v5920_v26 = vld [vmem:[#allocation10 + $0x78] sm:$0xf0]  ;;  %v3329_v39 = vpop.f32.mrf.mxu2  ;;  %v8763_v42 = vpop.f32.mrf.mxu3 }
 0x3d4   :  { %v7615_v31 = vld [vmem:[#allocation10 + $0x25c] sm:$0xf] }
 0x3d5   :  { %3581 = vmatpush.bf16.msra.mxu2 %v6595_v43  ;;  %3594 = vmatpush.bf16.msra.mxu3 %v6851_v46  ;;  %v6176_v32 = vld [vmem:[#allocation10 + $0x278] sm:$0xf0]  ;;  %v5923_v43 = vor.u32 %v7551_v25, %v5920_v26  ;;  %v3652_v25 = vld [vmem:[%s10061_s7 + $0x170] sm:$0xff] }
 0x3d6   :  { %v7687_v34 = vld [vmem:[#allocation10 + $0x49c] sm:$0xf]  ;;  %v6179_v46 = vor.u32 %v7615_v31, %v6176_v32  ;;  %v3668_v26 = vld [vmem:[%s10061_s7 + $0x1f0] sm:$0xff] }
 0x3d7   :  { %3557 = vmatpush.bf16.msra.mxu0 %v6019_v57  ;;  %3570 = vmatpush.bf16.msra.mxu1 %v6275_v58  ;;  %v6464_v35 = vld [vmem:[#allocation10 + $0x4b8] sm:$0xf0]  ;;  %v3632_v31 = vld [vmem:[%s10061_s7 + $0xd0] sm:$0xff] }
 0x3d8   :  { %v7751_v37 = vld [vmem:[#allocation10 + $0x69c] sm:$0xf]  ;;  %v6467_v48 = vor.u32 %v7687_v34, %v6464_v35  ;;  %v3651_v34 = vld [vmem:[%s10061_s7 + $0x168] sm:$0xff] }
 0x3d9   :  { %3582 = vmatpush.bf16.msra.mxu2 %v6563_v61  ;;  %3595 = vmatpush.bf16.msra.mxu3 %v6819_v56  ;;  %v6720_v38 = vld [vmem:[#allocation10 + $0x6b8] sm:$0xf0]  ;;  %v3265_v61 = vadd.f32 %v8749_v20, %v8747_v44 }
 0x3da   :  { %v7543_v47 = vld [vmem:[#allocation10 + $0x1c] sm:$0xf]  ;;  %v6723_v50 = vor.u32 %v7751_v37, %v6720_v38  ;;  %v3615_v37 = vld [vmem:[%s10061_s7 + $0x48] sm:$0xff] }
 0x3db   :  { %3558 = vmatpush.bf16.msra.mxu0 %v5987_v8  ;;  %3571 = vmatpush.bf16.msra.mxu1 %v6243_v11  ;;  %v5888_v51 = vld [vmem:[#allocation10 + $0x38] sm:$0xf0]  ;;  %v3278_v7 = vadd.f32 %v8753_v40, %v3265_v61  ;;  %v3331_v5 = vpop.f32.mrf.mxu2  ;;  %v3344_v6 = vpop.f32.mrf.mxu3  ;;  %v8777_v40 = vadd.f32 %v8745_v28, %v3226_v63  ;;  %v3620_v11 = vld [vmem:[%s10061_s7 + $0x70] sm:$0xff]  ;;  %v3619_v28 = vld [vmem:[%s10061_s7 + $0x68] sm:$0xff] }
 0x3dc   :  { %v7607_v52 = vld [vmem:[#allocation10 + $0x21c] sm:$0xf]  ;;  %v5891_v56 = vor.u32 %v7543_v47, %v5888_v51  ;;  %v3631_v38 = vld [vmem:[%s10061_s7 + $0xc8] sm:$0xff]  ;;  %v3614_v47 = vld [vmem:[%s10061_s7 + $0x40] sm:$0xff] }
 0x3dd   :  { %3583 = vmatpush.bf16.msra.mxu2 %v6531_v14  ;;  %3596 = vmatpush.bf16.msra.mxu3 %v6787_v15  ;;  %v6144_v53 = vld [vmem:[#allocation10 + $0x238] sm:$0xf0]  ;;  %v8786_v13 = vadd.f32 %v8755_v36, %v3278_v7  ;;  %v3317_v14 = vadd.f32 %v8761_v55, %v8759_v54  ;;  %v3635_v15 = vld [vmem:[%s10061_s7 + $0xe8] sm:$0xff]  ;;  %v3846_v54 = vmul.f32 %v8777_v40, %v8777_v40  ;;  %v3798_v32 = vrot.slane %v8777_v40, 4  ;;  %v3664_v63 = vld [vmem:[%s10061_s7 + $0x1d0] sm:$0xff] }
 0x3de   :  { %v7679_v57 = vld [vmem:[#allocation10 + $0x45c] sm:$0xf]  ;;  %v6147_v62 = vor.u32 %v7607_v52, %v6144_v53  ;;  %v3647_v5 = vld [vmem:[%s10061_s7 + $0x148] sm:$0xff] }
 0x3df   :  { %3559 = vmatpush.bf16.msra.mxu0 %v5955_v3  ;;  %3572 = vmatpush.bf16.msra.mxu1 %v6211_v24  ;;  %v6432_v58 = vld [vmem:[#allocation10 + $0x478] sm:$0xf0]  ;;  %v3330_v17 = vadd.f32 %v3329_v39, %v3317_v14  ;;  %v3847_v55 = vmul.f32 %v8786_v13, %v8786_v13  ;;  %v3854_v24 = vrot.slane %v3846_v54, 4  ;;  %v3663_v6 = vld [vmem:[%s10061_s7 + $0x1c8] sm:$0xff] }
 0x3e0   :  { %v7743_v59 = vld [vmem:[#allocation10 + $0x65c] sm:$0xf]  ;;  %v6435_v44 = vor.u32 %v7679_v57, %v6432_v58 }
 0x3e1   :  { %3584 = vmatpush.bf16.msra.mxu2 %v6499_v29  ;;  %3597 = vmatpush.bf16.msra.mxu3 %v6755_v30  ;;  %v6688_v60 = vld [vmem:[#allocation10 + $0x678] sm:$0xf0]  ;;  %v8815_v19 = vadd.f32 %v8763_v42, %v3330_v17  ;;  %v3860_v29 = vrot.slane %v3847_v55, 4  ;;  %v3616_v30 = vld [vmem:[%s10061_s7 + $0x50] sm:$0xff]  ;;  %v3855_v39 = vadd.f32 %v3854_v24, %v3846_v54  ;;  %v3650_v42 = vld [vmem:[%s10061_s7 + $0x160] sm:$0xff] }
 0x3e2   :  { %v3621_v0 = vld [vmem:[%s10061_s7 + $0x78] sm:$0xff]  ;;  %v6691_v20 = vor.u32 %v7743_v59, %v6688_v60  ;;  %v3610_v54 = vld [vmem:[%s10061_s7 + $0x20] sm:$0xff] }
 0x3e3   :  { %3560 = vmatpush.bf16.msra.mxu0 %v5923_v43  ;;  %3573 = vmatpush.bf16.msra.mxu1 %v6179_v46  ;;  %v3637_v1 = vld [vmem:[%s10061_s7 + $0xf8] sm:$0xff]  ;;  %v3848_v35 = vmul.f32 %v8815_v19, %v8815_v19  ;;  %v3666_v43 = vld [vmem:[%s10061_s7 + $0x1e0] sm:$0xff]  ;;  %v3861_v46 = vadd.f32 %v3860_v29, %v3847_v55  ;;  %v3644_v29 = vld [vmem:[%s10061_s7 + $0x130] sm:$0xff] }
 0x3e4   :  { %v7671_v4 = vld [vmem:[#allocation10 + $0x41c] sm:$0xf] }
 0x3e5   :  { %3585 = vmatpush.bf16.msra.mxu2 %v6467_v48  ;;  %3598 = vmatpush.bf16.msra.mxu3 %v6723_v50  ;;  %v6400_v49 = vld [vmem:[#allocation10 + $0x438] sm:$0xf0]  ;;  %v3630_v48 = vld [vmem:[%s10061_s7 + $0xc0] sm:$0xff]  ;;  %v3799_v50 = vadd.f32 %v3798_v32, %v8777_v40  ;;  %v3866_v57 = vrot.slane %v3848_v35, 4  ;;  %v3862_v7 = vrot.slane %v3861_v46, 2 }
 0x3e6   :  { %v7735_v27 = vld [vmem:[#allocation10 + $0x61c] sm:$0xf]  ;;  %v6403_v16 = vor.u32 %v7671_v4, %v6400_v49 }
 0x3e7   :  { %3561 = vmatpush.bf16.msra.mxu0 %v5891_v56  ;;  %3574 = vmatpush.bf16.msra.mxu1 %v6147_v62  ;;  %v6656_v8 = vld [vmem:[#allocation10 + $0x638] sm:$0xf0]  ;;  %v3355_v23 = vpop.f32.mrf.mxu0  ;;  %v3368_v3 = vpop.f32.mrf.mxu1  ;;  %v3856_v56 = vrot.slane %v3855_v39, 2  ;;  %v3648_v62 = vld [vmem:[%s10061_s7 + $0x150] sm:$0xff] }
 0x3e8   :  { %v6659_v36 = vor.u32 %v7735_v27, %v6656_v8  ;;  %v3653_v18 = vld [vmem:[%s10061_s7 + $0x178] sm:$0xff]  ;;  %v3369_v4 = vadd.f32 %v3368_v3, %v3355_v23  ;;  %v3867_v27 = vadd.f32 %v3866_v57, %v3848_v35  ;;  %v3611_v8 = vld [vmem:[%s10061_s7 + $0x28] sm:$0xff]  ;;  %v3642_v57 = vld [vmem:[%s10061_s7 + $0x120] sm:$0xff] }
 0x3e9   :  { %3586 = vmatpush.bf16.msra.mxu2 %v6435_v44  ;;  %3599 = vmatpush.bf16.msra.mxu3 %v6691_v20  ;;  %v3669_v2 = vld [vmem:[%s10061_s7 + $0x1f8] sm:$0xff]  ;;  %v3628_v44 = vld [vmem:[%s10061_s7 + $0xb0] sm:$0xff]  ;;  %v3800_v20 = vrot.slane %v3799_v50, 2 }
 0x3ea   :  { %3562 = vmatmul.bf16.vlgmr.msra.gmra.mxu0 %v8707_v45  ;;  %3575 = vmatmul.bf16.vlgmr.msra.gmra.mxu1 %v8709_v33  ;;  %v3618_v45 = vld [vmem:[%s10061_s7 + $0x60] sm:$0xff]  ;;  %v3617_v21 = vld [vmem:[%s10061_s7 + $0x58] sm:$0xff]  ;;  %v3868_v23 = vrot.slane %v3867_v27, 2 }
 0x3eb   :  { %3910 = vmatpush.msrb.mxu0 %v3621_v0  ;;  %3930 = vmatpush.msrb.mxu1 %v3637_v1  ;;  %v3634_v33 = vld [vmem:[%s10061_s7 + $0xe0] sm:$0xff]  ;;  %v3633_v22 = vld [vmem:[%s10061_s7 + $0xd8] sm:$0xff]  ;;  %v3810_v0 = vrot.slane %v8815_v19, 4  ;;  %v3612_v1 = vld [vmem:[%s10061_s7 + $0x30] sm:$0xff]  ;;  %v3801_v55 = vadd.f32 %v3800_v20, %v3799_v50 }
 0x3ec   :  { %v3649_v51 = vld [vmem:[%s10061_s7 + $0x158] sm:$0xff] }
 0x3ed   :  { %3911 = vmatpush.msrb.mxu0 %v3620_v11  ;;  %3931 = vmatpush.msrb.mxu1 %v3636_v12  ;;  %v3665_v52 = vld [vmem:[%s10061_s7 + $0x1d8] sm:$0xff]  ;;  %v3627_v11 = vld [vmem:[%s10061_s7 + $0xa8] sm:$0xff]  ;;  %v3811_v17 = vadd.f32 %v3810_v0, %v8815_v19 }
 0x3ee   :  { %3587 = vmatpush.bf16.msra.mxu2 %v6403_v16  ;;  %3600 = vmatpush.bf16.msra.mxu3 %v6659_v36  ;;  %v3613_v58 = vld [vmem:[%s10061_s7 + $0x38] sm:$0xff]  ;;  %v3662_v16 = vld [vmem:[%s10061_s7 + $0x1c0] sm:$0xff]  ;;  %v3857_v36 = vadd.f32 %v3856_v56, %v3855_v39  ;;  %v3802_v39 = vrot.slane %v3801_v55, 1 }
 0x3ef   :  { %3912 = vmatpush.msrb.mxu0 %v3619_v28  ;;  %3932 = vmatpush.msrb.mxu1 %v3635_v15  ;;  %v3629_v59 = vld [vmem:[%s10061_s7 + $0xb8] sm:$0xff]  ;;  %v3357_v60 = vpop.f32.mrf.mxu0  ;;  %v3370_v61 = vpop.f32.mrf.mxu1  ;;  %v3646_v28 = vld [vmem:[%s10061_s7 + $0x140] sm:$0xff]  ;;  %v3812_v32 = vrot.slane %v3811_v17, 2 }
 0x3f0   :  { %v3609_v3 = vld [vmem:[%s10061_s7 + $0x18] sm:$0xff]  ;;  %v3606_v61 = vld [vmem:[%s10061_s7] sm:$0xff] }
 0x3f1   :  { %3913 = vmatpush.msrb.mxu0 %v3618_v45  ;;  %3933 = vmatpush.msrb.mxu1 %v3634_v33  ;;  %v3626_v45 = vld [vmem:[%s10061_s7 + $0xa0] sm:$0xff]  ;;  %v3863_v33 = vadd.f32 %v3862_v7, %v3861_v46  ;;  %v3625_v24 = vld [vmem:[%s10061_s7 + $0x98] sm:$0xff]  ;;  %v3623_v46 = vld [vmem:[%s10061_s7 + $0x88] sm:$0xff]  ;;  %v3813_v60 = vadd.f32 %v3812_v32, %v3811_v17 }
 0x3f2   :  { %3950 = vmatpush.msrb.mxu2 %v3653_v18  ;;  %3970 = vmatpush.msrb.mxu3 %v3669_v2  ;;  %v3645_v18 = vld [vmem:[%s10061_s7 + $0x138] sm:$0xff]  ;;  %v3622_v56 = vld [vmem:[%s10061_s7 + $0x80] sm:$0xff]  ;;  %v3655_v17 = vld [vmem:[%s10061_s7 + $0x188] sm:$0xff] }
 0x3f3   :  { %3588 = vmatmul.bf16.vlgmr.msra.gmra.mxu2 %v8715_v9  ;;  %3601 = vmatmul.bf16.vlgmr.msra.gmra.mxu3 %v8717_v10  ;;  %v3667_v9 = vld [vmem:[%s10061_s7 + $0x1e8] sm:$0xff]  ;;  %v3804_v10 = vrot.slane %v8786_v13, 4  ;;  %v3381_v12 = vpop.f32.mrf.mxu2  ;;  %v3394_v14 = vpop.f32.mrf.mxu3  ;;  %v3641_v0 = vld [vmem:[%s10061_s7 + $0x118] sm:$0xff]  ;;  %v3680_v32 = vld [vmem:[%s10061_s7 + $0x250] sm:$0xff] }
 0x3f4   :  { %3914 = vmatpush.msrb.mxu0 %v3617_v21  ;;  %3934 = vmatpush.msrb.mxu1 %v3633_v22  ;;  %v3382_v15 = vadd.f32 %v3381_v12, %v3369_v4  ;;  %v3661_v21 = vld [vmem:[%s10061_s7 + $0x1b8] sm:$0xff]  ;;  %v3814_v12 = vrot.slane %v3813_v60, 1 }
 0x3f5   :  { %3951 = vmatpush.msrb.mxu2 %v3652_v25  ;;  %3971 = vmatpush.msrb.mxu3 %v3668_v26  ;;  %v3805_v53 = vadd.f32 %v3804_v10, %v8786_v13  ;;  %v3864_v10 = vrot.slane %v3863_v33, 1  ;;  %v3657_v20 = vld [vmem:[%s10061_s7 + $0x198] sm:$0xff] }
 0x3f6   :  { %3915 = vmatpush.msrb.mxu0 %v3616_v30  ;;  %3935 = vmatpush.msrb.mxu1 %v3632_v31  ;;  %v8920_v2 = vadd.f32 %v3394_v14, %v3382_v15  ;;  %v3660_v30 = vld [vmem:[%s10061_s7 + $0x1b0] sm:$0xff]  ;;  %v3858_v31 = vrot.slane %v3857_v36, 1 }
 0x3f7   :  { %3952 = vmatpush.msrb.mxu2 %v3651_v34  ;;  %3972 = vmatpush.msrb.mxu3 %v3667_v9  ;;  %v3806_v49 = vrot.slane %v3805_v53, 2  ;;  %v3608_v34 = vld [vmem:[%s10061_s7 + $0x10] sm:$0xff] }
 0x3f8   :  { %3916 = vmatpush.msrb.mxu0 %v3615_v37  ;;  %3936 = vmatpush.msrb.mxu1 %v3631_v38  ;;  %v3816_v25 = vrot.slane %v8920_v2, 4  ;;  %v3849_v26 = vmul.f32 %v8920_v2, %v8920_v2  ;;  %v3624_v9 = vld [vmem:[%s10061_s7 + $0x90] sm:$0xff]  ;;  %v3643_v38 = vld [vmem:[%s10061_s7 + $0x128] sm:$0xff] }
 0x3f9   :  { %3953 = vmatpush.msrb.mxu2 %v3650_v42  ;;  %3973 = vmatpush.msrb.mxu3 %v3666_v43  ;;  %v3807_v22 = vadd.f32 %v3806_v49, %v3805_v53  ;;  %v3659_v42 = vld [vmem:[%s10061_s7 + $0x1a8] sm:$0xff]  ;;  %v3685_v49 = vld [vmem:[%s10061_s7 + $0x278] sm:$0xff]  ;;  %v3656_v14 = vld [vmem:[%s10061_s7 + $0x190] sm:$0xff] }
 0x3fa   :  { %3917 = vmatpush.msrb.mxu0 %v3614_v47  ;;  %3937 = vmatpush.msrb.mxu1 %v3630_v48  ;;  %v3817_v35 = vadd.f32 %v3816_v25, %v8920_v2  ;;  %v3872_v37 = vrot.slane %v3849_v26, 4  ;;  %v3607_v43 = vld [vmem:[%s10061_s7 + $0x8] sm:$0xff]  ;;  %v3682_v25 = vld [vmem:[%s10061_s7 + $0x260] sm:$0xff] }
 0x3fb   :  { %3954 = vmatpush.msrb.mxu2 %v3649_v51  ;;  %3974 = vmatpush.msrb.mxu3 %v3665_v52  ;;  %v3383_v47 = vpop.f32.mrf.mxu2  ;;  %v3396_v48 = vpop.f32.mrf.mxu3  ;;  %v3808_v50 = vrot.slane %v3807_v22, 1  ;;  %v3869_v51 = vadd.f32 %v3868_v23, %v3867_v27 }
 0x3fc   :  { %3918 = vmatpush.msrb.mxu0 %v3613_v58  ;;  %3938 = vmatpush.msrb.mxu1 %v3629_v59  ;;  %v3818_v52 = vrot.slane %v3817_v35, 2  ;;  %v3873_v53 = vadd.f32 %v3872_v37, %v3849_v26  ;;  %v3859_v58 = vadd.f32 %v3858_v31, %v3857_v36  ;;  %v3658_v59 = vld [vmem:[%s10061_s7 + $0x1a0] sm:$0xff]  ;;  %v3699_v31 = vld [vmem:[%s10061_s7 + $0x2e8] sm:$0xff]  ;;  %v3697_v37 = vld [vmem:[%s10061_s7 + $0x2d8] sm:$0xff] }
 0x3fd   :  { %3955 = vmatpush.msrb.mxu2 %v3648_v62  ;;  %3975 = vmatpush.msrb.mxu3 %v3664_v63  ;;  %v3865_v62 = vadd.f32 %v3864_v10, %v3863_v33  ;;  %v3870_v4 = vrot.slane %v3869_v51, 1 }
 0x3fe   :  { %3919 = vmatpush.msrb.mxu0 %v3612_v1  ;;  %3939 = vmatpush.msrb.mxu1 %v3628_v44  ;;  %v3819_v63 = vadd.f32 %v3818_v52, %v3817_v35  ;;  %v3874_v7 = vrot.slane %v3873_v53, 2  ;;  %v3803_v1 = vadd.f32 %v3802_v39, %v3801_v55  ;;  %v3809_v44 = vadd.f32 %v3808_v50, %v3807_v22  ;;  %v3683_v55 = vld [vmem:[%s10061_s7 + $0x268] sm:$0xff]  ;;  %v3696_v39 = vld [vmem:[%s10061_s7 + $0x2d0] sm:$0xff] }
 0x3ff   :  { %3956 = vmatpush.msrb.mxu2 %v3647_v5  ;;  %3976 = vmatpush.msrb.mxu3 %v3663_v6  ;;  %v3640_v6 = vld [vmem:[%s10061_s7 + $0x110] sm:$0xff]  ;;  %v3871_v36 = vadd.f32 %v3870_v4, %v3869_v51  ;;  %v3675_v52 = vld [vmem:[%s10061_s7 + $0x228] sm:$0xff] }
 0x400   :  { %3920 = vmatpush.msrb.mxu0 %v3611_v8  ;;  %3940 = vmatpush.msrb.mxu1 %v3627_v11  ;;  %v3902_v5 = vsel %vm1440_vm1, %v3803_v1, %v3859_v58  ;;  %v3820_v27 = vrot.slane %v3819_v63, 1  ;;  %v3875_v8 = vadd.f32 %v3874_v7, %v3873_v53  ;;  %v3903_v11 = vsel %vm1440_vm1, %v3809_v44, %v3865_v62  ;;  %v3676_v50 = vld [vmem:[%s10061_s7 + $0x230] sm:$0xff]  ;;  %v3695_v53 = vld [vmem:[%s10061_s7 + $0x2c8] sm:$0xff]  ;;  %v3673_v62 = vld [vmem:[%s10061_s7 + $0x218] sm:$0xff] }
 0x401   :  { %3957 = vmatpush.msrb.mxu2 %v3646_v28  ;;  %3977 = vmatpush.msrb.mxu3 %v3662_v16  ;;  %v3639_v28 = vld [vmem:[%s10061_s7 + $0x108] sm:$0xff]  ;;  %v3684_v16 = vld [vmem:[%s10061_s7 + $0x270] sm:$0xff] }
 0x402   :  { %3921 = vmatpush.msrb.mxu0 %v3610_v54  ;;  %3941 = vmatpush.msrb.mxu1 %v3626_v45  ;;  %v3876_v15 = vrot.slane %v3875_v8, 1  ;;  %v3638_v54 = vld [vmem:[%s10061_s7 + $0x100] sm:$0xff]  ;;  %v3821_v45 = vadd.f32 %v3820_v27, %v3819_v63  ;;  %v3693_v63 = vld [vmem:[%s10061_s7 + $0x2b8] sm:$0xff]  ;;  %v3692_v4 = vld [vmem:[%s10061_s7 + $0x2b0] sm:$0xff] }
 0x403   :  { %3958 = vmatpush.msrb.mxu2 %v3645_v18  ;;  %3978 = vmatpush.msrb.mxu3 %v3661_v21  ;;  %v3701_v18 = vld [vmem:[%s10061_s7 + $0x2f8] sm:$0xff]  ;;  %v3815_v21 = vadd.f32 %v3814_v12, %v3813_v60  ;;  %v3694_v60 = vld [vmem:[%s10061_s7 + $0x2c0] sm:$0xff]  ;;  %v3671_v27 = vld [vmem:[%s10061_s7 + $0x208] sm:$0xff] }
 0x404   :  { %3922 = vmatpush.msrb.mxu0 %v3609_v3  ;;  %3942 = vmatpush.msrb.mxu1 %v3625_v24  ;;  %v3877_v33 = vadd.f32 %v3876_v15, %v3875_v8  ;;  %v3654_v3 = vld [vmem:[%s10061_s7 + $0x180] sm:$0xff] }
 0x405   :  { %3959 = vmatpush.msrb.mxu2 %v3644_v29  ;;  %3979 = vmatpush.msrb.mxu3 %v3660_v30  ;;  %v3904_v26 = vsel %vm1440_vm1, %v3815_v21, %v3871_v36  ;;  %v3700_v29 = vld [vmem:[%s10061_s7 + $0x2f0] sm:$0xff]  ;;  %v3681_v30 = vld [vmem:[%s10061_s7 + $0x258] sm:$0xff]  ;;  %v3690_v8 = vld [vmem:[%s10061_s7 + $0x2a0] sm:$0xff] }
 0x406   :  { %3923 = vmatpush.msrb.mxu0 %v3608_v34  ;;  %3943 = vmatpush.msrb.mxu1 %v3624_v9  ;;  %v3905_v24 = vsel %vm1440_vm1, %v3821_v45, %v3877_v33  ;;  %v3698_v34 = vld [vmem:[%s10061_s7 + $0x2e0] sm:$0xff]  ;;  %v3679_v9 = vld [vmem:[%s10061_s7 + $0x248] sm:$0xff]  ;;  %v3717_v45 = vld [vmem:[%s10061_s7 + $0x378] sm:$0xff] }
 0x407   :  { %3960 = vmatpush.msrb.mxu2 %v3643_v38  ;;  %3980 = vmatpush.msrb.mxu3 %v3659_v42  ;;  %v3407_v22 = vpop.f32.mrf.mxu0  ;;  %v3420_v23 = vpop.f32.mrf.mxu1  ;;  %v3678_v38 = vld [vmem:[%s10061_s7 + $0x240] sm:$0xff] }
 0x408   :  { %3924 = vmatpush.msrb.mxu0 %v3607_v43  ;;  %3944 = vmatpush.msrb.mxu1 %v3623_v46  ;;  %v3421_v42 = vadd.f32 %v3420_v23, %v3407_v22  ;;  %v3677_v43 = vld [vmem:[%s10061_s7 + $0x238] sm:$0xff]  ;;  %v3686_v22 = vld [vmem:[%s10061_s7 + $0x280] sm:$0xff]  ;;  %v3715_v23 = vld [vmem:[%s10061_s7 + $0x368] sm:$0xff] }
 0x409   :  { %3961 = vmatpush.msrb.mxu2 %v3642_v57  ;;  %3981 = vmatpush.msrb.mxu3 %v3658_v59  ;;  %v3674_v59 = vld [vmem:[%s10061_s7 + $0x220] sm:$0xff] }
 0x40a   :  { %3925 = vmatpush.msrb.mxu0 %v3606_v61  ;;  %3945 = vmatpush.msrb.mxu1 %v3622_v56 }
 0x40b   :  { %3962 = vmatpush.msrb.mxu2 %v3641_v0  ;;  %3926 = vmatmul.f32.vlgmr.msrb.gmra.mxu0 %v3902_v5  ;;  %v3691_v5 = vld [vmem:[%s10061_s7 + $0x2a8] sm:$0xff] }
 0x40c   :  { %3946 = vmatmul.f32.vlgmr.msrb.gmra.mxu1 %v3903_v11  ;;  %3982 = vmatpush.msrb.mxu3 %v3657_v20  ;;  %v3672_v20 = vld [vmem:[%s10061_s7 + $0x210] sm:$0xff]  ;;  %v3670_v11 = vld [vmem:[%s10061_s7 + $0x200] sm:$0xff] }
 0x40d   :  { %3963 = vmatpush.msrb.mxu2 %v3640_v6  ;;  %3990 = vmatpush.msra.mxu0 %v3685_v49 }
 0x40e   :  { %3983 = vmatpush.msrb.mxu3 %v3656_v14  ;;  %4010 = vmatpush.msra.mxu1 %v3701_v18  ;;  %v3716_v18 = vld [vmem:[%s10061_s7 + $0x370] sm:$0xff] }
 0x40f   :  { %3964 = vmatpush.msrb.mxu2 %v3639_v28  ;;  %3991 = vmatpush.msra.mxu0 %v3684_v16  ;;  %v3409_v10 = vpop.f32.mrf.mxu0  ;;  %v3422_v35 = vpop.f32.mrf.mxu1  ;;  %v3689_v28 = vld [vmem:[%s10061_s7 + $0x298] sm:$0xff]  ;;  %v3688_v16 = vld [vmem:[%s10061_s7 + $0x290] sm:$0xff] }
 0x410   :  { %3984 = vmatpush.msrb.mxu3 %v3655_v17  ;;  %4011 = vmatpush.msra.mxu1 %v3700_v29  ;;  %v3712_v29 = vld [vmem:[%s10061_s7 + $0x350] sm:$0xff]  ;;  %v3710_v35 = vld [vmem:[%s10061_s7 + $0x340] sm:$0xff] }
 0x411   :  { %3965 = vmatpush.msrb.mxu2 %v3638_v54  ;;  %3992 = vmatpush.msra.mxu0 %v3683_v55  ;;  %v3687_v54 = vld [vmem:[%s10061_s7 + $0x288] sm:$0xff] }
 0x412   :  { %3966 = vmatmul.f32.vlgmr.msrb.gmra.mxu2 %v3904_v26  ;;  %3985 = vmatpush.msrb.mxu3 %v3654_v3  ;;  %v3714_v3 = vld [vmem:[%s10061_s7 + $0x360] sm:$0xff] }
 0x413   :  { %3986 = vmatmul.f32.vlgmr.msrb.gmra.mxu3 %v3905_v24  ;;  %3993 = vmatpush.msra.mxu0 %v3682_v25  ;;  %v3433_v46 = vpop.f32.mrf.mxu2  ;;  %v3446_v47 = vpop.f32.mrf.mxu3  ;;  %v3713_v24 = vld [vmem:[%s10061_s7 + $0x358] sm:$0xff] }
 0x414   :  { %4012 = vmatpush.msra.mxu1 %v3699_v31  ;;  %v3434_v48 = vadd.f32 %v3433_v46, %v3421_v42  ;;  %4030 = vmatpush.msra.mxu2 %v3717_v45 }
 0x415   :  { %3994 = vmatpush.msra.mxu0 %v3681_v30 }
 0x416   :  { %4013 = vmatpush.msra.mxu1 %v3698_v34  ;;  %v9051_v51 = vadd.f32 %v3446_v47, %v3434_v48  ;;  %4031 = vmatpush.msra.mxu2 %v3716_v18  ;;  %v3708_v48 = vld [vmem:[%s10061_s7 + $0x330] sm:$0xff] }
 0x417   :  { %3995 = vmatpush.msra.mxu0 %v3680_v32 }
 0x418   :  { %4014 = vmatpush.msra.mxu1 %v3697_v37  ;;  %v3822_v57 = vrot.slane %v9051_v51, 4  ;;  %v3850_v58 = vmul.f32 %v9051_v51, %v9051_v51  ;;  %4032 = vmatpush.msra.mxu2 %v3715_v23 }
 0x419   :  { %3996 = vmatpush.msra.mxu0 %v3679_v9  ;;  %v3711_v9 = vld [vmem:[%s10061_s7 + $0x348] sm:$0xff] }
 0x41a   :  { %4015 = vmatpush.msra.mxu1 %v3696_v39  ;;  %v3823_v61 = vadd.f32 %v3822_v57, %v9051_v51  ;;  %v3878_v56 = vrot.slane %v3850_v58, 4  ;;  %4033 = vmatpush.msra.mxu2 %v3714_v3  ;;  %v3709_v39 = vld [vmem:[%s10061_s7 + $0x338] sm:$0xff]  ;;  %v3706_v57 = vld [vmem:[%s10061_s7 + $0x320] sm:$0xff]  ;;  %v3724_v3 = vld [vmem:[%s10061_s7 + $0x3b0] sm:$0xff] }
 0x41b   :  { %3997 = vmatpush.msra.mxu0 %v3678_v38  ;;  %v3435_v7 = vpop.f32.mrf.mxu2  ;;  %v3448_v0 = vpop.f32.mrf.mxu3 }
 0x41c   :  { %4016 = vmatpush.msra.mxu1 %v3695_v53  ;;  %v3824_v1 = vrot.slane %v3823_v61, 2  ;;  %v3879_v44 = vadd.f32 %v3878_v56, %v3850_v58  ;;  %4034 = vmatpush.msra.mxu2 %v3713_v24  ;;  %v3707_v53 = vld [vmem:[%s10061_s7 + $0x328] sm:$0xff] }
 0x41d   :  { %3998 = vmatpush.msra.mxu0 %v3677_v43 }
 0x41e   :  { %4017 = vmatpush.msra.mxu1 %v3694_v60  ;;  %v3825_v6 = vadd.f32 %v3824_v1, %v3823_v61  ;;  %v3880_v49 = vrot.slane %v3879_v44, 2  ;;  %4035 = vmatpush.msra.mxu2 %v3712_v29  ;;  %v3705_v60 = vld [vmem:[%s10061_s7 + $0x318] sm:$0xff]  ;;  %v3703_v1 = vld [vmem:[%s10061_s7 + $0x308] sm:$0xff] }
 0x41f   :  { %3999 = vmatpush.msra.mxu0 %v3676_v50 }
 0x420   :  { %4018 = vmatpush.msra.mxu1 %v3693_v63  ;;  %v3826_v12 = vrot.slane %v3825_v6, 1  ;;  %v3881_v14 = vadd.f32 %v3880_v49, %v3879_v44  ;;  %4036 = vmatpush.msra.mxu2 %v3711_v9  ;;  %v3733_v44 = vld [vmem:[%s10061_s7 + $0x3f8] sm:$0xff] }
 0x421   :  { %4000 = vmatpush.msra.mxu0 %v3675_v52  ;;  %4050 = vmatpush.msra.mxu3 %v3733_v44  ;;  %v3721_v9 = vld [vmem:[%s10061_s7 + $0x398] sm:$0xff] }
 0x422   :  { %4019 = vmatpush.msra.mxu1 %v3692_v4  ;;  %v3882_v15 = vrot.slane %v3881_v14, 1  ;;  %v3827_v36 = vadd.f32 %v3826_v12, %v3825_v6  ;;  %4037 = vmatpush.msra.mxu2 %v3710_v35  ;;  %v3732_v6 = vld [vmem:[%s10061_s7 + $0x3f0] sm:$0xff] }
 0x423   :  { %4001 = vmatpush.msra.mxu0 %v3674_v59  ;;  %4051 = vmatpush.msra.mxu3 %v3732_v6  ;;  %v3728_v12 = vld [vmem:[%s10061_s7 + $0x3d0] sm:$0xff] }
 0x424   :  { %4020 = vmatpush.msra.mxu1 %v3691_v5  ;;  %v3883_v17 = vadd.f32 %v3882_v15, %v3881_v14  ;;  %4038 = vmatpush.msra.mxu2 %v3709_v39  ;;  %v3702_v5 = vld [vmem:[%s10061_s7 + $0x300] sm:$0xff] }
 0x425   :  { %4002 = vmatpush.msra.mxu0 %v3673_v62  ;;  %v3704_v62 = vld [vmem:[%s10061_s7 + $0x310] sm:$0xff] }
 0x426   :  { %4021 = vmatpush.msra.mxu1 %v3690_v8  ;;  %v3906_v21 = vsel %vm1440_vm1, %v3827_v36, %v3883_v17  ;;  %4039 = vmatpush.msra.mxu2 %v3708_v48  ;;  %v3730_v8 = vld [vmem:[%s10061_s7 + $0x3e0] sm:$0xff] }
 0x427   :  { %4003 = vmatpush.msra.mxu0 %v3672_v20  ;;  %v3459_v33 = vpop.f32.mrf.mxu0  ;;  %v3472_v55 = vpop.f32.mrf.mxu1 }
 0x428   :  { %4022 = vmatpush.msra.mxu1 %v3689_v28  ;;  %v3473_v30 = vadd.f32 %v3472_v55, %v3459_v33  ;;  %4040 = vmatpush.msra.mxu2 %v3707_v53  ;;  %v3726_v33 = vld [vmem:[%s10061_s7 + $0x3c0] sm:$0xff] }
 0x429   :  { %4004 = vmatpush.msra.mxu0 %v3671_v27  ;;  %v3731_v27 = vld [vmem:[%s10061_s7 + $0x3e8] sm:$0xff] }
 0x42a   :  { %4023 = vmatpush.msra.mxu1 %v3688_v16  ;;  %4041 = vmatpush.msra.mxu2 %v3706_v57 }
 0x42b   :  { %4005 = vmatpush.msra.mxu0 %v3670_v11  ;;  %4052 = vmatpush.msra.mxu3 %v3731_v27  ;;  %v3729_v11 = vld [vmem:[%s10061_s7 + $0x3d8] sm:$0xff] }
 0x42c   :  { %4006 = vmatmul.f32.vlgmr.msra.gmra.mxu0 %v3906_v21  ;;  %4024 = vmatpush.msra.mxu1 %v3687_v54  ;;  %v3727_v54 = vld [vmem:[%s10061_s7 + $0x3c8] sm:$0xff]  ;;  %v3725_v21 = vld [vmem:[%s10061_s7 + $0x3b8] sm:$0xff] }
 0x42d   :  { %4042 = vmatpush.msra.mxu2 %v3705_v60  ;;  %4053 = vmatpush.msra.mxu3 %v3730_v8 }
 0x42e   :  { %4025 = vmatpush.msra.mxu1 %v3686_v22 }
 0x42f   :  { %v3461_v25 = vpop.f32.mrf.mxu0  ;;  %v3474_v26 = vpop.f32.mrf.mxu1  ;;  %4043 = vmatpush.msra.mxu2 %v3704_v62  ;;  %4054 = vmatpush.msra.mxu3 %v3729_v11 }
 0x431   :  { %4044 = vmatpush.msra.mxu2 %v3703_v1  ;;  %4055 = vmatpush.msra.mxu3 %v3728_v12 }
 0x433   :  { %v3485_v31 = vpop.f32.mrf.mxu2  ;;  %v3498_v32 = vpop.f32.mrf.mxu3  ;;  %4045 = vmatpush.msra.mxu2 %v3702_v5  ;;  %4056 = vmatpush.msra.mxu3 %v3727_v54  ;;  %v3793_v54 = vld [vmem:[#allocation11 + $0x1d8] sm:$0xff] }
 0x434   :  { %v3486_v34 = vadd.f32 %v3485_v31, %v3473_v30  ;;  %v3723_v30 = vld [vmem:[%s10061_s7 + $0x3a8] sm:$0xff]  ;;  %v3722_v31 = vld [vmem:[%s10061_s7 + $0x3a0] sm:$0xff] }
 0x435   :  { %4057 = vmatpush.msra.mxu3 %v3726_v33  ;;  %v3782_v33 = vld [vmem:[#allocation11 + $0x180] sm:$0xff] }
 0x436   :  { %v9128_v10 = vadd.f32 %v3498_v32, %v3486_v34 }
 0x437   :  { %4058 = vmatpush.msra.mxu3 %v3725_v21 }
 0x438   :  { %v3828_v37 = vrot.slane %v9128_v10, 4  ;;  %v3851_v38 = vmul.f32 %v9128_v10, %v9128_v10 }
 0x439   :  { %4059 = vmatpush.msra.mxu3 %v3724_v3  ;;  %v3774_v3 = vld [vmem:[#allocation11 + $0x140] sm:$0xff] }
 0x43a   :  { %v3829_v42 = vadd.f32 %v3828_v37, %v9128_v10  ;;  %v3884_v43 = vrot.slane %v3851_v38, 4 }
 0x43b   :  { %v3487_v46 = vpop.f32.mrf.mxu2  ;;  %v3500_v47 = vpop.f32.mrf.mxu3  ;;  %4060 = vmatpush.msra.mxu3 %v3723_v30 }
 0x43c   :  { %v3830_v50 = vrot.slane %v3829_v42, 2  ;;  %v3885_v52 = vadd.f32 %v3884_v43, %v3851_v38  ;;  %v3720_v38 = vld [vmem:[%s10061_s7 + $0x390] sm:$0xff]  ;;  %v3719_v46 = vld [vmem:[%s10061_s7 + $0x388] sm:$0xff] }
 0x43d   :  { %4061 = vmatpush.msra.mxu3 %v3722_v31  ;;  %v3766_v31 = vld [vmem:[#allocation11 + $0x100] sm:$0xff] }
 0x43e   :  { %v3831_v58 = vadd.f32 %v3830_v50, %v3829_v42  ;;  %v3886_v59 = vrot.slane %v3885_v52, 2 }
 0x43f   :  { %4062 = vmatpush.msra.mxu3 %v3721_v9 }
 0x440   :  { %v3832_v61 = vrot.slane %v3831_v58, 1  ;;  %v3887_v56 = vadd.f32 %v3886_v59, %v3885_v52  ;;  %v3718_v52 = vld [vmem:[%s10061_s7 + $0x380] sm:$0xff] }
 0x441   :  { %4063 = vmatpush.msra.mxu3 %v3720_v38  ;;  %v3758_v38 = vld [vmem:[#allocation11 + $0xc0] sm:$0xff] }
 0x442   :  { %v3888_v63 = vrot.slane %v3887_v56, 1  ;;  %v3833_v7 = vadd.f32 %v3832_v61, %v3831_v58 }
 0x443   :  { %4064 = vmatpush.msra.mxu3 %v3719_v46  ;;  %v3761_v46 = vld [vmem:[#allocation11 + $0xd8] sm:$0xff] }
 0x444   :  { %v3889_v0 = vadd.f32 %v3888_v63, %v3887_v56 }
 0x445   :  { %4065 = vmatpush.msra.mxu3 %v3718_v52  ;;  %v3752_v52 = vld [vmem:[#allocation11 + $0x90] sm:$0xff] }
 0x446   :  { %v3907_v49 = vsel %vm1440_vm1, %v3833_v7, %v3889_v0 }
 0x447   :  { %v3511_v20 = vpop.f32.mrf.mxu0  ;;  %v3524_v4 = vpop.f32.mrf.mxu1  ;;  %4026 = vmatmul.f32.vlgmr.msra.gmra.mxu1 %v3907_v49  ;;  %4167 = vmatpush.msrb.mxu3 %v3793_v54  ;;  %v3781_v54 = vld [vmem:[#allocation11 + $0x178] sm:$0xff] }
 0x448   :  { %v3525_v15 = vadd.f32 %v3524_v4, %v3511_v20 }
 0x44f   :  { %v3513_v14 = vpop.f32.mrf.mxu0  ;;  %v3526_v28 = vpop.f32.mrf.mxu1 }
 0x453   :  { %v3537_v16 = vpop.f32.mrf.mxu2  ;;  %v3550_v36 = vpop.f32.mrf.mxu3 }
 0x454   :  { %v3538_v17 = vadd.f32 %v3537_v16, %v3525_v15  ;;  %v3790_v15 = vld [vmem:[#allocation11 + $0x1c0] sm:$0xff]  ;;  %v3791_v16 = vld [vmem:[#allocation11 + $0x1c8] sm:$0xff] }
 0x455   :  { %4107 = vmatpush.msrb.mxu0 %v3790_v15  ;;  %4127 = vmatpush.msrb.mxu1 %v3791_v16  ;;  %v3778_v15 = vld [vmem:[#allocation11 + $0x160] sm:$0xff]  ;;  %v3779_v16 = vld [vmem:[#allocation11 + $0x168] sm:$0xff] }
 0x456   :  { %v9184_v45 = vadd.f32 %v3550_v36, %v3538_v17  ;;  %v3792_v36 = vld [vmem:[#allocation11 + $0x1d0] sm:$0xff] }
 0x457   :  { %4147 = vmatpush.msrb.mxu2 %v3792_v36  ;;  %4108 = vmatpush.msrb.mxu0 %v3782_v33  ;;  %v3780_v36 = vld [vmem:[#allocation11 + $0x170] sm:$0xff]  ;;  %v3770_v33 = vld [vmem:[#allocation11 + $0x120] sm:$0xff] }
 0x458   :  { %v3834_v55 = vrot.slane %v9184_v45, 4  ;;  %v3852_v18 = vmul.f32 %v9184_v45, %v9184_v45 }
 0x459   :  { %4109 = vmatpush.msrb.mxu0 %v3774_v3  ;;  %v3763_v3 = vld [vmem:[#allocation11 + $0xe8] sm:$0xff] }
 0x45a   :  { %v3835_v22 = vadd.f32 %v3834_v55, %v9184_v45  ;;  %v3890_v23 = vrot.slane %v3852_v18, 4  ;;  %v3783_v55 = vld [vmem:[#allocation11 + $0x188] sm:$0xff] }
 0x45b   :  { %v3539_v24 = vpop.f32.mrf.mxu2  ;;  %v3552_v25 = vpop.f32.mrf.mxu3  ;;  %4128 = vmatpush.msrb.mxu1 %v3783_v55  ;;  %4110 = vmatpush.msrb.mxu0 %v3766_v31  ;;  %v3771_v55 = vld [vmem:[#allocation11 + $0x128] sm:$0xff]  ;;  %v3756_v31 = vld [vmem:[#allocation11 + $0xb0] sm:$0xff] }
 0x45c   :  { %v3836_v26 = vrot.slane %v3835_v22, 2  ;;  %v3891_v29 = vadd.f32 %v3890_v23, %v3852_v18  ;;  %v3784_v18 = vld [vmem:[#allocation11 + $0x190] sm:$0xff]  ;;  %v3775_v24 = vld [vmem:[#allocation11 + $0x148] sm:$0xff] }
 0x45d   :  { %4148 = vmatpush.msrb.mxu2 %v3784_v18  ;;  %v3776_v25 = vld [vmem:[#allocation11 + $0x150] sm:$0xff]  ;;  %4129 = vmatpush.msrb.mxu1 %v3775_v24 }
 0x45e   :  { %v3837_v32 = vadd.f32 %v3836_v26, %v3835_v22  ;;  %v3892_v34 = vrot.slane %v3891_v29, 2  ;;  %v3785_v22 = vld [vmem:[#allocation11 + $0x198] sm:$0xff]  ;;  %4111 = vmatpush.msrb.mxu0 %v3758_v38  ;;  %v3772_v18 = vld [vmem:[#allocation11 + $0x130] sm:$0xff] }
 0x45f   :  { %4168 = vmatpush.msrb.mxu3 %v3785_v22  ;;  %4149 = vmatpush.msrb.mxu2 %v3776_v25  ;;  %v3764_v24 = vld [vmem:[#allocation11 + $0xf0] sm:$0xff]  ;;  %v3765_v25 = vld [vmem:[#allocation11 + $0xf8] sm:$0xff] }
 0x460   :  { %v3838_v35 = vrot.slane %v3837_v32, 1  ;;  %v3893_v37 = vadd.f32 %v3892_v34, %v3891_v29  ;;  %v3777_v29 = vld [vmem:[#allocation11 + $0x158] sm:$0xff]  ;;  %v3768_v34 = vld [vmem:[#allocation11 + $0x110] sm:$0xff] }
 0x461   :  { %4169 = vmatpush.msrb.mxu3 %v3777_v29  ;;  %4150 = vmatpush.msrb.mxu2 %v3768_v34  ;;  %v3754_v29 = vld [vmem:[#allocation11 + $0xa0] sm:$0xff]  ;;  %v3749_v38 = vld [vmem:[#allocation11 + $0x78] sm:$0xff] }
 0x462   :  { %v3894_v39 = vrot.slane %v3893_v37, 1  ;;  %v3839_v42 = vadd.f32 %v3838_v35, %v3837_v32  ;;  %v3767_v32 = vld [vmem:[#allocation11 + $0x108] sm:$0xff]  ;;  %v3769_v35 = vld [vmem:[#allocation11 + $0x118] sm:$0xff] }
 0x463   :  { %4130 = vmatpush.msrb.mxu1 %v3767_v32  ;;  %4170 = vmatpush.msrb.mxu3 %v3769_v35  ;;  %v3757_v32 = vld [vmem:[#allocation11 + $0xb8] sm:$0xff]  ;;  %v3747_v35 = vld [vmem:[#allocation11 + $0x68] sm:$0xff] }
 0x464   :  { %v3895_v43 = vadd.f32 %v3894_v39, %v3893_v37  ;;  %v3759_v39 = vld [vmem:[#allocation11 + $0xc8] sm:$0xff] }
 0x465   :  { %4131 = vmatpush.msrb.mxu1 %v3759_v39  ;;  %4171 = vmatpush.msrb.mxu3 %v3761_v46  ;;  %v3738_v39 = vld [vmem:[#allocation11 + $0x20] sm:$0xff]  ;;  %v3741_v46 = vld [vmem:[#allocation11 + $0x38] sm:$0xff] }
 0x466   :  { %v3908_v50 = vsel %vm1440_vm1, %v3839_v42, %v3895_v43  ;;  %v3760_v42 = vld [vmem:[#allocation11 + $0xd0] sm:$0xff] }
 0x467   :  { %v3563_v47 = vpop.f32.mrf.mxu0  ;;  %v3576_v48 = vpop.f32.mrf.mxu1  ;;  %4046 = vmatmul.f32.vlgmr.msra.gmra.mxu2 %v3908_v50  ;;  %v3751_v50 = vld [vmem:[#allocation11 + $0x88] sm:$0xff] }
 0x468   :  { %v3577_v58 = vadd.f32 %v3576_v48, %v3563_v47  ;;  %4151 = vmatpush.msrb.mxu2 %v3760_v42  ;;  %v3750_v48 = vld [vmem:[#allocation11 + $0x80] sm:$0xff]  ;;  %4132 = vmatpush.msrb.mxu1 %v3751_v50  ;;  %v3739_v42 = vld [vmem:[#allocation11 + $0x28] sm:$0xff] }
 0x469   :  { %4112 = vmatpush.msrb.mxu0 %v3750_v48 }
 0x46a   :  { %4152 = vmatpush.msrb.mxu2 %v3752_v52 }
 0x46f   :  { %v3565_v53 = vpop.f32.mrf.mxu0  ;;  %v3578_v57 = vpop.f32.mrf.mxu1 }
 0x470   :  { %v3753_v57 = vld [vmem:[#allocation11 + $0x98] sm:$0xff] }
 0x471   :  { %4172 = vmatpush.msrb.mxu3 %v3753_v57 }
 0x476   :  { %v3589_v59 = vpop.f32.mrf.mxu2  ;;  %v3602_v60 = vpop.f32.mrf.mxu3 }
 0x477   :  { %v3590_v61 = vadd.f32 %v3589_v59, %v3577_v58  ;;  %v3742_v59 = vld [vmem:[#allocation11 + $0x40] sm:$0xff] }
 0x478   :  { %4113 = vmatpush.msrb.mxu0 %v3742_v59 }
 0x479   :  { %v9219_v56 = vadd.f32 %v3602_v60, %v3590_v61  ;;  %v3743_v60 = vld [vmem:[#allocation11 + $0x48] sm:$0xff]  ;;  %v3744_v61 = vld [vmem:[#allocation11 + $0x50] sm:$0xff] }
 0x47a   :  { %4133 = vmatpush.msrb.mxu1 %v3743_v60  ;;  %4153 = vmatpush.msrb.mxu2 %v3744_v61  ;;  %v6950_v61 = vld [vmem:[%s10063_s9 + $0x70] sm:$0xf] }
 0x47b   :  { %v3840_v62 = vrot.slane %v9219_v56, 4  ;;  %v3853_v63 = vmul.f32 %v9219_v56, %v9219_v56 }
 0x47d   :  { %v3841_v7 = vadd.f32 %v3840_v62, %v9219_v56  ;;  %v3896_v0 = vrot.slane %v3853_v63, 4  ;;  %v3745_v62 = vld [vmem:[#allocation11 + $0x58] sm:$0xff] }
 0x47e   :  { %v3591_v1 = vpop.f32.mrf.mxu2  ;;  %v3604_v44 = vpop.f32.mrf.mxu3  ;;  %4173 = vmatpush.msrb.mxu3 %v3745_v62  ;;  %v7811_v62 = vld [vmem:[%s10063_s9 + $0x74] sm:$0xf0] }
 0x47f   :  { %v3842_v20 = vrot.slane %v3841_v7, 2  ;;  %v3897_v4 = vadd.f32 %v3896_v0, %v3853_v63  ;;  %v3735_v0 = vld [vmem:[#allocation11 + $0x8] sm:$0xff]  ;;  %v3736_v1 = vld [vmem:[#allocation11 + $0x10] sm:$0xff] }
 0x480   :  { %4134 = vmatpush.msrb.mxu1 %v3735_v0  ;;  %4154 = vmatpush.msrb.mxu2 %v3736_v1  ;;  %v7827_v0 = vld [vmem:[%s10063_s9 + $0xf4] sm:$0xf0]  ;;  %v7078_v1 = vld [vmem:[%s10063_s9 + $0x170] sm:$0xf] }
 0x481   :  { %v3843_v5 = vadd.f32 %v3842_v20, %v3841_v7  ;;  %v3898_v6 = vrot.slane %v3897_v4, 2  ;;  %v3734_v7 = vld [vmem:[#allocation11] sm:$0xff]  ;;  %v3737_v20 = vld [vmem:[#allocation11 + $0x18] sm:$0xff] }
 0x482   :  { %4114 = vmatpush.msrb.mxu0 %v3734_v7  ;;  %4174 = vmatpush.msrb.mxu3 %v3737_v20  ;;  %v7014_v7 = vld [vmem:[%s10063_s9 + $0xf0] sm:$0xf] }
 0x483   :  { %v3844_v49 = vrot.slane %v3843_v5, 1  ;;  %v3899_v27 = vadd.f32 %v3898_v6, %v3897_v4  ;;  %v3794_v4 = vld [vmem:[#allocation11 + $0x1e0] sm:$0xff]  ;;  %v7142_v20 = vld [vmem:[%s10063_s9 + $0x1f0] sm:$0xf] }
 0x484   :  { %4187 = vmatpush.msra.mxu0 %v3794_v4  ;;  %v7859_v4 = vld [vmem:[%s10063_s9 + $0x1f4] sm:$0xf0] }
 0x485   :  { %v3900_v8 = vrot.slane %v3899_v27, 1  ;;  %v3845_v11 = vadd.f32 %v3844_v49, %v3843_v5  ;;  %v3795_v5 = vld [vmem:[#allocation11 + $0x1e8] sm:$0xff]  ;;  %v3796_v49 = vld [vmem:[#allocation11 + $0x1f0] sm:$0xff] }
 0x486   :  { %4207 = vmatpush.msra.mxu1 %v3795_v5  ;;  %4227 = vmatpush.msra.mxu2 %v3796_v49  ;;  %v6951_v49 = vor.u32 %v7811_v62, %v6950_v61  ;;  %v7046_v61 = vld [vmem:[%s10063_s9 + $0x130] sm:$0xf]  ;;  %v7835_v62 = vld [vmem:[%s10063_s9 + $0x134] sm:$0xf0] }
 0x487   :  { %v3901_v12 = vadd.f32 %v3900_v8, %v3899_v27  ;;  %v3797_v27 = vld [vmem:[#allocation11 + $0x1f8] sm:$0xff]  ;;  %v3786_v8 = vld [vmem:[#allocation11 + $0x1a0] sm:$0xff] }
 0x488   :  { %v3927_v28 = vpop.f32.mrf.mxu0  ;;  %4188 = vmatpush.msra.mxu0 %v3786_v8  ;;  %v6942_v8 = vld [vmem:[%s10063_s9 + $0x60] sm:$0xf] }
 0x489   :  { %v3909_v14 = vsel %vm1440_vm1, %v3845_v11, %v3901_v12  ;;  %v3947_v17 = vpop.f32.mrf.mxu1  ;;  %v3787_v11 = vld [vmem:[#allocation11 + $0x1a8] sm:$0xff]  ;;  %v3788_v12 = vld [vmem:[#allocation11 + $0x1b0] sm:$0xff] }
 0x48a   :  { %4066 = vmatmul.f32.vlgmr.msra.gmra.mxu3 %v3909_v14  ;;  %v3948_v23 = vadd.f32 %v3947_v17, %v3927_v28  ;;  %v3789_v28 = vld [vmem:[#allocation11 + $0x1b8] sm:$0xff]  ;;  %4208 = vmatpush.msra.mxu1 %v3787_v11  ;;  %v7809_v11 = vld [vmem:[%s10063_s9 + $0x64] sm:$0xf0] }
 0x48b   :  { %4247 = vmatpush.msra.mxu3 %v3797_v27  ;;  %4228 = vmatpush.msra.mxu2 %v3788_v12  ;;  %v7015_v27 = vor.u32 %v7827_v0, %v7014_v7  ;;  %v7851_v7 = vld [vmem:[%s10063_s9 + $0x1b4] sm:$0xf0] }
 0x48c   :  { %4189 = vmatpush.msra.mxu0 %v3778_v15  ;;  %4209 = vmatpush.msra.mxu1 %v3779_v16  ;;  %v7143_v16 = vor.u32 %v7859_v4, %v7142_v20  ;;  %v7801_v20 = vld [vmem:[%s10063_s9 + $0x24] sm:$0xf0]  ;;  %v6974_v4 = vld [vmem:[%s10063_s9 + $0xa0] sm:$0xf] }
 0x48d   :  { %4248 = vmatpush.msra.mxu3 %v3789_v28  ;;  %4229 = vmatpush.msra.mxu2 %v3780_v36  ;;  %v7825_v28 = vld [vmem:[%s10063_s9 + $0xe4] sm:$0xf0]  ;;  %v7070_v36 = vld [vmem:[%s10063_s9 + $0x160] sm:$0xf] }
 0x48e   :  { %4190 = vmatpush.msra.mxu0 %v3770_v33  ;;  %4210 = vmatpush.msra.mxu1 %v3771_v55  ;;  %v6943_v33 = vor.u32 %v7809_v11, %v6942_v8  ;;  %v7833_v8 = vld [vmem:[%s10063_s9 + $0x124] sm:$0xf0]  ;;  %v7102_v11 = vld [vmem:[%s10063_s9 + $0x1a0] sm:$0xf] }
 0x48f   :  { %4249 = vmatpush.msra.mxu3 %v3781_v54  ;;  %4230 = vmatpush.msra.mxu2 %v3772_v18  ;;  %v7857_v54 = vld [vmem:[%s10063_s9 + $0x1e4] sm:$0xf0]  ;;  %v6934_v18 = vld [vmem:[%s10063_s9 + $0x50] sm:$0xf] }
 0x490   :  { %4211 = vmatpush.msra.mxu1 %v3763_v3  ;;  %v7071_v3 = vor.u32 %v7841_v41, %v7070_v36  ;;  %v6966_v36 = vld [vmem:[%s10063_s9 + $0x90] sm:$0xf]  ;;  %v7815_v41 = vld [vmem:[%s10063_s9 + $0x94] sm:$0xf0] }
 0x491   :  { %4231 = vmatpush.msra.mxu2 %v3764_v24 }
 0x493   :  { %4232 = vmatpush.msra.mxu2 %v3756_v31 }
 0x495   :  { %v3967_v21 = vpop.f32.mrf.mxu2 }
 0x496   :  { %v3987_v26 = vpop.f32.mrf.mxu3  ;;  %v3968_v30 = vadd.f32 %v3967_v21, %v3948_v23  ;;  %v3773_v21 = vld [vmem:[#allocation11 + $0x138] sm:$0xff]  ;;  %v3762_v23 = vld [vmem:[#allocation11 + $0xe0] sm:$0xff] }
 0x497   :  { %4250 = vmatpush.msra.mxu3 %v3773_v21  ;;  %4191 = vmatpush.msra.mxu0 %v3762_v23  ;;  %v7807_v21 = vld [vmem:[%s10063_s9 + $0x54] sm:$0xf0] }
 0x498   :  { %v3988_v37 = vadd.f32 %v3987_v26, %v3968_v30  ;;  %v3755_v30 = vld [vmem:[#allocation11 + $0xa8] sm:$0xff]  ;;  %v7823_v23 = vld [vmem:[%s10063_s9 + $0xd4] sm:$0xf0]  ;;  %v6935_v31 = vor.u32 %v7807_v21, %v6934_v18  ;;  %v7094_v18 = vld [vmem:[%s10063_s9 + $0x190] sm:$0xf] }
 0x499   :  { %4251 = vmatpush.msra.mxu3 %v3765_v25  ;;  %4192 = vmatpush.msra.mxu0 %v3754_v29  ;;  %v7062_v25 = vld [vmem:[%s10063_s9 + $0x150] sm:$0xf]  ;;  %v7847_v21 = vld [vmem:[%s10063_s9 + $0x194] sm:$0xf0] }
 0x49a   :  { %4212 = vmatpush.msra.mxu1 %v3755_v30  ;;  %v7126_v29 = vld [vmem:[%s10063_s9 + $0x1d0] sm:$0xf]  ;;  %v7855_v30 = vld [vmem:[%s10063_s9 + $0x1d4] sm:$0xf0] }
 0x49b   :  { %4252 = vmatpush.msra.mxu3 %v3757_v32 }
 0x49c   :  { %4213 = vmatpush.msra.mxu1 %v3747_v35  ;;  %v6990_v35 = vld [vmem:[%s10063_s9 + $0xc0] sm:$0xf] }
 0x49d   :  { %4253 = vmatpush.msra.mxu3 %v3749_v38 }
 0x49e   :  { %4214 = vmatpush.msra.mxu1 %v3739_v42  ;;  %v7054_v42 = vld [vmem:[%s10063_s9 + $0x140] sm:$0xf] }
 0x49f   :  { %4254 = vmatpush.msra.mxu3 %v3741_v46  ;;  %v7118_v46 = vld [vmem:[%s10063_s9 + $0x1c0] sm:$0xf] }
 0x4a9   :  { %v4007_v9 = vpop.f32.mrf.mxu0 }
 0x4aa   :  { %v4008_v47 = vadd.f32 %v4007_v9, %v3988_v37  ;;  %v3746_v9 = vld [vmem:[#allocation11 + $0x60] sm:$0xff]  ;;  %v3748_v37 = vld [vmem:[#allocation11 + $0x70] sm:$0xff] }
 0x4ab   :  { %4193 = vmatpush.msra.mxu0 %v3746_v9  ;;  %4233 = vmatpush.msra.mxu2 %v3748_v37  ;;  %v7805_v9 = vld [vmem:[%s10063_s9 + $0x44] sm:$0xf0] }
 0x4ac   :  { %v7821_v37 = vld [vmem:[%s10063_s9 + $0xc4] sm:$0xf0] }
 0x4ad   :  { %4194 = vmatpush.msra.mxu0 %v3738_v39  ;;  %v7127_v39 = vor.u32 %v7855_v30, %v7126_v29  ;;  %v7206_v29 = vld [vmem:[%s10063_s9 + $0x270] sm:$0xf]  ;;  %v7875_v30 = vld [vmem:[%s10063_s9 + $0x274] sm:$0xf0] }
 0x4c4   :  { %v4027_v43 = vpop.f32.mrf.mxu1 }
 0x4c5   :  { %v4028_v58 = vadd.f32 %v4027_v43, %v4008_v47  ;;  %v3740_v43 = vld [vmem:[#allocation11 + $0x30] sm:$0xff] }
 0x4c6   :  { %4234 = vmatpush.msra.mxu2 %v3740_v43  ;;  %v7837_v43 = vld [vmem:[%s10063_s9 + $0x144] sm:$0xf0] }
 0x4ea   :  { %v4047_v53 = vpop.f32.mrf.mxu2 }
 0x4eb   :  { %v4048_v63 = vadd.f32 %v4047_v53, %v4028_v58 }
 0x50d   :  { %v4067_v44 = vpop.f32.mrf.mxu3 }
 0x50e   :  { %v4068_v6 = vadd.f32 %v4067_v44, %v4048_v63  ;;  %v7843_v44 = vld [vmem:[%s10063_s9 + $0x174] sm:$0xf0] }
 0x50f   :  { %v7079_v15 = vor.u32 %v7843_v44, %v7078_v1  ;;  %v6910_v44 = vld [vmem:[%s10063_s9 + $0x20] sm:$0xf] }
 0x510   :  { %v9227_v14 = vmul.f32 0.0078125, %v4068_v6 }
 0x512   :  { %v4071_v17 = vmul.f32 %v9227_v14, %v9227_v14  ;;  %v4087_v59 = vsub.f32 0.0, %v9227_v14 }
 0x514   :  { %v4073_v22 = vrot.slane %v4071_v17, 7  ;;  %v7134_v17 = vld [vmem:[%s10063_s9 + $0x1e0] sm:$0xf] }
 0x515   :  { %v7135_v24 = vor.u32 %v7857_v54, %v7134_v17 }
 0x516   :  { %v4075_v26 = vsub.f32 %v9227_v14, %v4073_v22  ;;  %v7006_v14 = vld [vmem:[%s10063_s9 + $0xe0] sm:$0xf]  ;;  %v6998_v22 = vld [vmem:[%s10063_s9 + $0xd0] sm:$0xf] }
 0x517   :  { %v7007_v55 = vor.u32 %v7825_v28, %v7006_v14  ;;  %v6999_v32 = vor.u32 %v7823_v23, %v6998_v22  ;;  %v6911_v14 = vor.u32 %v7801_v20, %v6910_v44  ;;  %v6894_v22 = vld [vmem:[%s10063_s9] sm:$0xf]  ;;  %v7921_v20 = vld [vmem:[%s10063_s9 + $0x3e4] sm:$0xf0] }
 0x518   :  { %v4076_v34 = vadd.f32 1e-05, %v4075_v26  ;;  %v7839_v26 = vld [vmem:[%s10063_s9 + $0x154] sm:$0xf0]  ;;  %v7390_v44 = vld [vmem:[%s10063_s9 + $0x3e0] sm:$0xf] }
 0x519   :  { %v7063_v38 = vor.u32 %v7839_v26, %v7062_v25  ;;  %v6958_v25 = vld [vmem:[%s10063_s9 + $0x80] sm:$0xf]  ;;  %v7813_v26 = vld [vmem:[%s10063_s9 + $0x84] sm:$0xf0] }
 0x51a   :  { %7942 = vrsqrt.f32 %v4076_v34  ;;  %vm4083_vm6 = vweird.f32 %v4076_v34 }
 0x520   :  { %v7943_v47 = vpop.eup %7942 }
 0x521   :  { %v4078_v48 = vmul.f32 %v7943_v47, %v4076_v34  ;;  %vm4084_vm5 = vweird.f32 %v7943_v47  ;;  %v6926_v34 = vld [vmem:[%s10063_s9 + $0x40] sm:$0xf] }
 0x522   :  { %vm4085_vm7 = vmor %vm4083_vm6, %vm4084_vm5 }
 0x523   :  { %v4079_v50 = vmul.f32 %v7943_v47, %v4078_v48  ;;  %v6927_v48 = vor.u32 %v7805_v9, %v6926_v34  ;;  %v7095_v34 = vor.u32 %v7847_v21, %v7094_v18  ;;  %v7891_v9 = vld [vmem:[%s10063_s9 + $0x2f4] sm:$0xf0] }
 0x525   :  { %v4080_v52 = vmul.f32 0.5, %v4079_v50  ;;  %v6991_v50 = vor.u32 %v7821_v37, %v6990_v35  ;;  %v7022_v35 = vld [vmem:[%s10063_s9 + $0x100] sm:$0xf]  ;;  %v7829_v37 = vld [vmem:[%s10063_s9 + $0x104] sm:$0xf0] }
 0x527   :  { %v4081_v53 = vsub.f32 1.5, %v4080_v52  ;;  %v6918_v52 = vld [vmem:[%s10063_s9 + $0x30] sm:$0xf] }
 0x529   :  { %v4082_v57 = vmul.f32 %v7943_v47, %v4081_v53  ;;  %v7803_v53 = vld [vmem:[%s10063_s9 + $0x34] sm:$0xf0] }
 0x52a   :  { %v6919_v0 = vor.u32 %v7803_v53, %v6918_v52  ;;  %v7207_v52 = vor.u32 %v7875_v30, %v7206_v29 }
 0x52b   :  { %v4086_v58 = vsel %vm4085_vm7, %v7943_v47, %v4082_v57  ;;  %v7853_v47 = vld [vmem:[%s10063_s9 + $0x1c4] sm:$0xf0]  ;;  %v6982_v57 = vld [vmem:[%s10063_s9 + $0xb0] sm:$0xf] }
 0x52c   :  { %v4089_v60 = vrot.slane %v4086_v58, 1  ;;  %v4092_v5 = vperm.slane %v4086_v58, 1  ;;  %v7819_v58 = vld [vmem:[%s10063_s9 + $0xb4] sm:$0xf0] }
 0x52d   :  { %v6983_v1 = vor.u32 %v7819_v58, %v6982_v57  ;;  %v7198_v57 = vld [vmem:[%s10063_s9 + $0x260] sm:$0xf]  ;;  %v7873_v58 = vld [vmem:[%s10063_s9 + $0x264] sm:$0xf0] }
 0x52e   :  { %v4091_v63 = vmul.f32 %v4089_v60, %v4087_v59  ;;  %v7055_v59 = vor.u32 %v7837_v43, %v7054_v42  ;;  %v7119_v60 = vor.u32 %v7853_v47, %v7118_v46  ;;  %v7334_v42 = vld [vmem:[%s10063_s9 + $0x370] sm:$0xf]  ;;  %v6959_v46 = vor.u32 %v7813_v26, %v6958_v25  ;;  %v7907_v47 = vld [vmem:[%s10063_s9 + $0x374] sm:$0xf0] }
 0x52f   :  { %v7238_v25 = vld [vmem:[%s10063_s9 + $0x2b0] sm:$0xf]  ;;  %v7883_v26 = vld [vmem:[%s10063_s9 + $0x2b4] sm:$0xf0] }
 0x530   :  { %v4093_v6 = vperm.slane %v4091_v63, 0  ;;  %v7110_v63 = vld [vmem:[%s10063_s9 + $0x1b0] sm:$0xf]  ;;  %v7239_v30 = vor.u32 %v7883_v26, %v7238_v25 }
 0x532   :  { %v4094_v12 = vsel %vm1440_vm1, %v4092_v5, %v4093_v6  ;;  %v7817_v5 = vld [vmem:[%s10063_s9 + $0xa4] sm:$0xf0]  ;;  %v7047_v6 = vor.u32 %v7835_v62, %v7046_v61  ;;  %v7023_v61 = vor.u32 %v7829_v37, %v7022_v35 }
 0x533   :  { %6884 = vmatmul.msk.f32.vlgmr.msrb.gmra.mxu0 %vm4095_vm8, %v4094_v12  ;;  %6885 = vmatmul.msk.f32.vlgmr.msrb.gmra.mxu1 %vm4095_vm8, %v4094_v12  ;;  %v6975_v28 = vor.u32 %v7817_v5, %v6974_v4  ;;  %v7199_v4 = vor.u32 %v7873_v58, %v7198_v57  ;;  %v7917_v35 = vld [vmem:[%s10063_s9 + $0x3c4] sm:$0xf0]  ;;  %v7915_v57 = vld [vmem:[%s10063_s9 + $0x3b4] sm:$0xf0] }
 0x534   :  { %6886 = vmatmul.msk.f32.vlgmr.msrb.gmra.mxu2 %vm4095_vm8, %v4094_v12  ;;  %6887 = vmatmul.msk.f32.vlgmr.msrb.gmra.mxu3 %vm4095_vm8, %v4094_v12 }
 0x535   :  { %5080 = vmatpush.bf16.msrb.mxu0 %v6951_v49  ;;  %5093 = vmatpush.bf16.msrb.mxu1 %v7015_v27  ;;  %v7111_v49 = vor.u32 %v7851_v7, %v7110_v63  ;;  %v7038_v27 = vld [vmem:[%s10063_s9 + $0x120] sm:$0xf]  ;;  %v7335_v63 = vor.u32 %v7907_v47, %v7334_v42 }
 0x536   :  { %5106 = vmatpush.bf16.msrb.mxu2 %v7079_v15  ;;  %5119 = vmatpush.bf16.msrb.mxu3 %v7143_v16  ;;  %v6902_v15 = vld [vmem:[%s10063_s9 + $0x10] sm:$0xf]  ;;  %v7799_v16 = vld [vmem:[%s10063_s9 + $0x14] sm:$0xf0]  ;;  %v7039_v17 = vor.u32 %v7833_v8, %v7038_v27  ;;  %v7230_v42 = vld [vmem:[%s10063_s9 + $0x2a0] sm:$0xf] }
 0x537   :  { %v6903_v23 = vor.u32 %v7799_v16, %v6902_v15  ;;  %v7254_v27 = vld [vmem:[%s10063_s9 + $0x2d0] sm:$0xf]  ;;  %v7887_v8 = vld [vmem:[%s10063_s9 + $0x2d4] sm:$0xf0] }
 0x538   :  { %v7382_v15 = vld [vmem:[%s10063_s9 + $0x3d0] sm:$0xf]  ;;  %v7919_v16 = vld [vmem:[%s10063_s9 + $0x3d4] sm:$0xf0] }
 0x539   :  { %5081 = vmatpush.bf16.msrb.mxu0 %v6943_v33  ;;  %5094 = vmatpush.bf16.msrb.mxu1 %v7007_v55  ;;  %v7030_v33 = vld [vmem:[%s10063_s9 + $0x110] sm:$0xf]  ;;  %v7831_v55 = vld [vmem:[%s10063_s9 + $0x114] sm:$0xf0]  ;;  %v7383_v21 = vor.u32 %v7919_v16, %v7382_v15 }
 0x53a   :  { %5107 = vmatpush.bf16.msrb.mxu2 %v7071_v3  ;;  %5120 = vmatpush.bf16.msrb.mxu3 %v7135_v24  ;;  %v6967_v3 = vor.u32 %v7815_v41, %v6966_v36  ;;  %v7797_v24 = vld [vmem:[%s10063_s9 + $0x4] sm:$0xf0]  ;;  %v7255_v41 = vor.u32 %v7887_v8, %v7254_v27  ;;  %v7214_v27 = vld [vmem:[%s10063_s9 + $0x280] sm:$0xf]  ;;  %v7350_v15 = vld [vmem:[%s10063_s9 + $0x390] sm:$0xf] }
 0x53b   :  { %6888 = vmatmul.msk.f32.vlgmr.msra.gmra.mxu0 %vm4095_vm8, %v4094_v12  ;;  %6889 = vmatmul.msk.f32.vlgmr.msra.gmra.mxu1 %vm4095_vm8, %v4094_v12  ;;  %v6895_v43 = vor.u32 %v7797_v24, %v6894_v22  ;;  %v7867_v24 = vld [vmem:[%s10063_s9 + $0x234] sm:$0xf0] }
 0x53c   :  { %6890 = vmatmul.msk.f32.vlgmr.msra.gmra.mxu2 %vm4095_vm8, %v4094_v12  ;;  %6891 = vmatmul.msk.f32.vlgmr.msra.gmra.mxu3 %vm4095_vm8, %v4094_v12  ;;  %v7849_v12 = vld [vmem:[%s10063_s9 + $0x1a4] sm:$0xf0]  ;;  %v7911_v16 = vld [vmem:[%s10063_s9 + $0x394] sm:$0xf0] }
 0x53d   :  { %5082 = vmatpush.bf16.msrb.mxu0 %v6935_v31  ;;  %5095 = vmatpush.bf16.msrb.mxu1 %v6999_v32  ;;  %v7103_v54 = vor.u32 %v7849_v12, %v7102_v11  ;;  %v7270_v31 = vld [vmem:[%s10063_s9 + $0x2f0] sm:$0xf]  ;;  %v7031_v32 = vor.u32 %v7831_v55, %v7030_v33  ;;  %v7391_v12 = vor.u32 %v7921_v20, %v7390_v44  ;;  %v7246_v33 = vld [vmem:[%s10063_s9 + $0x2c0] sm:$0xf]  ;;  %v7885_v55 = vld [vmem:[%s10063_s9 + $0x2c4] sm:$0xf0] }
 0x53e   :  { %5108 = vmatpush.bf16.msrb.mxu2 %v7063_v38  ;;  %5121 = vmatpush.bf16.msrb.mxu3 %v7127_v39  ;;  %v7086_v38 = vld [vmem:[%s10063_s9 + $0x180] sm:$0xf]  ;;  %v7845_v39 = vld [vmem:[%s10063_s9 + $0x184] sm:$0xf0]  ;;  %v7271_v53 = vor.u32 %v7891_v9, %v7270_v31 }
 0x53f   :  { %v7087_v62 = vor.u32 %v7845_v39, %v7086_v38  ;;  %v7310_v31 = vld [vmem:[%s10063_s9 + $0x340] sm:$0xf]  ;;  %v7865_v39 = vld [vmem:[%s10063_s9 + $0x224] sm:$0xf0] }
 0x540   :  { %v7166_v38 = vld [vmem:[%s10063_s9 + $0x220] sm:$0xf] }
 0x541   :  { %5083 = vmatpush.bf16.msrb.mxu0 %v6927_v48  ;;  %5096 = vmatpush.bf16.msrb.mxu1 %v6991_v50  ;;  %v7398_v48 = vld [vmem:[%s10063_s9 + $0x3f0] sm:$0xf]  ;;  %v7923_v50 = vld [vmem:[%s10063_s9 + $0x3f4] sm:$0xf0]  ;;  %v7358_v44 = vld [vmem:[%s10063_s9 + $0x3a0] sm:$0xf] }
 0x542   :  { %5109 = vmatpush.bf16.msrb.mxu2 %v7055_v59  ;;  %5122 = vmatpush.bf16.msrb.mxu3 %v7119_v60  ;;  %v7262_v59 = vld [vmem:[%s10063_s9 + $0x2e0] sm:$0xf]  ;;  %v7889_v60 = vld [vmem:[%s10063_s9 + $0x2e4] sm:$0xf0]  ;;  %v7399_v7 = vor.u32 %v7923_v50, %v7398_v48  ;;  %v7302_v48 = vld [vmem:[%s10063_s9 + $0x330] sm:$0xf] }
 0x543   :  { %v7263_v5 = vor.u32 %v7889_v60, %v7262_v59  ;;  %v7899_v50 = vld [vmem:[%s10063_s9 + $0x334] sm:$0xf0]  ;;  %v7158_v59 = vld [vmem:[%s10063_s9 + $0x210] sm:$0xf] }
 0x544   :  { %v7863_v60 = vld [vmem:[%s10063_s9 + $0x214] sm:$0xf0] }
 0x545   :  { %5084 = vmatpush.bf16.msrb.mxu0 %v6919_v0  ;;  %5097 = vmatpush.bf16.msrb.mxu1 %v6983_v1  ;;  %v7326_v0 = vld [vmem:[%s10063_s9 + $0x360] sm:$0xf]  ;;  %v7905_v1 = vld [vmem:[%s10063_s9 + $0x364] sm:$0xf0] }
 0x546   :  { %5110 = vmatpush.bf16.msrb.mxu2 %v7047_v6  ;;  %5123 = vmatpush.bf16.msrb.mxu3 %v7111_v49  ;;  %v7190_v6 = vld [vmem:[%s10063_s9 + $0x250] sm:$0xf]  ;;  %v7871_v49 = vld [vmem:[%s10063_s9 + $0x254] sm:$0xf0]  ;;  %v7327_v11 = vor.u32 %v7905_v1, %v7326_v0  ;;  %v7294_v0 = vld [vmem:[%s10063_s9 + $0x320] sm:$0xf] }
 0x547   :  { %v7191_v36 = vor.u32 %v7871_v49, %v7190_v6  ;;  %v7897_v1 = vld [vmem:[%s10063_s9 + $0x324] sm:$0xf0]  ;;  %v7150_v6 = vld [vmem:[%s10063_s9 + $0x200] sm:$0xf] }
 0x548   :  { %v7295_v20 = vor.u32 %v7897_v1, %v7294_v0  ;;  %v7861_v49 = vld [vmem:[%s10063_s9 + $0x204] sm:$0xf0] }
 0x549   :  { %5085 = vmatpush.bf16.msrb.mxu0 %v6911_v14  ;;  %5098 = vmatpush.bf16.msrb.mxu1 %v6975_v28  ;;  %v7318_v14 = vld [vmem:[%s10063_s9 + $0x350] sm:$0xf]  ;;  %v7903_v28 = vld [vmem:[%s10063_s9 + $0x354] sm:$0xf0]  ;;  %v7151_v8 = vor.u32 %v7861_v49, %v7150_v6 }
 0x54a   :  { %5111 = vmatpush.bf16.msrb.mxu2 %v7039_v17  ;;  %5124 = vmatpush.bf16.msrb.mxu3 %v7103_v54  ;;  %v7182_v17 = vld [vmem:[%s10063_s9 + $0x240] sm:$0xf]  ;;  %v7869_v54 = vld [vmem:[%s10063_s9 + $0x244] sm:$0xf0]  ;;  %v7319_v18 = vor.u32 %v7903_v28, %v7318_v14  ;;  %v7286_v14 = vld [vmem:[%s10063_s9 + $0x310] sm:$0xf] }
 0x54b   :  { %v7183_v22 = vor.u32 %v7869_v54, %v7182_v17  ;;  %v7895_v28 = vld [vmem:[%s10063_s9 + $0x314] sm:$0xf0]  ;;  %v7278_v17 = vld [vmem:[%s10063_s9 + $0x300] sm:$0xf]  ;;  %v7893_v54 = vld [vmem:[%s10063_s9 + $0x304] sm:$0xf0] }
 0x54d   :  { %5086 = vmatpush.bf16.msrb.mxu0 %v6903_v23  ;;  %5099 = vmatpush.bf16.msrb.mxu1 %v6967_v3  ;;  %v7247_v23 = vor.u32 %v7885_v55, %v7246_v33  ;;  %v7174_v3 = vld [vmem:[%s10063_s9 + $0x230] sm:$0xf]  ;;  %v7279_v33 = vor.u32 %v7893_v54, %v7278_v17  ;;  %v7342_v55 = vld [vmem:[%s10063_s9 + $0x380] sm:$0xf]  ;;  %v7072_v17 = vld [vmem:[%s10063_s9 + $0x168] sm:$0xf0] }
 0x54e   :  { %5112 = vmatpush.bf16.msrb.mxu2 %v7031_v32  ;;  %5125 = vmatpush.bf16.msrb.mxu3 %v7095_v34  ;;  %v7175_v29 = vor.u32 %v7867_v24, %v7174_v3  ;;  %v7901_v32 = vld [vmem:[%s10063_s9 + $0x344] sm:$0xf0]  ;;  %v7374_v34 = vld [vmem:[%s10063_s9 + $0x3c0] sm:$0xf] }
 0x54f   :  { %v7311_v9 = vor.u32 %v7901_v32, %v7310_v31  ;;  %v7375_v37 = vor.u32 %v7917_v35, %v7374_v34  ;;  %v7810_v31 = vld [vmem:[%s10063_s9 + $0x74] sm:$0xf] }
 0x550   :  { %v7826_v35 = vld [vmem:[%s10063_s9 + $0xf4] sm:$0xf] }
 0x551   :  { %5087 = vmatpush.bf16.msrb.mxu0 %v6895_v43  ;;  %5100 = vmatpush.bf16.msrb.mxu1 %v6959_v46  ;;  %v7167_v43 = vor.u32 %v7865_v39, %v7166_v38  ;;  %v7881_v46 = vld [vmem:[%s10063_s9 + $0x2a4] sm:$0xf0] }
 0x552   :  { %5113 = vmatpush.bf16.msrb.mxu2 %v7023_v61  ;;  %5126 = vmatpush.bf16.msrb.mxu3 %v7087_v62  ;;  %v7231_v47 = vor.u32 %v7881_v46, %v7230_v42  ;;  %v7222_v61 = vld [vmem:[%s10063_s9 + $0x290] sm:$0xf]  ;;  %v7159_v62 = vor.u32 %v7863_v60, %v7158_v59 }
 0x555   :  { %5132 = vmatpush.bf16.msra.mxu0 %v7207_v52  ;;  %5145 = vmatpush.bf16.msra.mxu1 %v7271_v53  ;;  %v7366_v52 = vld [vmem:[%s10063_s9 + $0x3b0] sm:$0xf]  ;;  %v7303_v53 = vor.u32 %v7899_v50, %v7302_v48 }
 0x556   :  { %5158 = vmatpush.bf16.msra.mxu2 %v7335_v63  ;;  %5171 = vmatpush.bf16.msra.mxu3 %v7399_v7  ;;  %v7367_v58 = vor.u32 %v7915_v57, %v7366_v52  ;;  %v7879_v63 = vld [vmem:[%s10063_s9 + $0x294] sm:$0xf0]  ;;  %v7808_v52 = vld [vmem:[%s10063_s9 + $0x64] sm:$0xf] }
 0x557   :  { %v7223_v7 = vor.u32 %v7879_v63, %v7222_v61  ;;  %v7824_v61 = vld [vmem:[%s10063_s9 + $0xe4] sm:$0xf] }
 0x559   :  { %5133 = vmatpush.bf16.msra.mxu0 %v7199_v4  ;;  %5146 = vmatpush.bf16.msra.mxu1 %v7263_v5  ;;  %v7913_v4 = vld [vmem:[%s10063_s9 + $0x3a4] sm:$0xf0] }
 0x55a   :  { %5159 = vmatpush.bf16.msra.mxu2 %v7327_v11  ;;  %5172 = vmatpush.bf16.msra.mxu3 %v7391_v12  ;;  %v7359_v5 = vor.u32 %v7913_v4, %v7358_v44  ;;  %v7877_v11 = vld [vmem:[%s10063_s9 + $0x284] sm:$0xf0]  ;;  %v7842_v44 = vld [vmem:[%s10063_s9 + $0x174] sm:$0xf] }
 0x55b   :  { %v7215_v12 = vor.u32 %v7877_v11, %v7214_v27  ;;  %v7822_v11 = vld [vmem:[%s10063_s9 + $0xd4] sm:$0xf] }
 0x55d   :  { %5134 = vmatpush.bf16.msra.mxu0 %v7191_v36  ;;  %5147 = vmatpush.bf16.msra.mxu1 %v7255_v41  ;;  %v7287_v36 = vor.u32 %v7895_v28, %v7286_v14  ;;  %v7351_v41 = vor.u32 %v7911_v16, %v7350_v15 }
 0x55e   :  { %5160 = vmatpush.bf16.msra.mxu2 %v7319_v18  ;;  %5173 = vmatpush.bf16.msra.mxu3 %v7383_v21  ;;  %v7909_v18 = vld [vmem:[%s10063_s9 + $0x384] sm:$0xf0] }
 0x55f   :  { %v7343_v21 = vor.u32 %v7909_v18, %v7342_v55 }
 0x561   :  { %5135 = vmatpush.bf16.msra.mxu0 %v7183_v22  ;;  %5148 = vmatpush.bf16.msra.mxu1 %v7247_v23 }
 0x562   :  { %5161 = vmatpush.bf16.msra.mxu2 %v7311_v9  ;;  %5174 = vmatpush.bf16.msra.mxu3 %v7375_v37  ;;  %v6952_v9 = vld [vmem:[%s10063_s9 + $0x78] sm:$0xf0] }
 0x563   :  { %v6955_v48 = vor.u32 %v7810_v31, %v6952_v9  ;;  %v7820_v31 = vld [vmem:[%s10063_s9 + $0xc4] sm:$0xf] }
 0x565   :  { %5136 = vmatpush.bf16.msra.mxu0 %v7175_v29  ;;  %5149 = vmatpush.bf16.msra.mxu1 %v7239_v30 }
 0x566   :  { %5162 = vmatpush.bf16.msra.mxu2 %v7303_v53  ;;  %5175 = vmatpush.bf16.msra.mxu3 %v7367_v58  ;;  %v6944_v53 = vld [vmem:[%s10063_s9 + $0x68] sm:$0xf0] }
 0x567   :  { %v6947_v4 = vor.u32 %v7808_v52, %v6944_v53 }
 0x569   :  { %5137 = vmatpush.bf16.msra.mxu0 %v7167_v43  ;;  %5150 = vmatpush.bf16.msra.mxu1 %v7231_v47 }
 0x56a   :  { %5163 = vmatpush.bf16.msra.mxu2 %v7295_v20  ;;  %5176 = vmatpush.bf16.msra.mxu3 %v7359_v5  ;;  %v7080_v20 = vld [vmem:[%s10063_s9 + $0x178] sm:$0xf0]  ;;  %v7806_v5 = vld [vmem:[%s10063_s9 + $0x54] sm:$0xf] }
 0x56b   :  { %v7083_v14 = vor.u32 %v7842_v44, %v7080_v20  ;;  %v7852_v44 = vld [vmem:[%s10063_s9 + $0x1c4] sm:$0xf]  ;;  %v7120_v20 = vld [vmem:[%s10063_s9 + $0x1c8] sm:$0xf0] }
 0x56d   :  { %5138 = vmatpush.bf16.msra.mxu0 %v7159_v62  ;;  %5151 = vmatpush.bf16.msra.mxu1 %v7223_v7  ;;  %v7008_v62 = vld [vmem:[%s10063_s9 + $0xe8] sm:$0xf0] }
 0x56e   :  { %5164 = vmatpush.bf16.msra.mxu2 %v7287_v36  ;;  %5177 = vmatpush.bf16.msra.mxu3 %v7351_v41  ;;  %v7011_v27 = vor.u32 %v7824_v61, %v7008_v62  ;;  %v7840_v41 = vld [vmem:[%s10063_s9 + $0x164] sm:$0xf] }
 0x571   :  { %5139 = vmatpush.bf16.msra.mxu0 %v7151_v8  ;;  %5152 = vmatpush.bf16.msra.mxu1 %v7215_v12  ;;  %v6936_v8 = vld [vmem:[%s10063_s9 + $0x58] sm:$0xf0] }
 0x572   :  { %5165 = vmatpush.bf16.msra.mxu2 %v7279_v33  ;;  %5178 = vmatpush.bf16.msra.mxu3 %v7343_v21  ;;  %v7000_v12 = vld [vmem:[%s10063_s9 + $0xd8] sm:$0xf0]  ;;  %v6939_v21 = vor.u32 %v7806_v5, %v6936_v8  ;;  %v6976_v8 = vld [vmem:[%s10063_s9 + $0xa8] sm:$0xf0] }
 0x5b0   :  { %v4116_v22 = vpop.f32.mrf.mxu0  ;;  %v4136_v23 = vpop.f32.mrf.mxu1 }
 0x5b1   :  { %v4259_v3 = vperm.slane %v4116_v22, 0  ;;  %v4260_v24 = vperm.slane %v4136_v23, 0  ;;  %v4275_v26 = vperm.slane %v4116_v22, 1  ;;  %v4276_v30 = vperm.slane %v4136_v23, 1 }
 0x5b2   :  { %v7003_v22 = vor.u32 %v7822_v11, %v7000_v12  ;;  %v7123_v12 = vor.u32 %v7852_v44, %v7120_v20  ;;  %v7844_v44 = vld [vmem:[%s10063_s9 + $0x184] sm:$0xf]  ;;  %v7088_v20 = vld [vmem:[%s10063_s9 + $0x188] sm:$0xf0] }
 0x5b3   :  { %v4267_v25 = vmul.f32 %v4259_v3, %v8777_v40  ;;  %v4268_v29 = vmul.f32 %v4260_v24, %v8786_v13  ;;  %v7016_v40 = vld [vmem:[%s10063_s9 + $0xf8] sm:$0xf0] }
 0x5b4   :  { %v7019_v50 = vor.u32 %v7826_v35, %v7016_v40  ;;  %v7075_v35 = vor.u32 %v7840_v41, %v7072_v17  ;;  %v7112_v41 = vld [vmem:[%s10063_s9 + $0x1b8] sm:$0xf0] }
 0x5b5   :  { %v4283_v32 = vadd.f32 %v4275_v26, %v4267_v25  ;;  %v4284_v34 = vadd.f32 %v4276_v30, %v4268_v29  ;;  %v7804_v26 = vld [vmem:[%s10063_s9 + $0x44] sm:$0xf]  ;;  %v6928_v29 = vld [vmem:[%s10063_s9 + $0x48] sm:$0xf0] }
 0x5b7   :  { %v4291_v13 = vmax.f32 %v4283_v32, 0.0  ;;  %v4292_v37 = vmax.f32 %v4284_v34, 0.0  ;;  %v4156_v38 = vpop.f32.mrf.mxu2  ;;  %v4176_v39 = vpop.f32.mrf.mxu3  ;;  %v6992_v32 = vld [vmem:[%s10063_s9 + $0xc8] sm:$0xf0] }
 0x5b8   :  { %v4261_v42 = vperm.slane %v4156_v38, 0  ;;  %v4262_v43 = vperm.slane %v4176_v39, 0  ;;  %v4196_v46 = vpop.f32.mrf.mxu0  ;;  %v4216_v47 = vpop.f32.mrf.mxu1  ;;  %v4277_v59 = vperm.slane %v4156_v38, 1  ;;  %v4278_v60 = vperm.slane %v4176_v39, 1 }
 0x5b9   :  { %v9647_v57 = vpack.c.bf16 %v4291_v13, %v4291_v13  ;;  %v9649_v58 = vpack.c.bf16 %v4292_v37, %v4292_v37  ;;  %v4263_v0 = vperm.slane %v4196_v46, 0  ;;  %v4264_v1 = vperm.slane %v4216_v47, 0  ;;  %v7838_v37 = vld [vmem:[%s10063_s9 + $0x154] sm:$0xf] }
 0x5ba   :  { %v4269_v63 = vmul.f32 %v4261_v42, %v8815_v19  ;;  %v4270_v7 = vmul.f32 %v4262_v43, %v8920_v2  ;;  %v7858_v19 = vld [vmem:[%s10063_s9 + $0x1f4] sm:$0xf]  ;;  %v7144_v2 = vld [vmem:[%s10063_s9 + $0x1f8] sm:$0xf0]  ;;  %v4279_v54 = vperm.slane %v4196_v46, 1  ;;  %v4280_v24 = vperm.slane %v4216_v47, 1 }
 0x5bb   :  { %5088 = vmatmul.bf16.vlgmr.msrb.gmra.mxu0 %v9647_v57  ;;  %5101 = vmatmul.bf16.vlgmr.msrb.gmra.mxu1 %v9649_v58  ;;  %v4271_v16 = vmul.f32 %v4263_v0, %v9051_v51  ;;  %v4272_v36 = vmul.f32 %v4264_v1, %v9128_v10  ;;  %v7147_v18 = vor.u32 %v7858_v19, %v7144_v2  ;;  %v7856_v51 = vld [vmem:[%s10063_s9 + $0x1e4] sm:$0xf]  ;;  %v7136_v10 = vld [vmem:[%s10063_s9 + $0x1e8] sm:$0xf0]  ;;  %v7064_v43 = vld [vmem:[%s10063_s9 + $0x158] sm:$0xf0] }
 0x5bc   :  { %v4285_v6 = vadd.f32 %v4277_v59, %v4269_v63  ;;  %v4286_v49 = vadd.f32 %v4278_v60, %v4270_v7  ;;  %5184 = vmatpush.bf16.msrb.mxu0 %v6955_v48  ;;  %5197 = vmatpush.bf16.msrb.mxu1 %v7019_v50  ;;  %v7139_v40 = vor.u32 %v7856_v51, %v7136_v10  ;;  %v7854_v46 = vld [vmem:[%s10063_s9 + $0x1d4] sm:$0xf]  ;;  %v7128_v47 = vld [vmem:[%s10063_s9 + $0x1d8] sm:$0xf0]  ;;  %v7836_v63 = vld [vmem:[%s10063_s9 + $0x144] sm:$0xf] }
 0x5bd   :  { %v4287_v34 = vadd.f32 %v4279_v54, %v4271_v16  ;;  %v4288_v9 = vadd.f32 %v4280_v24, %v4272_v36  ;;  %v6931_v13 = vor.u32 %v7804_v26, %v6928_v29  ;;  %v6995_v42 = vor.u32 %v7820_v31, %v6992_v32  ;;  %v7818_v48 = vld [vmem:[%s10063_s9 + $0xb4] sm:$0xf]  ;;  %v6984_v60 = vld [vmem:[%s10063_s9 + $0xb8] sm:$0xf0]  ;;  %v7056_v1 = vld [vmem:[%s10063_s9 + $0x148] sm:$0xf0] }
 0x5be   :  { %v4293_v28 = vmax.f32 %v4285_v6, 0.0  ;;  %v4294_v15 = vmax.f32 %v4286_v49, 0.0  ;;  %v7067_v61 = vor.u32 %v7838_v37, %v7064_v43  ;;  %v7131_v62 = vor.u32 %v7854_v46, %v7128_v47  ;;  %v7800_v2 = vld [vmem:[%s10063_s9 + $0x24] sm:$0xf]  ;;  %v6912_v49 = vld [vmem:[%s10063_s9 + $0x28] sm:$0xf0] }
 0x5bf   :  { %v4236_v33 = vpop.f32.mrf.mxu2  ;;  %v4256_v55 = vpop.f32.mrf.mxu3  ;;  %v4295_v50 = vmax.f32 %v4287_v34, 0.0  ;;  %v4296_v52 = vmax.f32 %v4288_v9, 0.0  ;;  %v6987_v19 = vor.u32 %v7818_v48, %v6984_v60  ;;  %v7059_v11 = vor.u32 %v7836_v63, %v7056_v1  ;;  %v7850_v36 = vld [vmem:[%s10063_s9 + $0x1b4] sm:$0xf]  ;;  %v7832_v10 = vld [vmem:[%s10063_s9 + $0x124] sm:$0xf] }
 0x5c0   :  { %v9699_v23 = vpack.c.bf16 %v4293_v28, %v4293_v28  ;;  %v9701_v3 = vpack.c.bf16 %v4294_v15, %v4294_v15  ;;  %v4265_v25 = vperm.slane %v4236_v33, 0  ;;  %5185 = vmatpush.bf16.msrb.mxu0 %v6947_v4  ;;  %5198 = vmatpush.bf16.msrb.mxu1 %v7011_v27  ;;  %v4266_v30 = vperm.slane %v4256_v55, 0  ;;  %v7816_v27 = vld [vmem:[%s10063_s9 + $0xa4] sm:$0xf]  ;;  %v7048_v28 = vld [vmem:[%s10063_s9 + $0x138] sm:$0xf0] }
 0x5c1   :  { %v4281_v53 = vperm.slane %v4236_v33, 1  ;;  %v4282_v59 = vperm.slane %v4256_v55, 1  ;;  %v9758_v5 = vpack.c.bf16 %v4295_v50, %v4295_v50  ;;  %v9760_v6 = vpack.c.bf16 %v4296_v52, %v4296_v52  ;;  %v7798_v33 = vld [vmem:[%s10063_s9 + $0x14] sm:$0xf]  ;;  %v6904_v55 = vld [vmem:[%s10063_s9 + $0x18] sm:$0xf0] }
 0x5c2   :  { %5114 = vmatmul.bf16.vlgmr.msrb.gmra.mxu2 %v9699_v23  ;;  %5127 = vmatmul.bf16.vlgmr.msrb.gmra.mxu3 %v9701_v3  ;;  %v4273_v38 = vmul.f32 %v4265_v25, %v9184_v45  ;;  %v4274_v39 = vmul.f32 %v4266_v30, %v9219_v56  ;;  %v7802_v45 = vld [vmem:[%s10063_s9 + $0x34] sm:$0xf]  ;;  %v6920_v56 = vld [vmem:[%s10063_s9 + $0x38] sm:$0xf0]  ;;  %v6915_v17 = vor.u32 %v7800_v2, %v6912_v49  ;;  %v7040_v26 = vld [vmem:[%s10063_s9 + $0x128] sm:$0xf0] }
 0x5c3   :  { %5210 = vmatpush.bf16.msrb.mxu2 %v7083_v14  ;;  %5223 = vmatpush.bf16.msrb.mxu3 %v7147_v18  ;;  %v6923_v4 = vor.u32 %v7802_v45, %v6920_v56  ;;  %v7834_v14 = vld [vmem:[%s10063_s9 + $0x134] sm:$0xf]  ;;  %v6979_v54 = vor.u32 %v7816_v27, %v6976_v8  ;;  %v7115_v51 = vor.u32 %v7850_v36, %v7112_v41  ;;  %v7848_v29 = vld [vmem:[%s10063_s9 + $0x1a4] sm:$0xf]  ;;  %v7104_v30 = vld [vmem:[%s10063_s9 + $0x1a8] sm:$0xf0] }
 0x5c4   :  { %5186 = vmatpush.bf16.msrb.mxu0 %v6939_v21  ;;  %5199 = vmatpush.bf16.msrb.mxu1 %v7003_v22  ;;  %v4289_v7 = vadd.f32 %v4281_v53, %v4273_v38  ;;  %v4290_v0 = vadd.f32 %v4282_v59, %v4274_v39  ;;  %v7814_v18 = vld [vmem:[%s10063_s9 + $0x94] sm:$0xf]  ;;  %v6968_v21 = vld [vmem:[%s10063_s9 + $0x98] sm:$0xf0]  ;;  %v7051_v22 = vor.u32 %v7834_v14, %v7048_v28  ;;  %v7796_v34 = vld [vmem:[%s10063_s9 + $0x4] sm:$0xf] }
 0x5c5   :  { %v6907_v31 = vor.u32 %v7798_v33, %v6904_v55  ;;  %v6971_v32 = vor.u32 %v7814_v18, %v6968_v21  ;;  %v6896_v9 = vld [vmem:[%s10063_s9 + $0x8] sm:$0xf0]  ;;  %v7208_v37 = vld [vmem:[%s10063_s9 + $0x278] sm:$0xf0]  ;;  %v7043_v38 = vor.u32 %v7832_v10, %v7040_v26  ;;  %v7107_v39 = vor.u32 %v7848_v29, %v7104_v30  ;;  %v7830_v46 = vld [vmem:[%s10063_s9 + $0x114] sm:$0xf] }
 0x5c6   :  { %v4297_v15 = vmax.f32 %v4289_v7, 0.0  ;;  %v4298_v16 = vmax.f32 %v4290_v0, 0.0  ;;  %v7272_v43 = vld [vmem:[%s10063_s9 + $0x2f8] sm:$0xf0]  ;;  %v7846_v45 = vld [vmem:[%s10063_s9 + $0x194] sm:$0xf]  ;;  %v6899_v48 = vor.u32 %v7796_v34, %v6896_v9  ;;  %v7091_v14 = vor.u32 %v7844_v44, %v7088_v20 }
 0x5c7   :  { %5211 = vmatpush.bf16.msrb.mxu2 %v7075_v35  ;;  %5224 = vmatpush.bf16.msrb.mxu3 %v7139_v40  ;;  %v7812_v35 = vld [vmem:[%s10063_s9 + $0x84] sm:$0xf]  ;;  %v6960_v40 = vld [vmem:[%s10063_s9 + $0x88] sm:$0xf0]  ;;  %v7032_v47 = vld [vmem:[%s10063_s9 + $0x118] sm:$0xf0] }
 0x5c8   :  { %5187 = vmatpush.bf16.msrb.mxu0 %v6931_v13  ;;  %5200 = vmatpush.bf16.msrb.mxu1 %v6995_v42  ;;  %v9800_v24 = vpack.c.bf16 %v4297_v15, %v4297_v15  ;;  %v9802_v25 = vpack.c.bf16 %v4298_v16, %v4298_v16  ;;  %v7874_v13 = vld [vmem:[%s10063_s9 + $0x274] sm:$0xf]  ;;  %v7096_v56 = vld [vmem:[%s10063_s9 + $0x198] sm:$0xf0]  ;;  %v6963_v50 = vor.u32 %v7812_v35, %v6960_v40  ;;  %v7872_v59 = vld [vmem:[%s10063_s9 + $0x264] sm:$0xf] }
 0x5c9   :  { %v7890_v42 = vld [vmem:[%s10063_s9 + $0x2f4] sm:$0xf]  ;;  %v7211_v52 = vor.u32 %v7874_v13, %v7208_v37  ;;  %v7200_v60 = vld [vmem:[%s10063_s9 + $0x268] sm:$0xf0]  ;;  %v7099_v63 = vor.u32 %v7846_v45, %v7096_v56  ;;  %v7828_v0 = vld [vmem:[%s10063_s9 + $0x104] sm:$0xf] }
 0x5ca   :  { %v7275_v53 = vor.u32 %v7890_v42, %v7272_v43  ;;  %v7264_v7 = vld [vmem:[%s10063_s9 + $0x2e8] sm:$0xf0]  ;;  %v7922_v2 = vld [vmem:[%s10063_s9 + $0x3f4] sm:$0xf]  ;;  %v7400_v49 = vld [vmem:[%s10063_s9 + $0x3f8] sm:$0xf0]  ;;  %v7203_v27 = vor.u32 %v7872_v59, %v7200_v60 }
 0x5cb   :  { %5212 = vmatpush.bf16.msrb.mxu2 %v7067_v61  ;;  %5225 = vmatpush.bf16.msrb.mxu3 %v7131_v62  ;;  %v7888_v61 = vld [vmem:[%s10063_s9 + $0x2e4] sm:$0xf]  ;;  %v7035_v62 = vor.u32 %v7830_v46, %v7032_v47  ;;  %v7024_v1 = vld [vmem:[%s10063_s9 + $0x108] sm:$0xf0]  ;;  %v7192_v28 = vld [vmem:[%s10063_s9 + $0x258] sm:$0xf0]  ;;  %v7403_v41 = vor.u32 %v7922_v2, %v7400_v49 }
 0x5cc   :  { %5140 = vmatmul.bf16.vlgmr.msra.gmra.mxu0 %v9758_v5  ;;  %5153 = vmatmul.bf16.vlgmr.msra.gmra.mxu1 %v9760_v6  ;;  %v7267_v8 = vor.u32 %v7888_v61, %v7264_v7  ;;  %v7886_v15 = vld [vmem:[%s10063_s9 + $0x2d4] sm:$0xf]  ;;  %v7256_v16 = vld [vmem:[%s10063_s9 + $0x2d8] sm:$0xf0]  ;;  %v7920_v33 = vld [vmem:[%s10063_s9 + $0x3e4] sm:$0xf] }
 0x5cd   :  { %5188 = vmatpush.bf16.msrb.mxu0 %v6923_v4  ;;  %5201 = vmatpush.bf16.msrb.mxu1 %v6987_v19  ;;  %v7906_v4 = vld [vmem:[%s10063_s9 + $0x374] sm:$0xf]  ;;  %v7336_v19 = vld [vmem:[%s10063_s9 + $0x378] sm:$0xf0]  ;;  %v7259_v55 = vor.u32 %v7886_v15, %v7256_v16  ;;  %v7868_v18 = vld [vmem:[%s10063_s9 + $0x244] sm:$0xf] }
 0x5ce   :  { %v7339_v36 = vor.u32 %v7906_v4, %v7336_v19  ;;  %v7184_v21 = vld [vmem:[%s10063_s9 + $0x248] sm:$0xf0]  ;;  %v7902_v29 = vld [vmem:[%s10063_s9 + $0x354] sm:$0xf]  ;;  %v7320_v30 = vld [vmem:[%s10063_s9 + $0x358] sm:$0xf0] }
 0x5cf   :  { %5213 = vmatpush.bf16.msrb.mxu2 %v7059_v11  ;;  %5226 = vmatpush.bf16.msrb.mxu3 %v7123_v12  ;;  %v7870_v11 = vld [vmem:[%s10063_s9 + $0x254] sm:$0xf]  ;;  %v7027_v12 = vor.u32 %v7828_v0, %v7024_v1  ;;  %v7187_v34 = vor.u32 %v7868_v18, %v7184_v21  ;;  %v7176_v40 = vld [vmem:[%s10063_s9 + $0x238] sm:$0xf0]  ;;  %v7916_v42 = vld [vmem:[%s10063_s9 + $0x3c4] sm:$0xf] }
 0x5d0   :  { %v7866_v35 = vld [vmem:[%s10063_s9 + $0x234] sm:$0xf]  ;;  %v7240_v37 = vld [vmem:[%s10063_s9 + $0x2b8] sm:$0xf0]  ;;  %v7376_v43 = vld [vmem:[%s10063_s9 + $0x3c8] sm:$0xf0] }
 0x5d1   :  { %5189 = vmatpush.bf16.msrb.mxu0 %v6915_v17  ;;  %5202 = vmatpush.bf16.msrb.mxu1 %v6979_v54  ;;  %v7904_v17 = vld [vmem:[%s10063_s9 + $0x364] sm:$0xf]  ;;  %v7328_v54 = vld [vmem:[%s10063_s9 + $0x368] sm:$0xf0]  ;;  %v7882_v13 = vld [vmem:[%s10063_s9 + $0x2b4] sm:$0xf]  ;;  %v7179_v46 = vor.u32 %v7866_v35, %v7176_v40 }
 0x5d2   :  { %5166 = vmatmul.bf16.vlgmr.msra.gmra.mxu2 %v9800_v24  ;;  %5179 = vmatmul.bf16.vlgmr.msra.gmra.mxu3 %v9802_v25  ;;  %v7331_v10 = vor.u32 %v7904_v17, %v7328_v54  ;;  %v7243_v47 = vor.u32 %v7882_v13, %v7240_v37  ;;  %v7864_v45 = vld [vmem:[%s10063_s9 + $0x224] sm:$0xf]  ;;  %v7168_v56 = vld [vmem:[%s10063_s9 + $0x228] sm:$0xf0]  ;;  %v7898_v59 = vld [vmem:[%s10063_s9 + $0x334] sm:$0xf] }
 0x5d3   :  { %5214 = vmatpush.bf16.msrb.mxu2 %v7051_v22  ;;  %5227 = vmatpush.bf16.msrb.mxu3 %v7115_v51  ;;  %v7884_v22 = vld [vmem:[%s10063_s9 + $0x2c4] sm:$0xf]  ;;  %v7248_v51 = vld [vmem:[%s10063_s9 + $0x2c8] sm:$0xf0]  ;;  %v7304_v60 = vld [vmem:[%s10063_s9 + $0x338] sm:$0xf0] }
 0x5d4   :  { %v7251_v9 = vor.u32 %v7884_v22, %v7248_v51  ;;  %v7914_v61 = vld [vmem:[%s10063_s9 + $0x3b4] sm:$0xf]  ;;  %v7160_v1 = vld [vmem:[%s10063_s9 + $0x218] sm:$0xf0]  ;;  %v7307_v4 = vor.u32 %v7898_v59, %v7304_v60  ;;  %v7896_v2 = vld [vmem:[%s10063_s9 + $0x324] sm:$0xf] }
 0x5d5   :  { %5190 = vmatpush.bf16.msrb.mxu0 %v6907_v31  ;;  %5203 = vmatpush.bf16.msrb.mxu1 %v6971_v32  ;;  %v7918_v31 = vld [vmem:[%s10063_s9 + $0x3d4] sm:$0xf]  ;;  %v7384_v32 = vld [vmem:[%s10063_s9 + $0x3d8] sm:$0xf0]  ;;  %v7296_v49 = vld [vmem:[%s10063_s9 + $0x328] sm:$0xf0] }
 0x5d6   :  { %v7862_v0 = vld [vmem:[%s10063_s9 + $0x214] sm:$0xf]  ;;  %v7224_v20 = vld [vmem:[%s10063_s9 + $0x298] sm:$0xf0]  ;;  %v7876_v15 = vld [vmem:[%s10063_s9 + $0x284] sm:$0xf] }
 0x5d7   :  { %5215 = vmatpush.bf16.msrb.mxu2 %v7043_v38  ;;  %5228 = vmatpush.bf16.msrb.mxu3 %v7107_v39  ;;  %v7323_v38 = vor.u32 %v7902_v29, %v7320_v30  ;;  %v7387_v39 = vor.u32 %v7918_v31, %v7384_v32  ;;  %v7878_v44 = vld [vmem:[%s10063_s9 + $0x294] sm:$0xf]  ;;  %v7216_v16 = vld [vmem:[%s10063_s9 + $0x288] sm:$0xf0]  ;;  %v7288_v54 = vld [vmem:[%s10063_s9 + $0x318] sm:$0xf0] }
 0x5d8   :  { %v7894_v17 = vld [vmem:[%s10063_s9 + $0x314] sm:$0xf]  ;;  %v7892_v22 = vld [vmem:[%s10063_s9 + $0x304] sm:$0xf]  ;;  %v7280_v51 = vld [vmem:[%s10063_s9 + $0x308] sm:$0xf0] }
 0x5d9   :  { %5191 = vmatpush.bf16.msrb.mxu0 %v6899_v48  ;;  %5204 = vmatpush.bf16.msrb.mxu1 %v6963_v50  ;;  %v7880_v48 = vld [vmem:[%s10063_s9 + $0x2a4] sm:$0xf]  ;;  %v7232_v50 = vld [vmem:[%s10063_s9 + $0x2a8] sm:$0xf0]  ;;  %v7291_v18 = vor.u32 %v7894_v17, %v7288_v54  ;;  %v7283_v29 = vor.u32 %v7892_v22, %v7280_v51 }
 0x5da   :  { %v7235_v7 = vor.u32 %v7880_v48, %v7232_v50 }
 0x5db   :  { %5216 = vmatpush.bf16.msrb.mxu2 %v7035_v62  ;;  %5229 = vmatpush.bf16.msrb.mxu3 %v7099_v63  ;;  %v7368_v62 = vld [vmem:[%s10063_s9 + $0x3b8] sm:$0xf0]  ;;  %v7171_v63 = vor.u32 %v7864_v45, %v7168_v56 }
 0x5dc   :  { %5192 = vmatmul.bf16.vlgmr.msrb.gmra.mxu0 %v9647_v57  ;;  %5205 = vmatmul.bf16.vlgmr.msrb.gmra.mxu1 %v9649_v58  ;;  %v7392_v57 = vld [vmem:[%s10063_s9 + $0x3e8] sm:$0xf0]  ;;  %v7195_v58 = vor.u32 %v7870_v11, %v7192_v28  ;;  %v7371_v19 = vor.u32 %v7914_v61, %v7368_v62  ;;  %v7163_v11 = vor.u32 %v7862_v0, %v7160_v1 }
 0x5dd   :  { %5236 = vmatpush.bf16.msra.mxu0 %v7211_v52  ;;  %5249 = vmatpush.bf16.msra.mxu1 %v7275_v53  ;;  %v7395_v26 = vor.u32 %v7920_v33, %v7392_v57  ;;  %v7379_v53 = vor.u32 %v7916_v42, %v7376_v43  ;;  %v7152_v28 = vld [vmem:[%s10063_s9 + $0x208] sm:$0xf0]  ;;  %v7910_v33 = vld [vmem:[%s10063_s9 + $0x394] sm:$0xf]  ;;  %v7352_v57 = vld [vmem:[%s10063_s9 + $0x398] sm:$0xf0] }
 0x5de   :  { %v7355_v21 = vor.u32 %v7910_v33, %v7352_v57 }
 0x5df   :  { %5217 = vmatpush.bf16.msrb.mxu2 %v7027_v12  ;;  %5230 = vmatpush.bf16.msrb.mxu3 %v7091_v14  ;;  %v7227_v12 = vor.u32 %v7878_v44, %v7224_v20  ;;  %v7860_v14 = vld [vmem:[%s10063_s9 + $0x204] sm:$0xf] }
 0x5e1   :  { %5237 = vmatpush.bf16.msra.mxu0 %v7203_v27  ;;  %5250 = vmatpush.bf16.msra.mxu1 %v7267_v8  ;;  %v7912_v27 = vld [vmem:[%s10063_s9 + $0x3a4] sm:$0xf]  ;;  %v7360_v8 = vld [vmem:[%s10063_s9 + $0x3a8] sm:$0xf0] }
 0x5e2   :  { %5218 = vmatmul.bf16.vlgmr.msrb.gmra.mxu2 %v9699_v23  ;;  %5231 = vmatmul.bf16.vlgmr.msrb.gmra.mxu3 %v9701_v3  ;;  %v7900_v23 = vld [vmem:[%s10063_s9 + $0x344] sm:$0xf]  ;;  %v7312_v3 = vld [vmem:[%s10063_s9 + $0x348] sm:$0xf0] }
 0x5e3   :  { %5262 = vmatpush.bf16.msra.mxu2 %v7339_v36  ;;  %5275 = vmatpush.bf16.msra.mxu3 %v7403_v41  ;;  %v7315_v52 = vor.u32 %v7900_v23, %v7312_v3  ;;  %v7299_v36 = vor.u32 %v7896_v2, %v7296_v49  ;;  %v7363_v41 = vor.u32 %v7912_v27, %v7360_v8 }
 0x5e5   :  { %5238 = vmatpush.bf16.msra.mxu0 %v7195_v58  ;;  %5251 = vmatpush.bf16.msra.mxu1 %v7259_v55  ;;  %v7155_v58 = vor.u32 %v7860_v14, %v7152_v28  ;;  %v7219_v55 = vor.u32 %v7876_v15, %v7216_v16 }
 0x5e7   :  { %5263 = vmatpush.bf16.msra.mxu2 %v7331_v10  ;;  %5276 = vmatpush.bf16.msra.mxu3 %v7395_v26  ;;  %v7908_v10 = vld [vmem:[%s10063_s9 + $0x384] sm:$0xf]  ;;  %v7344_v26 = vld [vmem:[%s10063_s9 + $0x388] sm:$0xf0]  ;;  %s8165_s9 = smov [#allocation14]  }
 0x5e8   :  { %v7347_v30 = vor.u32 %v7908_v10, %v7344_v26  ;;  %s5297_s22 = sshll.u32 %s8165_s9, 4  ;;  %s5298_s22 = int_to_ptr.vmem [resolvable:$true] %s5297_s22 }
 0x5e9   :  { %5239 = vmatpush.bf16.msra.mxu0 %v7187_v34  ;;  %5252 = vmatpush.bf16.msra.mxu1 %v7251_v9  ;;  %v149_v34 = vld [vmem:[#allocation13 + $0x6] sm:$0x3] }
 0x5ea   :  { %v4436_v9 = vperm.slane %v149_v34, 0  ;;  %v4437_v1 = vperm.slane %v149_v34, 1 }
 0x5eb   :  { %5264 = vmatpush.bf16.msra.mxu2 %v7323_v38  ;;  %5277 = vmatpush.bf16.msra.mxu3 %v7387_v39 }
 0x5ed   :  { %5240 = vmatpush.bf16.msra.mxu0 %v7179_v46  ;;  %5253 = vmatpush.bf16.msra.mxu1 %v7243_v47 }
 0x5ef   :  { %5265 = vmatpush.bf16.msra.mxu2 %v7315_v52  ;;  %5278 = vmatpush.bf16.msra.mxu3 %v7379_v53 }
 0x5f1   :  { %5241 = vmatpush.bf16.msra.mxu0 %v7171_v63  ;;  %5254 = vmatpush.bf16.msra.mxu1 %v7235_v7 }
 0x5f3   :  { %5266 = vmatpush.bf16.msra.mxu2 %v7307_v4  ;;  %5279 = vmatpush.bf16.msra.mxu3 %v7371_v19 }
 0x5f5   :  { %5242 = vmatpush.bf16.msra.mxu0 %v7163_v11  ;;  %5255 = vmatpush.bf16.msra.mxu1 %v7227_v12 }
 0x5f7   :  { %5267 = vmatpush.bf16.msra.mxu2 %v7299_v36  ;;  %5280 = vmatpush.bf16.msra.mxu3 %v7363_v41 }
 0x5f9   :  { %5243 = vmatpush.bf16.msra.mxu0 %v7155_v58  ;;  %5256 = vmatpush.bf16.msra.mxu1 %v7219_v55 }
 0x5fb   :  { %5268 = vmatpush.bf16.msra.mxu2 %v7291_v18  ;;  %5281 = vmatpush.bf16.msra.mxu3 %v7355_v21 }
 0x5fc   :  { %5244 = vmatmul.bf16.vlgmr.msra.gmra.mxu0 %v9758_v5  ;;  %5257 = vmatmul.bf16.vlgmr.msra.gmra.mxu1 %v9760_v6 }
 0x5ff   :  { %5269 = vmatpush.bf16.msra.mxu2 %v7283_v29  ;;  %5282 = vmatpush.bf16.msra.mxu3 %v7347_v30 }
 0x602   :  { %5270 = vmatmul.bf16.vlgmr.msra.gmra.mxu2 %v9800_v24  ;;  %5283 = vmatmul.bf16.vlgmr.msra.gmra.mxu3 %v9802_v25 }
 0x638   :  { %v5089_v31 = vpop.f32.mrf.mxu0  ;;  %v5102_v32 = vpop.f32.mrf.mxu1 }
 0x639   :  { %v5090_v13 = vadd.f32 %v5089_v31, %v4436_v9 }
 0x63b   :  { %v5103_v39 = vadd.f32 %v5102_v32, %v5090_v13 }
 0x640   :  { %v5091_v35 = vpop.f32.mrf.mxu0  ;;  %v5104_v40 = vpop.f32.mrf.mxu1 }
 0x645   :  { %v5115_v37 = vpop.f32.mrf.mxu2  ;;  %v5128_v38 = vpop.f32.mrf.mxu3 }
 0x646   :  { %v5116_v23 = vadd.f32 %v5115_v37, %v5103_v39 }
 0x648   :  { %v5129_v6 = vadd.f32 %v5128_v38, %v5116_v23 }
 0x649   :  { %v5141_v5 = vpop.f32.mrf.mxu0  ;;  %v5154_v3 = vpop.f32.mrf.mxu1 }
 0x64a   :  { %v5142_v46 = vadd.f32 %v5141_v5, %v5129_v6 }
 0x64c   :  { %v5155_v25 = vadd.f32 %v5154_v3, %v5142_v46 }
 0x64d   :  { %v5117_v42 = vpop.f32.mrf.mxu2  ;;  %v5130_v43 = vpop.f32.mrf.mxu3 }
 0x651   :  { %v5143_v24 = vpop.f32.mrf.mxu0  ;;  %v5156_v47 = vpop.f32.mrf.mxu1 }
 0x655   :  { %v5167_v45 = vpop.f32.mrf.mxu2  ;;  %v5180_v56 = vpop.f32.mrf.mxu3 }
 0x656   :  { %v5168_v48 = vadd.f32 %v5167_v45, %v5155_v25 }
 0x658   :  { %v5181_v50 = vadd.f32 %v5180_v56, %v5168_v48 }
 0x659   :  { %v5193_v52 = vpop.f32.mrf.mxu0  ;;  %v5206_v53 = vpop.f32.mrf.mxu1 }
 0x65a   :  { %7944 = vtanh.f32 %v5181_v50  ;;  %v5194_v4 = vadd.f32 %v5193_v52, %v4437_v1 }
 0x65c   :  { %v5207_v19 = vadd.f32 %v5206_v53, %v5194_v4 }
 0x65d   :  { %v5169_v59 = vpop.f32.mrf.mxu2  ;;  %v5182_v60 = vpop.f32.mrf.mxu3 }
 0x660   :  { %v7945_v61 = vpop.eup %7944 }
 0x661   :  { %5290 = vst [vmem:[#allocation14] sm:$0xff] %v7945_v61  ;;  %v5195_v62 = vpop.f32.mrf.mxu0  ;;  %v5208_v63 = vpop.f32.mrf.mxu1 }
 0x665   :  { %v5219_v7 = vpop.f32.mrf.mxu2  ;;  %v5232_v0 = vpop.f32.mrf.mxu3 }
 0x666   :  { %v5220_v27 = vadd.f32 %v5219_v7, %v5207_v19 }
 0x668   :  { %v5233_v8 = vadd.f32 %v5232_v0, %v5220_v27 }
 0x66d   :  { %v5221_v44 = vpop.f32.mrf.mxu2  ;;  %v5234_v20 = vpop.f32.mrf.mxu3 }
 0x679   :  { %v5245_v2 = vpop.f32.mrf.mxu0  ;;  %v5258_v49 = vpop.f32.mrf.mxu1 }
 0x67a   :  { %v5246_v11 = vadd.f32 %v5245_v2, %v5233_v8 }
 0x67c   :  { %v5259_v28 = vadd.f32 %v5258_v49, %v5246_v11 }
 0x681   :  { %v5247_v12 = vpop.f32.mrf.mxu0  ;;  %v5260_v14 = vpop.f32.mrf.mxu1 }
 0x685   :  { %v5271_v15 = vpop.f32.mrf.mxu2  ;;  %v5284_v16 = vpop.f32.mrf.mxu3 }
 0x686   :  { %v5272_v36 = vadd.f32 %v5271_v15, %v5259_v28 }
 0x688   :  { %v5285_v41 = vadd.f32 %v5284_v16, %v5272_v36 }
 0x68a   :  { %7946 = vtanh.f32 %v5285_v41 }
 0x68d   :  { %v5273_v17 = vpop.f32.mrf.mxu2  ;;  %v5286_v54 = vpop.f32.mrf.mxu3 }
 0x690   :  { %v7947_v33 = vpop.eup %7946 }
 0x691   :  { %5291 = vst [vmem:[#allocation14 + $0x8] sm:$0xff] %v7947_v33 }
 0x692   :  { %5302 = dma.vmem_to_hbm [thread:$0]  %s5298_s22, 256, %s5300_s24, [#allocation4]  }
 0x693   :  { %8148 = dma.done.wait [#allocation4], 256  }
 0x694   :  { %8149 = vsyncadd [#allocation4], 4294967040 }
 0x695   :  { %5307 = vsyncpa [#allocation3], 1 }
 0x696   :  { %5308 = vsyncpa [#allocation6], 1 }
 0x697   :  { %5309 = vsyncpa [#allocation9], 1 }
 0x698   :  { %5310 = vsyncpa [#allocation12], 1 }
 0x699   :  { %5311 = vsyncpa [#allocation4], 1 }

</bundles_post_ra>
